<compile_context>
chip_gen: v6e
topology: v6e:2x2x1
jax: 0.10.0
libtpu: 0.0.40
codegen_flags: <defaults>
</compile_context>

<pallas_src>
import functools

import jax
import jax.numpy as jnp
import numpy as np
from jax.experimental import pallas as pl
from jax.experimental.pallas import tpu as pltpu

LANE = 128
SUBLANE = 8


# ------------------------------ small helpers -------------------------------

def _round_up(x, m):
    return (x + m - 1) // m * m


def _pad2(x, shape, dtype):
    out = jnp.zeros(shape, dtype)
    return out.at[: x.shape[0], : x.shape[1]].set(x.astype(dtype))


def _vmem_caps():
    """(vmem_limit_bytes, tile_budget_bytes), generation aware, safe fallback."""
    try:
        kind = jax.devices()[0].device_kind.lower()
    except Exception:  # pragma: no cover - defensive
        kind = ""
    if any(t in kind for t in ("v2", "v3", "v4", "v5", "v6")):
        return 100 * 2**20, 80 * 2**20     # 128 MiB physical VMEM generations
    return 48 * 2**20, 36 * 2**20          # v7x (64 MiB physical) / unknown


def _choose_tiles(np0, budget, tm_target, tk_target):
    """Row tile tm (<= Np/2 so v7x's 2 TCs both get work) and reduction tile tk
    (multiple of tm so padding N up to a multiple of tk is enough)."""
    tm = min(_round_up(tm_target, LANE), np0)
    half = (np0 // 2) // LANE * LANE
    if half >= LANE:
        tm = min(tm, half)
    tk = min(_round_up(tk_target, LANE), np0)
    tk = max(tm, (tk // tm) * tm)
    # keep the double-buffered A stream within ~1/3 of the tile budget
    while tk > tm and 2 * (tm * tk * 2) > budget // 3:
        tk -= tm
    return tm, tk


def _tile_structure(a_p, tm, tk):
    """Per-row-block compacted list of nonzero A column tiles + counts.

    col_idx[i, k] for k >= nnz[i] repeats the last nonzero tile index, so the
    pipeline never re-fetches (same block index) and the kernel skips the dot.
    """
    np_ = a_p.shape[0]
    nb_i, nb_k = np_ // tm, np_ // tk
    mask = (a_p != 0).reshape(nb_i, tm, nb_k, tk).any(axis=(1, 3))     # [nb_i, nb_k]
    order = jnp.argsort((~mask).astype(jnp.int32), axis=1).astype(jnp.int32)
    nnz = mask.sum(axis=1).astype(jnp.int32)                            # [nb_i]
    kpos = jnp.arange(nb_k, dtype=jnp.int32)[None, :]
    clamp = jnp.minimum(kpos, jnp.maximum(nnz[:, None] - 1, 0))
    col_idx = jnp.take_along_axis(order, clamp, axis=1).astype(jnp.int32)
    return col_idx, nnz


# ------------------------------ Pallas kernels ------------------------------

def _make_gcn_layer_kernel(tk, x_resident, fuse_pool):
    """GCN layer row-block kernel, reassociated as (A @ X) @ W.

    Grid = (row blocks [parallel], column tiles [arbitrary / reduction]).
    f32 accumulator in VMEM scratch; bias + ReLU only at the last k step.
    If fuse_pool: the epilogue also emits pool[:, i_block] @ h (partial mean
    pool) instead of writing the activation back to HBM.
    """

    def kernel(ci_ref, nz_ref, a_ref, x_ref, w_ref, b_ref, *rest):
        if fuse_pool:
            p_ref, o_ref, acc_ref = rest
        else:
            o_ref, acc_ref = rest
        i = pl.program_id(0)
        k = pl.program_id(1)

        @pl.when(k == 0)
        def _():
            acc_ref[...] = jnp.zeros_like(acc_ref)

        # Skip MXU work for zero A tiles (the DMA was already skipped by the
        # clamped index_map returning a repeated block index).
        @pl.when(k < nz_ref[i])
        def _():
            if x_resident:
                start = pl.multiple_of(ci_ref[i, k] * tk, tk)
                x_tile = x_ref[pl.ds(start, tk), :]
            else:
                x_tile = x_ref[...]
            acc_ref[...] += jnp.dot(a_ref[...], x_tile,
                                    preferred_element_type=jnp.float32)

        @pl.when(k == pl.num_programs(1) - 1)
        def _():
            h = jnp.dot(acc_ref[...].astype(jnp.bfloat16), w_ref[...],
                        preferred_element_type=jnp.float32)
            h = jnp.maximum(h + b_ref[...], 0.0)      # bias/ReLU in f32 (v5e-safe)
            if fuse_pool:
                o_ref[0] = jnp.dot(p_ref[...], h.astype(jnp.bfloat16),
                                   preferred_element_type=jnp.float32)
            else:
                o_ref[...] = h.astype(o_ref.dtype)    # bf16 activation writeback

    return kernel


def head_kernel(part_ref, invc_ref, wc1_ref, bc1_ref, wc2_ref, bc2_ref, o_ref):
    """Sum per-row-block pool partials, apply f32 1/count, 2-layer MLP head."""
    pooled = jnp.sum(part_ref[...], axis=0) * invc_ref[...]
    g = jnp.dot(pooled.astype(jnp.bfloat16), wc1_ref[...],
                preferred_element_type=jnp.float32)
    g = jnp.maximum(g + bc1_ref[...], 0.0)
    o_ref[...] = jnp.dot(g.astype(jnp.bfloat16), wc2_ref[...],
                         preferred_element_type=jnp.float32) + bc2_ref[...]


# ------------------------------ pallas_call wrappers ------------------------

def _gcn_layer(a, x, w, b, col_idx, nnz, *, tm, tk, x_resident, vmem_limit,
               pool=None):
    np_, _ = a.shape
    fin = x.shape[1]
    fout = w.shape[1]
    nb_i, nb_k = np_ // tm, np_ // tk
    fuse_pool = pool is not None

    if x_resident:
        # Whole activation resident in VMEM; kernel slices the column block.
        x_spec = pl.BlockSpec((np_, fin), lambda i, k, ci, nz: (0, 0))
    else:
        x_spec = pl.BlockSpec((tk, fin), lambda i, k, ci, nz: (ci[i, k], 0))

    in_specs = [
        pl.BlockSpec((tm, tk), lambda i, k, ci, nz: (i, ci[i, k])),   # A tile
        x_spec,                                                        # X
        pl.BlockSpec((fin, fout), lambda i, k, ci, nz: (0, 0)),        # W
        pl.BlockSpec((1, fout), lambda i, k, ci, nz: (0, 0)),          # b
    ]
    args = [col_idx, nnz, a, x, w, b]

    if fuse_pool:
        gp = pool.shape[0]
        in_specs.append(pl.BlockSpec((gp, tm), lambda i, k, ci, nz: (0, i)))
        args.append(pool)
        out_shape = jax.ShapeDtypeStruct((nb_i, gp, fout), jnp.float32)
        out_spec = pl.BlockSpec((1, gp, fout), lambda i, k, ci, nz: (i, 0, 0))
    else:
        out_shape = jax.ShapeDtypeStruct((np_, fout), jnp.bfloat16)
        out_spec = pl.BlockSpec((tm, fout), lambda i, k, ci, nz: (i, 0))

    return pl.pallas_call(
        _make_gcn_layer_kernel(tk, x_resident, fuse_pool),
        out_shape=out_shape,
        grid_spec=pltpu.PrefetchScalarGridSpec(
            num_scalar_prefetch=2,
            grid=(nb_i, nb_k),
            in_specs=in_specs,
            out_specs=out_spec,
            scratch_shapes=[pltpu.VMEM((tm, fin), jnp.float32)],  # width = fin
        ),
        compiler_params=pltpu.CompilerParams(
            dimension_semantics=("parallel", "arbitrary"),
            vmem_limit_bytes=vmem_limit,
        ),
    )(*args)


def _pool_head(partials, invc, wc1, bc1, wc2, bc2, *, vmem_limit):
    nb_i, gp, hp = partials.shape
    cp = wc2.shape[1]
    return pl.pallas_call(
        head_kernel,
        out_shape=jax.ShapeDtypeStruct((gp, cp), jnp.float32),
        grid_spec=pltpu.PrefetchScalarGridSpec(
            num_scalar_prefetch=0,
            grid=(1,),
            in_specs=[
                pl.BlockSpec((nb_i, gp, hp), lambda i: (0, 0, 0)),
                pl.BlockSpec((gp, hp), lambda i: (0, 0)),
                pl.BlockSpec((hp, hp), lambda i: (0, 0)),
                pl.BlockSpec((1, hp), lambda i: (0, 0)),
                pl.BlockSpec((hp, cp), lambda i: (0, 0)),
                pl.BlockSpec((1, cp), lambda i: (0, 0)),
            ],
            out_specs=pl.BlockSpec((gp, cp), lambda i: (0, 0)),
        ),
        compiler_params=pltpu.CompilerParams(
            dimension_semantics=("arbitrary",),
            vmem_limit_bytes=vmem_limit,
        ),
    )(partials, invc, wc1, bc1, wc2, bc2)


def gnn_forward(a_norm, x, pool_onehot, inv_counts, params, *,
                tm_target=512, tk_target=1024):
    """Full GNNModel forward: 2x GCN layer -> mean pool -> 2-layer MLP."""
    n, f = x.shape
    g = pool_onehot.shape[0]
    h = params["w1"].shape[1]
    c = params["wc2"].shape[1]

    vmem_limit, tile_budget = _vmem_caps()

    np0 = _round_up(n, LANE)
    tm, tk = _choose_tiles(np0, tile_budget, tm_target, tk_target)
    np_ = _round_up(np0, tk)            # pad N up to tile size (never shrink tiles)
    gp = _round_up(g, SUBLANE)
    fp = _round_up(f, LANE)
    hp = _round_up(h, LANE)
    cp = _round_up(c, LANE)

    # Keep the streamed activation resident in VMEM when its double buffer fits.
    x_resident = 2 * np_ * max(fp, hp) * 2 <= tile_budget // 3

    bf16, f32 = jnp.bfloat16, jnp.float32
    # Zero padding keeps padded lanes exactly zero through bias/ReLU (padded W
    # columns / bias lanes are zero) and keeps padded node/graph rows out of
    # every reduction (padded A columns and pool columns are zero).
    a_p = _pad2(a_norm, (np_, np_), bf16)
    x_p = _pad2(x, (np_, fp), bf16)
    pool_p = _pad2(pool_onehot, (gp, np_), bf16)            # exact 0/1 in bf16
    invc_p = jnp.zeros((gp, hp), f32).at[:g, :].set(
        inv_counts.astype(f32)[:, None])                    # 1/count stays f32
    w1 = _pad2(params["w1"], (fp, hp), bf16)
    b1 = _pad2(params["b1"], (1, hp), f32)
    w2 = _pad2(params["w2"], (hp, hp), bf16)
    b2 = _pad2(params["b2"], (1, hp), f32)
    wc1 = _pad2(params["wc1"], (hp, hp), bf16)
    bc1 = _pad2(params["bc1"], (1, hp), f32)
    wc2 = _pad2(params["wc2"], (hp, cp), bf16)
    bc2 = _pad2(params["bc2"], (1, cp), f32)

    # Tile-sparsity structure of A (shared by both layers).
    # TODO(synk): the grid's k extent stays at Np/tk (jit-static); a host-side
    # max-nnz bound would also shrink the grid for very sparse graphs.
    col_idx, nnz = _tile_structure(a_p, tm, tk)

    h1 = _gcn_layer(a_p, x_p, w1, b1, col_idx, nnz, tm=tm, tk=tk,
                    x_resident=x_resident, vmem_limit=vmem_limit)       # [Np,Hp] bf16
    partials = _gcn_layer(a_p, h1, w2, b2, col_idx, nnz, tm=tm, tk=tk,
                          x_resident=x_resident, vmem_limit=vmem_limit,
                          pool=pool_p)                                   # [nb_i,Gp,Hp]
    out_p = _pool_head(partials, invc_p, wc1, bc1, wc2, bc2,
                       vmem_limit=vmem_limit)                            # [Gp,Cp]
    return out_p[:g, :c]


# ----------------------- plain-JAX glue (graph prep) ------------------------

def build_dense_gcn_adj(edge_index, num_nodes):
    """Dense D^-1/2 (A + I) D^-1/2 matching PyG GCNConv (add_self_loops=True)."""
    src, dst = edge_index[0], edge_index[1]
    w = jnp.where(src == dst, 0.0, 1.0).astype(jnp.float32)
    a = jnp.zeros((num_nodes, num_nodes), jnp.float32)
    a = a.at[dst, src].add(w)                          # A_hat[i, j] = edge j -> i
    a = a + jnp.eye(num_nodes, dtype=jnp.float32)      # self loops
    deg = a.sum(axis=1)
    dis = jnp.where(deg > 0, jax.lax.rsqrt(deg), 0.0)
    return dis[:, None] * a * dis[None, :]


def build_mean_pool(batch, num_graphs):
    """0/1 membership matrix (exact in bf16) + f32 1/count per graph."""
    onehot = (batch[None, :] == jnp.arange(num_graphs)[:, None]).astype(jnp.float32)
    counts = onehot.sum(axis=1)
    inv_counts = jnp.where(counts > 0, 1.0 / counts, 0.0)
    return onehot, inv_counts


def init_params(key, input_dim, hidden_dim, num_classes):
    ks = jax.random.split(key, 8)
    scale = 0.1
    return {
        "w1": scale * jax.random.normal(ks[0], (input_dim, hidden_dim), jnp.float32),
        "b1": scale * jax.random.normal(ks[1], (1, hidden_dim), jnp.float32),
        "w2": scale * jax.random.normal(ks[2], (hidden_dim, hidden_dim), jnp.float32),
        "b2": scale * jax.random.normal(ks[3], (1, hidden_dim), jnp.float32),
        "wc1": scale * jax.random.normal(ks[4], (hidden_dim, hidden_dim), jnp.float32),
        "bc1": scale * jax.random.normal(ks[5], (1, hidden_dim), jnp.float32),
        "wc2": scale * jax.random.normal(ks[6], (hidden_dim, num_classes), jnp.float32),
        "bc2": scale * jax.random.normal(ks[7], (1, num_classes), jnp.float32),
    }


def reference_forward(a_norm, x, pool_onehot, inv_counts, p):
    """Pure-JAX reference with the same bf16-in / f32-accumulate matmul policy."""
    def mm(a_, b_):
        return jnp.dot(a_.astype(jnp.bfloat16), b_.astype(jnp.bfloat16),
                       preferred_element_type=jnp.float32)
    h = jnp.maximum(mm(mm(a_norm, x), p["w1"]) + p["b1"], 0.0)
    h = jnp.maximum(mm(mm(a_norm, h), p["w2"]) + p["b2"], 0.0)
    g = mm(pool_onehot, h) * inv_counts[:, None]
    g = jnp.maximum(mm(g, p["wc1"]) + p["bc1"], 0.0)
    return mm(g, p["wc2"]) + p["bc2"]


if __name__ == "__main__":
    # Synthetic graph batch: 8 graphs x 128 nodes, ring topology per graph.
    # With tm=tk=512 over Np=1024 the adjacency is block-diagonal at the tile
    # level, so the sparse-tile skip / clamped index path is actually exercised.
    num_graphs = 8
    nodes_per_graph = 128
    N = num_graphs * nodes_per_graph
    input_dim = 8
    hidden_dim = 32
    num_classes = 6

    src_list, dst_list = [], []
    for gidx in range(num_graphs):
        base = gidx * nodes_per_graph
        for i in range(nodes_per_graph):
            u = base + i
            v = base + (i + 1) % nodes_per_graph
            src_list += [u, v]
            dst_list += [v, u]
    edge_index = jnp.array([src_list, dst_list], dtype=jnp.int32)   # [2, E]
    batch = jnp.repeat(jnp.arange(num_graphs, dtype=jnp.int32), nodes_per_graph)

    key = jax.random.PRNGKey(0)
    kx, kp = jax.random.split(key)
    x = jax.random.normal(kx, (N, input_dim), jnp.float32)
    params = init_params(kp, input_dim, hidden_dim, num_classes)

    # TODO(synk): torch.unique(batch) implies a data-dependent number of graphs;
    # here the number of graphs is static and known ahead of the kernel call.
    a_norm = build_dense_gcn_adj(edge_index, N)
    pool_onehot, inv_counts = build_mean_pool(batch, num_graphs)

    # tk_target=512 at this small N so the grid has 2 column tiles and the
    # zero-tile skip path is covered; large-N defaults stay at 512/1024.
    fwd = jax.jit(functools.partial(gnn_forward, tm_target=512, tk_target=512))
    out = jax.block_until_ready(fwd(a_norm, x, pool_onehot, inv_counts, params))

    ref = reference_forward(a_norm, x, pool_onehot, inv_counts, params)
    np.testing.assert_allclose(np.asarray(out), np.asarray(ref),
                               rtol=2e-3, atol=2e-3)

    print("KERNEL_OK")
</pallas_src>

<mosaic_0001>
module attributes {stable_mosaic.version = 11 : i64} {
  func.func @kernel(%arg0: i32, %arg1: i32, %arg2: memref<2x2xi32, #tpu.memory_space<smem>>, %arg3: memref<2xi32, #tpu.memory_space<smem>>, %arg4: memref<512x512xbf16, #tpu.memory_space<vmem>>, %arg5: memref<1024x128xbf16, #tpu.memory_space<vmem>>, %arg6: memref<128x128xbf16, #tpu.memory_space<vmem>>, %arg7: memref<1x128xf32, #tpu.memory_space<vmem>>, %arg8: memref<512x128xbf16, #tpu.memory_space<vmem>>, %arg9: memref<512x128xf32, #tpu.memory_space<vmem>>) attributes {dimension_semantics = [#tpu.dimension_semantics<parallel>, #tpu.dimension_semantics<arbitrary>], iteration_bounds = array<i64: 2, 2>, scalar_prefetch = 2 : i64, scratch_operands = 1 : i64, tpu.core_type = #tpu.core_type<tc>, window_params = [{transform_indices = @transform_0, window_bounds = array<i64: 512, 512>}, {pipeline_mode = #tpu.pipeline_mode<synchronous>, transform_indices = @transform_1, window_bounds = array<i64: 1024, 128>}, {pipeline_mode = #tpu.pipeline_mode<synchronous>, transform_indices = @transform_2, window_bounds = array<i64: 128, 128>}, {pipeline_mode = #tpu.pipeline_mode<synchronous>, transform_indices = @transform_3, window_bounds = array<i64: 1, 128>}, {transform_indices = @transform_4, window_bounds = array<i64: 512, 128>}]} {
    %c0_i32 = arith.constant 0 : i32
    %0 = arith.cmpi eq, %arg1, %c0_i32 : i32
    %1 = arith.extui %0 : i1 to i32
    %c0_i32_0 = arith.constant 0 : i32
    %2 = arith.cmpi ne, %1, %c0_i32_0 : i32
    scf.if %2 {
      %cst = arith.constant 0.000000e+00 : f32
      %11 = vector.broadcast %cst : f32 to vector<512x128xf32>
      %c0 = arith.constant 0 : index
      %c0_3 = arith.constant 0 : index
      %12 = vector.load %arg9[%c0, %c0_3] : memref<512x128xf32, #tpu.memory_space<vmem>>, vector<512x128xf32>
      tpu.vector_store %arg9[%c0, %c0_3], %11 {strides = array<i32>} : memref<512x128xf32, #tpu.memory_space<vmem>>, vector<512x128xf32>,
    } else {
    }
    %3 = arith.index_cast %arg0 : i32 to index
    %4 = memref.load %arg3[%3] : memref<2xi32, #tpu.memory_space<smem>>
    %5 = arith.cmpi slt, %arg1, %4 : i32
    %6 = arith.extui %5 : i1 to i32
    %c0_i32_1 = arith.constant 0 : i32
    %7 = arith.cmpi ne, %6, %c0_i32_1 : i32
    scf.if %7 {
      %11 = arith.index_cast %arg0 : i32 to index
      %12 = arith.index_cast %arg1 : i32 to index
      %13 = memref.load %arg2[%11, %12] : memref<2x2xi32, #tpu.memory_space<smem>>
      %c512_i32 = arith.constant 512 : i32
      %14 = arith.muli %13, %c512_i32 : i32
      %15 = tpu.assume_multiple %14, 512 : i32
      %16 = arith.index_cast %15 : i32 to index
      %c0 = arith.constant 0 : index
      %17 = vector.load %arg5[%16, %c0] : memref<1024x128xbf16, #tpu.memory_space<vmem>>, vector<512x128xbf16>
      %c0_3 = arith.constant 0 : index
      %c0_4 = arith.constant 0 : index
      %18 = vector.load %arg9[%c0_3, %c0_4] : memref<512x128xf32, #tpu.memory_space<vmem>>, vector<512x128xf32>
      %c0_5 = arith.constant 0 : index
      %c0_6 = arith.constant 0 : index
      %19 = vector.load %arg4[%c0_5, %c0_6] : memref<512x512xbf16, #tpu.memory_space<vmem>>, vector<512x512xbf16>
      %cst = arith.constant dense<0.000000e+00> : vector<512x128xf32>
      %20 = tpu.matmul %19, %17, %cst {dimension_numbers = #tpu.dot_dimension_numbers<[1], [0], [0], [1], [0, 0, 1, 1], [], []>} : vector<512x512xbf16>, vector<512x128xbf16>, vector<512x128xf32> -> vector<512x128xf32>
      %21 = arith.addf %18, %20 : vector<512x128xf32>
      %c0_7 = arith.constant 0 : index
      %c0_8 = arith.constant 0 : index
      %22 = vector.load %arg9[%c0_7, %c0_8] : memref<512x128xf32, #tpu.memory_space<vmem>>, vector<512x128xf32>
      tpu.vector_store %arg9[%c0_7, %c0_8], %21 {strides = array<i32>} : memref<512x128xf32, #tpu.memory_space<vmem>>, vector<512x128xf32>,
    } else {
    }
    %c1_i32 = arith.constant 1 : i32
    %8 = arith.cmpi eq, %arg1, %c1_i32 : i32
    %9 = arith.extui %8 : i1 to i32
    %c0_i32_2 = arith.constant 0 : i32
    %10 = arith.cmpi ne, %9, %c0_i32_2 : i32
    scf.if %10 {
      %c0 = arith.constant 0 : index
      %c0_3 = arith.constant 0 : index
      %11 = vector.load %arg9[%c0, %c0_3] : memref<512x128xf32, #tpu.memory_space<vmem>>, vector<512x128xf32>
      %12 = arith.truncf %11 : vector<512x128xf32> to vector<512x128xbf16>
      %c0_4 = arith.constant 0 : index
      %c0_5 = arith.constant 0 : index
      %13 = vector.load %arg6[%c0_4, %c0_5] : memref<128x128xbf16, #tpu.memory_space<vmem>>, vector<128x128xbf16>
      %cst = arith.constant dense<0.000000e+00> : vector<512x128xf32>
      %14 = tpu.matmul %12, %13, %cst {dimension_numbers = #tpu.dot_dimension_numbers<[1], [0], [0], [1], [0, 0, 1, 1], [], []>} : vector<512x128xbf16>, vector<128x128xbf16>, vector<512x128xf32> -> vector<512x128xf32>
      %c0_6 = arith.constant 0 : index
      %c0_7 = arith.constant 0 : index
      %15 = vector.load %arg7[%c0_6, %c0_7] : memref<1x128xf32, #tpu.memory_space<vmem>>, vector<1x128xf32>
      %16 = vector.broadcast %15 : vector<1x128xf32> to vector<512x128xf32>
      %17 = arith.addf %14, %16 : vector<512x128xf32>
      %cst_8 = arith.constant 0.000000e+00 : f32
      %18 = vector.broadcast %cst_8 : f32 to vector<512x128xf32>
      %19 = arith.maximumf %17, %18 : vector<512x128xf32>
      %20 = arith.truncf %19 : vector<512x128xf32> to vector<512x128xbf16>
      %c0_9 = arith.constant 0 : index
      %c0_10 = arith.constant 0 : index
      %21 = vector.load %arg8[%c0_9, %c0_10] : memref<512x128xbf16, #tpu.memory_space<vmem>>, vector<512x128xbf16>
      tpu.vector_store %arg8[%c0_9, %c0_10], %20 {strides = array<i32>} : memref<512x128xbf16, #tpu.memory_space<vmem>>, vector<512x128xbf16>,
    } else {
    }
    return
  }
  func.func @transform_0(%arg0: i32, %arg1: i32, %arg2: memref<2x2xi32, #tpu.memory_space<smem>>, %arg3: memref<2xi32, #tpu.memory_space<smem>>) -> (i32, i32) {
    %0 = arith.index_cast %arg0 : i32 to index
    %1 = arith.index_cast %arg1 : i32 to index
    %2 = memref.load %arg2[%0, %1] : memref<2x2xi32, #tpu.memory_space<smem>>
    %c0_i32 = arith.constant 0 : i32
    return %arg0, %2 : i32, i32
  }
  func.func @transform_1(%arg0: i32, %arg1: i32, %arg2: memref<2x2xi32, #tpu.memory_space<smem>>, %arg3: memref<2xi32, #tpu.memory_space<smem>>) -> (i32, i32) {
    %c0_i32 = arith.constant 0 : i32
    %c0_i32_0 = arith.constant 0 : i32
    %c0_i32_1 = arith.constant 0 : i32
    return %c0_i32, %c0_i32_0 : i32, i32
  }
  func.func @transform_2(%arg0: i32, %arg1: i32, %arg2: memref<2x2xi32, #tpu.memory_space<smem>>, %arg3: memref<2xi32, #tpu.memory_space<smem>>) -> (i32, i32) {
    %c0_i32 = arith.constant 0 : i32
    %c0_i32_0 = arith.constant 0 : i32
    %c0_i32_1 = arith.constant 0 : i32
    return %c0_i32, %c0_i32_0 : i32, i32
  }
  func.func @transform_3(%arg0: i32, %arg1: i32, %arg2: memref<2x2xi32, #tpu.memory_space<smem>>, %arg3: memref<2xi32, #tpu.memory_space<smem>>) -> (i32, i32) {
    %c0_i32 = arith.constant 0 : i32
    %c0_i32_0 = arith.constant 0 : i32
    %c0_i32_1 = arith.constant 0 : i32
    return %c0_i32, %c0_i32_0 : i32, i32
  }
  func.func @transform_4(%arg0: i32, %arg1: i32, %arg2: memref<2x2xi32, #tpu.memory_space<smem>>, %arg3: memref<2xi32, #tpu.memory_space<smem>>) -> (i32, i32) {
    %c0_i32 = arith.constant 0 : i32
    %c0_i32_0 = arith.constant 0 : i32
    return %arg0, %c0_i32 : i32, i32
  }
}

module attributes {stable_mosaic.version = 11 : i64} {
  func.func @kernel(%arg0: i32, %arg1: i32, %arg2: memref<2x2xi32, #tpu.memory_space<smem>>, %arg3: memref<2xi32, #tpu.memory_space<smem>>, %arg4: memref<512x512xbf16, #tpu.memory_space<vmem>>, %arg5: memref<1024x128xbf16, #tpu.memory_space<vmem>>, %arg6: memref<128x128xbf16, #tpu.memory_space<vmem>>, %arg7: memref<1x128xf32, #tpu.memory_space<vmem>>, %arg8: memref<8x512xbf16, #tpu.memory_space<vmem>>, %arg9: memref<1x8x128xf32, #tpu.memory_space<vmem>>, %arg10: memref<512x128xf32, #tpu.memory_space<vmem>>) attributes {dimension_semantics = [#tpu.dimension_semantics<parallel>, #tpu.dimension_semantics<arbitrary>], iteration_bounds = array<i64: 2, 2>, scalar_prefetch = 2 : i64, scratch_operands = 1 : i64, tpu.core_type = #tpu.core_type<tc>, window_params = [{transform_indices = @transform_0, window_bounds = array<i64: 512, 512>}, {pipeline_mode = #tpu.pipeline_mode<synchronous>, transform_indices = @transform_1, window_bounds = array<i64: 1024, 128>}, {pipeline_mode = #tpu.pipeline_mode<synchronous>, transform_indices = @transform_2, window_bounds = array<i64: 128, 128>}, {pipeline_mode = #tpu.pipeline_mode<synchronous>, transform_indices = @transform_3, window_bounds = array<i64: 1, 128>}, {transform_indices = @transform_4, window_bounds = array<i64: 8, 512>}, {transform_indices = @transform_5, window_bounds = array<i64: 1, 8, 128>}]} {
    %c0_i32 = arith.constant 0 : i32
    %0 = arith.cmpi eq, %arg1, %c0_i32 : i32
    %1 = arith.extui %0 : i1 to i32
    %c0_i32_0 = arith.constant 0 : i32
    %2 = arith.cmpi ne, %1, %c0_i32_0 : i32
    scf.if %2 {
      %cst = arith.constant 0.000000e+00 : f32
      %11 = vector.broadcast %cst : f32 to vector<512x128xf32>
      %c0 = arith.constant 0 : index
      %c0_3 = arith.constant 0 : index
      %12 = vector.load %arg10[%c0, %c0_3] : memref<512x128xf32, #tpu.memory_space<vmem>>, vector<512x128xf32>
      tpu.vector_store %arg10[%c0, %c0_3], %11 {strides = array<i32>} : memref<512x128xf32, #tpu.memory_space<vmem>>, vector<512x128xf32>,
    } else {
    }
    %3 = arith.index_cast %arg0 : i32 to index
    %4 = memref.load %arg3[%3] : memref<2xi32, #tpu.memory_space<smem>>
    %5 = arith.cmpi slt, %arg1, %4 : i32
    %6 = arith.extui %5 : i1 to i32
    %c0_i32_1 = arith.constant 0 : i32
    %7 = arith.cmpi ne, %6, %c0_i32_1 : i32
    scf.if %7 {
      %11 = arith.index_cast %arg0 : i32 to index
      %12 = arith.index_cast %arg1 : i32 to index
      %13 = memref.load %arg2[%11, %12] : memref<2x2xi32, #tpu.memory_space<smem>>
      %c512_i32 = arith.constant 512 : i32
      %14 = arith.muli %13, %c512_i32 : i32
      %15 = tpu.assume_multiple %14, 512 : i32
      %16 = arith.index_cast %15 : i32 to index
      %c0 = arith.constant 0 : index
      %17 = vector.load %arg5[%16, %c0] : memref<1024x128xbf16, #tpu.memory_space<vmem>>, vector<512x128xbf16>
      %c0_3 = arith.constant 0 : index
      %c0_4 = arith.constant 0 : index
      %18 = vector.load %arg10[%c0_3, %c0_4] : memref<512x128xf32, #tpu.memory_space<vmem>>, vector<512x128xf32>
      %c0_5 = arith.constant 0 : index
      %c0_6 = arith.constant 0 : index
      %19 = vector.load %arg4[%c0_5, %c0_6] : memref<512x512xbf16, #tpu.memory_space<vmem>>, vector<512x512xbf16>
      %cst = arith.constant dense<0.000000e+00> : vector<512x128xf32>
      %20 = tpu.matmul %19, %17, %cst {dimension_numbers = #tpu.dot_dimension_numbers<[1], [0], [0], [1], [0, 0, 1, 1], [], []>} : vector<512x512xbf16>, vector<512x128xbf16>, vector<512x128xf32> -> vector<512x128xf32>
      %21 = arith.addf %18, %20 : vector<512x128xf32>
      %c0_7 = arith.constant 0 : index
      %c0_8 = arith.constant 0 : index
      %22 = vector.load %arg10[%c0_7, %c0_8] : memref<512x128xf32, #tpu.memory_space<vmem>>, vector<512x128xf32>
      tpu.vector_store %arg10[%c0_7, %c0_8], %21 {strides = array<i32>} : memref<512x128xf32, #tpu.memory_space<vmem>>, vector<512x128xf32>,
    } else {
    }
    %c1_i32 = arith.constant 1 : i32
    %8 = arith.cmpi eq, %arg1, %c1_i32 : i32
    %9 = arith.extui %8 : i1 to i32
    %c0_i32_2 = arith.constant 0 : i32
    %10 = arith.cmpi ne, %9, %c0_i32_2 : i32
    scf.if %10 {
      %c0 = arith.constant 0 : index
      %c0_3 = arith.constant 0 : index
      %11 = vector.load %arg10[%c0, %c0_3] : memref<512x128xf32, #tpu.memory_space<vmem>>, vector<512x128xf32>
      %12 = arith.truncf %11 : vector<512x128xf32> to vector<512x128xbf16>
      %c0_4 = arith.constant 0 : index
      %c0_5 = arith.constant 0 : index
      %13 = vector.load %arg6[%c0_4, %c0_5] : memref<128x128xbf16, #tpu.memory_space<vmem>>, vector<128x128xbf16>
      %cst = arith.constant dense<0.000000e+00> : vector<512x128xf32>
      %14 = tpu.matmul %12, %13, %cst {dimension_numbers = #tpu.dot_dimension_numbers<[1], [0], [0], [1], [0, 0, 1, 1], [], []>} : vector<512x128xbf16>, vector<128x128xbf16>, vector<512x128xf32> -> vector<512x128xf32>
      %c0_6 = arith.constant 0 : index
      %c0_7 = arith.constant 0 : index
      %15 = vector.load %arg7[%c0_6, %c0_7] : memref<1x128xf32, #tpu.memory_space<vmem>>, vector<1x128xf32>
      %16 = vector.broadcast %15 : vector<1x128xf32> to vector<512x128xf32>
      %17 = arith.addf %14, %16 : vector<512x128xf32>
      %cst_8 = arith.constant 0.000000e+00 : f32
      %18 = vector.broadcast %cst_8 : f32 to vector<512x128xf32>
      %19 = arith.maximumf %17, %18 : vector<512x128xf32>
      %c0_9 = arith.constant 0 : index
      %c0_10 = arith.constant 0 : index
      %20 = vector.load %arg8[%c0_9, %c0_10] : memref<8x512xbf16, #tpu.memory_space<vmem>>, vector<8x512xbf16>
      %21 = arith.truncf %19 : vector<512x128xf32> to vector<512x128xbf16>
      %cst_11 = arith.constant dense<0.000000e+00> : vector<8x128xf32>
      %22 = tpu.matmul %20, %21, %cst_11 {dimension_numbers = #tpu.dot_dimension_numbers<[1], [0], [0], [1], [0, 0, 1, 1], [], []>} : vector<8x512xbf16>, vector<512x128xbf16>, vector<8x128xf32> -> vector<8x128xf32>
      %c0_12 = arith.constant 0 : index
      %c0_13 = arith.constant 0 : index
      %c0_14 = arith.constant 0 : index
      %23 = vector.load %arg9[%c0_12, %c0_13, %c0_14] : memref<1x8x128xf32, #tpu.memory_space<vmem>>, vector<1x8x128xf32>
      %24 = vector.shape_cast %23 : vector<1x8x128xf32> to vector<8x128xf32>
      %25 = vector.shape_cast %22 : vector<8x128xf32> to vector<1x8x128xf32>
      tpu.vector_store %arg9[%c0_12, %c0_13, %c0_14], %25 {strides = array<i32>} : memref<1x8x128xf32, #tpu.memory_space<vmem>>, vector<1x8x128xf32>,
    } else {
    }
    return
  }
  func.func @transform_0(%arg0: i32, %arg1: i32, %arg2: memref<2x2xi32, #tpu.memory_space<smem>>, %arg3: memref<2xi32, #tpu.memory_space<smem>>) -> (i32, i32) {
    %0 = arith.index_cast %arg0 : i32 to index
    %1 = arith.index_cast %arg1 : i32 to index
    %2 = memref.load %arg2[%0, %1] : memref<2x2xi32, #tpu.memory_space<smem>>
    %c0_i32 = arith.constant 0 : i32
    return %arg0, %2 : i32, i32
  }
  func.func @transform_1(%arg0: i32, %arg1: i32, %arg2: memref<2x2xi32, #tpu.memory_space<smem>>, %arg3: memref<2xi32, #tpu.memory_space<smem>>) -> (i32, i32) {
    %c0_i32 = arith.constant 0 : i32
    %c0_i32_0 = arith.constant 0 : i32
    %c0_i32_1 = arith.constant 0 : i32
    return %c0_i32, %c0_i32_0 : i32, i32
  }
  func.func @transform_2(%arg0: i32, %arg1: i32, %arg2: memref<2x2xi32, #tpu.memory_space<smem>>, %arg3: memref<2xi32, #tpu.memory_space<smem>>) -> (i32, i32) {
    %c0_i32 = arith.constant 0 : i32
    %c0_i32_0 = arith.constant 0 : i32
    %c0_i32_1 = arith.constant 0 : i32
    return %c0_i32, %c0_i32_0 : i32, i32
  }
  func.func @transform_3(%arg0: i32, %arg1: i32, %arg2: memref<2x2xi32, #tpu.memory_space<smem>>, %arg3: memref<2xi32, #tpu.memory_space<smem>>) -> (i32, i32) {
    %c0_i32 = arith.constant 0 : i32
    %c0_i32_0 = arith.constant 0 : i32
    %c0_i32_1 = arith.constant 0 : i32
    return %c0_i32, %c0_i32_0 : i32, i32
  }
  func.func @transform_4(%arg0: i32, %arg1: i32, %arg2: memref<2x2xi32, #tpu.memory_space<smem>>, %arg3: memref<2xi32, #tpu.memory_space<smem>>) -> (i32, i32) {
    %c0_i32 = arith.constant 0 : i32
    %c0_i32_0 = arith.constant 0 : i32
    return %c0_i32, %arg0 : i32, i32
  }
  func.func @transform_5(%arg0: i32, %arg1: i32, %arg2: memref<2x2xi32, #tpu.memory_space<smem>>, %arg3: memref<2xi32, #tpu.memory_space<smem>>) -> (i32, i32, i32) {
    %c0_i32 = arith.constant 0 : i32
    %c0_i32_0 = arith.constant 0 : i32
    %c0_i32_1 = arith.constant 0 : i32
    return %arg0, %c0_i32, %c0_i32_0 : i32, i32, i32
  }
}

module attributes {stable_mosaic.version = 11 : i64} {
  func.func @head_kernel(%arg0: i32, %arg1: memref<2x8x128xf32, #tpu.memory_space<vmem>>, %arg2: memref<8x128xf32, #tpu.memory_space<vmem>>, %arg3: memref<128x128xbf16, #tpu.memory_space<vmem>>, %arg4: memref<1x128xf32, #tpu.memory_space<vmem>>, %arg5: memref<128x128xbf16, #tpu.memory_space<vmem>>, %arg6: memref<1x128xf32, #tpu.memory_space<vmem>>, %arg7: memref<8x128xf32, #tpu.memory_space<vmem>>) attributes {dimension_semantics = [#tpu.dimension_semantics<arbitrary>], iteration_bounds = array<i64: 1>, scalar_prefetch = 0 : i64, scratch_operands = 0 : i64, tpu.core_type = #tpu.core_type<tc>, window_params = [{pipeline_mode = #tpu.pipeline_mode<synchronous>, transform_indices = @transform_0, window_bounds = array<i64: 2, 8, 128>}, {pipeline_mode = #tpu.pipeline_mode<synchronous>, transform_indices = @transform_1, window_bounds = array<i64: 8, 128>}, {pipeline_mode = #tpu.pipeline_mode<synchronous>, transform_indices = @transform_2, window_bounds = array<i64: 128, 128>}, {pipeline_mode = #tpu.pipeline_mode<synchronous>, transform_indices = @transform_3, window_bounds = array<i64: 1, 128>}, {pipeline_mode = #tpu.pipeline_mode<synchronous>, transform_indices = @transform_4, window_bounds = array<i64: 128, 128>}, {pipeline_mode = #tpu.pipeline_mode<synchronous>, transform_indices = @transform_5, window_bounds = array<i64: 1, 128>}, {pipeline_mode = #tpu.pipeline_mode<synchronous>, transform_indices = @transform_6, window_bounds = array<i64: 8, 128>}]} {
    %c0 = arith.constant 0 : index
    %c0_0 = arith.constant 0 : index
    %c0_1 = arith.constant 0 : index
    %0 = vector.load %arg1[%c0, %c0_0, %c0_1] : memref<2x8x128xf32, #tpu.memory_space<vmem>>, vector<2x8x128xf32>
    %cst = arith.constant dense<0.000000e+00> : vector<8x128xf32>
    %1 = vector.multi_reduction <add>, %0, %cst [0] : vector<2x8x128xf32> to vector<8x128xf32>
    %c0_2 = arith.constant 0 : index
    %c0_3 = arith.constant 0 : index
    %2 = vector.load %arg2[%c0_2, %c0_3] : memref<8x128xf32, #tpu.memory_space<vmem>>, vector<8x128xf32>
    %3 = arith.mulf %1, %2 : vector<8x128xf32>
    %4 = arith.truncf %3 : vector<8x128xf32> to vector<8x128xbf16>
    %c0_4 = arith.constant 0 : index
    %c0_5 = arith.constant 0 : index
    %5 = vector.load %arg3[%c0_4, %c0_5] : memref<128x128xbf16, #tpu.memory_space<vmem>>, vector<128x128xbf16>
    %cst_6 = arith.constant dense<0.000000e+00> : vector<8x128xf32>
    %6 = tpu.matmul %4, %5, %cst_6 {dimension_numbers = #tpu.dot_dimension_numbers<[1], [0], [0], [1], [0, 0, 1, 1], [], []>} : vector<8x128xbf16>, vector<128x128xbf16>, vector<8x128xf32> -> vector<8x128xf32>
    %c0_7 = arith.constant 0 : index
    %c0_8 = arith.constant 0 : index
    %7 = vector.load %arg4[%c0_7, %c0_8] : memref<1x128xf32, #tpu.memory_space<vmem>>, vector<1x128xf32>
    %8 = vector.broadcast %7 : vector<1x128xf32> to vector<8x128xf32>
    %9 = arith.addf %6, %8 : vector<8x128xf32>
    %cst_9 = arith.constant 0.000000e+00 : f32
    %10 = vector.broadcast %cst_9 : f32 to vector<8x128xf32>
    %11 = arith.maximumf %9, %10 : vector<8x128xf32>
    %12 = arith.truncf %11 : vector<8x128xf32> to vector<8x128xbf16>
    %c0_10 = arith.constant 0 : index
    %c0_11 = arith.constant 0 : index
    %13 = vector.load %arg5[%c0_10, %c0_11] : memref<128x128xbf16, #tpu.memory_space<vmem>>, vector<128x128xbf16>
    %cst_12 = arith.constant dense<0.000000e+00> : vector<8x128xf32>
    %14 = tpu.matmul %12, %13, %cst_12 {dimension_numbers = #tpu.dot_dimension_numbers<[1], [0], [0], [1], [0, 0, 1, 1], [], []>} : vector<8x128xbf16>, vector<128x128xbf16>, vector<8x128xf32> -> vector<8x128xf32>
    %c0_13 = arith.constant 0 : index
    %c0_14 = arith.constant 0 : index
    %15 = vector.load %arg6[%c0_13, %c0_14] : memref<1x128xf32, #tpu.memory_space<vmem>>, vector<1x128xf32>
    %16 = vector.broadcast %15 : vector<1x128xf32> to vector<8x128xf32>
    %17 = arith.addf %14, %16 : vector<8x128xf32>
    %c0_15 = arith.constant 0 : index
    %c0_16 = arith.constant 0 : index
    %18 = vector.load %arg7[%c0_15, %c0_16] : memref<8x128xf32, #tpu.memory_space<vmem>>, vector<8x128xf32>
    tpu.vector_store %arg7[%c0_15, %c0_16], %17 {strides = array<i32>} : memref<8x128xf32, #tpu.memory_space<vmem>>, vector<8x128xf32>,
    return
  }
  func.func @transform_0(%arg0: i32) -> (i32, i32, i32) {
    %c0_i32 = arith.constant 0 : i32
    %c0_i32_0 = arith.constant 0 : i32
    %c0_i32_1 = arith.constant 0 : i32
    %c0_i32_2 = arith.constant 0 : i32
    return %c0_i32, %c0_i32_0, %c0_i32_1 : i32, i32, i32
  }
  func.func @transform_1(%arg0: i32) -> (i32, i32) {
    %c0_i32 = arith.constant 0 : i32
    %c0_i32_0 = arith.constant 0 : i32
    %c0_i32_1 = arith.constant 0 : i32
    return %c0_i32, %c0_i32_0 : i32, i32
  }
  func.func @transform_2(%arg0: i32) -> (i32, i32) {
    %c0_i32 = arith.constant 0 : i32
    %c0_i32_0 = arith.constant 0 : i32
    %c0_i32_1 = arith.constant 0 : i32
    return %c0_i32, %c0_i32_0 : i32, i32
  }
  func.func @transform_3(%arg0: i32) -> (i32, i32) {
    %c0_i32 = arith.constant 0 : i32
    %c0_i32_0 = arith.constant 0 : i32
    %c0_i32_1 = arith.constant 0 : i32
    return %c0_i32, %c0_i32_0 : i32, i32
  }
  func.func @transform_4(%arg0: i32) -> (i32, i32) {
    %c0_i32 = arith.constant 0 : i32
    %c0_i32_0 = arith.constant 0 : i32
    %c0_i32_1 = arith.constant 0 : i32
    return %c0_i32, %c0_i32_0 : i32, i32
  }
  func.func @transform_5(%arg0: i32) -> (i32, i32) {
    %c0_i32 = arith.constant 0 : i32
    %c0_i32_0 = arith.constant 0 : i32
    %c0_i32_1 = arith.constant 0 : i32
    return %c0_i32, %c0_i32_0 : i32, i32
  }
  func.func @transform_6(%arg0: i32) -> (i32, i32) {
    %c0_i32 = arith.constant 0 : i32
    %c0_i32_0 = arith.constant 0 : i32
    %c0_i32_1 = arith.constant 0 : i32
    return %c0_i32, %c0_i32_0 : i32, i32
  }
}

</mosaic_0001>

<bundles_post_ra>
// kernel: gnn_forward.4
= control target key start
LH: loop header
LB: loop body
LE: loop exit
PB: predicated region body
PF: predicated region fallthrough
CT: control target
= control target key end

     0   :  { %s4862_s0 = inlined_call_operand.vmem [shape: s32[2,2], index: 0, kind: input, shape index: {}]   ;;  %s4863_s2 = inlined_call_operand.vmem [shape: bf16[1024,1024], index: 2, kind: input, shape index: {}]   ;;  %s4864_s3 = inlined_call_operand.vmem [shape: bf16[1024,128], index: 3, kind: input, shape index: {}]   ;;  %s4865_s4 = inlined_call_operand.vmem [shape: bf16[128,128], index: 4, kind: input, shape index: {}]   ;;  %s4866_s5 = inlined_call_operand.vmem [shape: f32[1,128], index: 5, kind: input, shape index: {}]   ;;  %s4867_s6 = inlined_call_operand.vmem [shape: bf16[8,1024], index: 6, kind: input, shape index: {}]   ;;  %s4868_s7 = inlined_call_operand.vmem [shape: f32[2,8,128], index: 7, kind: output, shape index: {}]   ;;  %s4869_s1 = inlined_call_operand.vmem [shape: s32[2], index: 1, kind: input, shape index: {}]  }
   0x1   :  { %s12_s26 = sshll.u32 %s4862_s0, 4  ;;  %s16_s29 = sshll.u32 %s4869_s1, 4  ;;  %s13_s26 = int_to_ptr.vmem [resolvable:$true] %s12_s26  ;;  %s17_s29 = int_to_ptr.vmem [resolvable:$true] %s16_s29 }
   0x2   :  { %s3878_s30 = scalar_lea.vmem %s13_s26, 32  ;;  %p3883_p1 = scmp.lt.s32.totalorder %s13_s26, %s13_s26 }
   0x3   :  { %p3879_p0 = scmp.ne.s32.totalorder %s13_s26, %s3878_s30  ;;  %p3884_p2 = scmp.lt.s32.totalorder %s3878_s30, %s3878_s30 }
   0x5   :  { %p3885_p3 = por %p3884_p2, %p3883_p1 }
   0x7   :  { %p3886_p4 = pnand %p3885_p3, %p3879_p0 }
   0x9   :  { %3889 = shalt.err (!%p3886_p4)  }
   0xa   :  { %s3960_s8 = smov [#allocation4]   ;;  %s3890_s9 = scalar_lea.vmem %s17_s29, 16 }
   0xb   :  { %15 = dma.vmem_to_smem %s13_s26, 32, %s3960_s8, [#allocation3] }
   0xc   :  { %p3891_p5 = scmp.ne.s32.totalorder %s17_s29, %s3890_s9  ;;  %p3895_p6 = scmp.lt.s32.totalorder %s17_s29, %s17_s29 }
   0xd   :  { %p3896_p7 = scmp.lt.s32.totalorder %s3890_s9, %s3890_s9 }
   0xf   :  { %p3897_p8 = por %p3896_p7, %p3895_p6 }
  0x11   :  { %p3898_p9 = pnand %p3897_p8, %p3891_p5 }
  0x13   :  { %3901 = shalt.err (!%p3898_p9)  }
  0x14   :  { %s3961_s0 = smov [#allocation5]  }
  0x15   :  { %19 = dma.vmem_to_smem %s17_s29, 16, %s3961_s0, [#allocation3] }
  0x16   :  { %3930 = dma.done.wait [#allocation3], 48 }
  0x17   :  { %3931 = vsyncadd [#allocation3], 4294967248 }
  0x18   :  { %21 = sfence }
  0x19   :  { %s4010_s1 = smov 0   ;;  %s4012_s10 = smov 0  }
  0x1a   :  { %s4014_s11 = smov 0   ;;  %s4016_s12 = smov 0  }
  0x1b   :  { %s4018_s13 = smov 0   ;;  %s4020_s14 = smov 0  }
  0x1c   :  { %s4022_s15 = smov 0  }
  0x1d LB: > { %s36_s16 = sadd.s32 1, %s3950_s13  ;;  %s39_s17 = sadd.s32 1, %s3954_s14  ;;  %s3958_s15 = sphi %s4022_s15, %s27_s15   ;;  %s3954_s14 = sphi %s4020_s14, %s4875_s14   ;;  %s3950_s13 = sphi %s4018_s13, %s4874_s13   ;;  %s3946_s12 = sphi %s4016_s12, %s4873_s12   ;;  %s3942_s11 = sphi %s4014_s11, %s4872_s11   ;;  %s3938_s10 = sphi %s4012_s10, %s4871_s10   ;;  %s3934_s1 = sphi %s4010_s1, %s4870_s1  }
  0x1e   : > { %p37_p10 = scmp.ge.s32.totalorder %s36_s16, 2  ;;  %s43_s18 = sshra.s32 %s3950_s13, 7 }
  0x1f   : > { %s45_s19 = sadd.s32 %s3954_s14, %s43_s18  ;;  %s48_s20 = sand.u32 127, %s3950_s13 }
  0x20   : > { %s4877_s16 = smov (%p37_p10, %s36_s16), 0  ;;  %s4879_s17 = smov (!%p37_p10, %s39_s17), %s3954_s14 }
  0x21   : > { %s3205_s21 = sshll.u32 %s45_s19, 7  ;;  %p41_p11 = scmp.ge.s32.totalorder %s4879_s17, 2 }
  0x22   : > { %s49_s22 = sadd.s32 %s3205_s21, %s48_s20  ;;  %s51_s23 = sshra.s32 %s4877_s16, 7 }
  0x23   : > { %s4881_s17 = smov (%p41_p11, %s4879_s17), 0  ;;  %s56_s24 = sand.u32 127, %s4877_s16 }
  0x24   : > { %p71_p12 = scmp.ne.s32.totalorder %s3938_s10, %s3934_s1  ;;  %s50_s25 = sld [smem:[#allocation4 + %s49_s22]] }
  0x25   : > { %s53_s26 = sadd.s32 %s51_s23, %s4881_s17  ;;  %p72_p13 = scmp.eq.s32.totalorder %s3958_s15, 0 }
  0x26   : > { %s3206_s27 = sshll.u32 %s53_s26, 7  ;;  %s59_s30 = ssub.s32 %s3954_s14, %s4881_s17 }
  0x27   : > { %s57_s28 = sadd.s32 %s3206_s27, %s56_s24  ;;  %p73_p0 = por %p72_p13, %p71_p12 }
  0x28   : > { %s58_s29 = sld [smem:[#allocation4 + %s57_s28]]  ;;  %s64_s0 = sadd.s32 1, %s3938_s10 }
  0x29   : > { %p3208_p2 = scmp.ge.s32.totalorder %s3958_s15, 4 }
  0x2e   : > { %s60_s8 = ssub.s32 %s50_s25, %s58_s29  ;;  %221 = sbr.rel (%p3208_p2) target bundleno = 126 (0x7e), region = 28 }
  0x2f   : > { %s61_s9 = sor.u32 %s60_s8, %s59_s30 }
  0x30   : > { %p62_p1 = scmp.eq.s32.totalorder %s61_s9, 0 }
  0x32   : > { %s4065_s18 = scalar_select %p62_p1, %s3938_s10, %s64_s0  }
  0x33   : > { %224 = sbr.rel (!%p73_p0) target bundleno = 126 (0x7e), region = 32  ;;  %s236_s19 = sld [smem:[#allocation4 + %s49_s22]] (%p73_p0) }
  0x34   : > { %s226_s20 = sand.u32 (%p73_p0), 1, %s3938_s10   ;;  %s3401_s21 = sshll.u32 (%p73_p0), %s3954_s14, 9 }
  0x35   : > { %s3209_s23 = sshll.u32 (%p73_p0), %s226_s20, 10 }
  0x36   : > { %s4078_s22 = scalar_lea.vmem (%p73_p0), [#allocation6], %s3209_s23 }
  0x39   : > { %s3212_s24 = sshll.u32 %s236_s19, 2 }
  0x3a   : > { %s240_s26 = sadd.s32 %s3401_s21, %s3212_s24 }
  0x3b   : > { %s3214_s27 = sshll.u32 %s240_s26, 2 }
  0x3c   : > { %s4073_s29 = scalar_lea.vmem %s4863_s2, %s3214_s27 }
  0x3d   : > { %v255_v0 = vld [vmem:[%s4073_s29] sm:$0xff]  ;;  %v257_v1 = vld [vmem:[%s4073_s29 + $0x8] sm:$0xff] }
  0x3e   : > { %v259_v2 = vld [vmem:[%s4073_s29 + $0x20] sm:$0xff]  ;;  %256 = vst [vmem:[%s4078_s22] sm:$0xff] %v255_v0  ;;  %258 = vst [vmem:[%s4078_s22 + $0x8] sm:$0xff] %v257_v1  ;;  %v261_v3 = vld [vmem:[%s4073_s29 + $0x28] sm:$0xff] }
  0x3f   : > { %260 = vst [vmem:[%s4078_s22 + $0x10] sm:$0xff] %v259_v2  ;;  %v263_v4 = vld [vmem:[%s4073_s29 + $0x40] sm:$0xff]  ;;  %v265_v5 = vld [vmem:[%s4073_s29 + $0x48] sm:$0xff]  ;;  %262 = vst [vmem:[%s4078_s22 + $0x18] sm:$0xff] %v261_v3 }
  0x40   : > { %264 = vst [vmem:[%s4078_s22 + $0x20] sm:$0xff] %v263_v4  ;;  %266 = vst [vmem:[%s4078_s22 + $0x28] sm:$0xff] %v265_v5  ;;  %v267_v6 = vld [vmem:[%s4073_s29 + $0x60] sm:$0xff]  ;;  %v269_v7 = vld [vmem:[%s4073_s29 + $0x68] sm:$0xff] }
  0x41   : > { %v271_v8 = vld [vmem:[%s4073_s29 + $0x80] sm:$0xff]  ;;  %268 = vst [vmem:[%s4078_s22 + $0x30] sm:$0xff] %v267_v6  ;;  %270 = vst [vmem:[%s4078_s22 + $0x38] sm:$0xff] %v269_v7  ;;  %v273_v9 = vld [vmem:[%s4073_s29 + $0x88] sm:$0xff] }
  0x42   : > { %272 = vst [vmem:[%s4078_s22 + $0x40] sm:$0xff] %v271_v8  ;;  %v275_v10 = vld [vmem:[%s4073_s29 + $0xa0] sm:$0xff]  ;;  %v277_v11 = vld [vmem:[%s4073_s29 + $0xa8] sm:$0xff]  ;;  %274 = vst [vmem:[%s4078_s22 + $0x48] sm:$0xff] %v273_v9 }
  0x43   : > { %276 = vst [vmem:[%s4078_s22 + $0x50] sm:$0xff] %v275_v10  ;;  %278 = vst [vmem:[%s4078_s22 + $0x58] sm:$0xff] %v277_v11  ;;  %v279_v12 = vld [vmem:[%s4073_s29 + $0xc0] sm:$0xff]  ;;  %v281_v13 = vld [vmem:[%s4073_s29 + $0xc8] sm:$0xff] }
  0x44   : > { %v283_v14 = vld [vmem:[%s4073_s29 + $0xe0] sm:$0xff]  ;;  %280 = vst [vmem:[%s4078_s22 + $0x60] sm:$0xff] %v279_v12  ;;  %282 = vst [vmem:[%s4078_s22 + $0x68] sm:$0xff] %v281_v13  ;;  %v285_v15 = vld [vmem:[%s4073_s29 + $0xe8] sm:$0xff] }
  0x45   : > { %284 = vst [vmem:[%s4078_s22 + $0x70] sm:$0xff] %v283_v14  ;;  %v287_v16 = vld [vmem:[%s4073_s29 + $0x100] sm:$0xff]  ;;  %v289_v17 = vld [vmem:[%s4073_s29 + $0x108] sm:$0xff]  ;;  %286 = vst [vmem:[%s4078_s22 + $0x78] sm:$0xff] %v285_v15 }
  0x46   : > { %288 = vst [vmem:[%s4078_s22 + $0x80] sm:$0xff] %v287_v16  ;;  %290 = vst [vmem:[%s4078_s22 + $0x88] sm:$0xff] %v289_v17  ;;  %v291_v18 = vld [vmem:[%s4073_s29 + $0x120] sm:$0xff]  ;;  %v293_v19 = vld [vmem:[%s4073_s29 + $0x128] sm:$0xff] }
  0x47   : > { %v295_v20 = vld [vmem:[%s4073_s29 + $0x140] sm:$0xff]  ;;  %292 = vst [vmem:[%s4078_s22 + $0x90] sm:$0xff] %v291_v18  ;;  %294 = vst [vmem:[%s4078_s22 + $0x98] sm:$0xff] %v293_v19  ;;  %v297_v21 = vld [vmem:[%s4073_s29 + $0x148] sm:$0xff] }
  0x48   : > { %296 = vst [vmem:[%s4078_s22 + $0xa0] sm:$0xff] %v295_v20  ;;  %v299_v22 = vld [vmem:[%s4073_s29 + $0x160] sm:$0xff]  ;;  %v301_v23 = vld [vmem:[%s4073_s29 + $0x168] sm:$0xff]  ;;  %298 = vst [vmem:[%s4078_s22 + $0xa8] sm:$0xff] %v297_v21 }
  0x49   : > { %300 = vst [vmem:[%s4078_s22 + $0xb0] sm:$0xff] %v299_v22  ;;  %302 = vst [vmem:[%s4078_s22 + $0xb8] sm:$0xff] %v301_v23  ;;  %v303_v24 = vld [vmem:[%s4073_s29 + $0x180] sm:$0xff]  ;;  %v305_v25 = vld [vmem:[%s4073_s29 + $0x188] sm:$0xff] }
  0x4a   : > { %v307_v26 = vld [vmem:[%s4073_s29 + $0x1a0] sm:$0xff]  ;;  %304 = vst [vmem:[%s4078_s22 + $0xc0] sm:$0xff] %v303_v24  ;;  %306 = vst [vmem:[%s4078_s22 + $0xc8] sm:$0xff] %v305_v25  ;;  %v309_v27 = vld [vmem:[%s4073_s29 + $0x1a8] sm:$0xff] }
  0x4b   : > { %308 = vst [vmem:[%s4078_s22 + $0xd0] sm:$0xff] %v307_v26  ;;  %v311_v28 = vld [vmem:[%s4073_s29 + $0x1c0] sm:$0xff]  ;;  %v313_v29 = vld [vmem:[%s4073_s29 + $0x1c8] sm:$0xff]  ;;  %310 = vst [vmem:[%s4078_s22 + $0xd8] sm:$0xff] %v309_v27 }
  0x4c   : > { %312 = vst [vmem:[%s4078_s22 + $0xe0] sm:$0xff] %v311_v28  ;;  %314 = vst [vmem:[%s4078_s22 + $0xe8] sm:$0xff] %v313_v29  ;;  %v315_v30 = vld [vmem:[%s4073_s29 + $0x1e0] sm:$0xff]  ;;  %v317_v31 = vld [vmem:[%s4073_s29 + $0x1e8] sm:$0xff] }
  0x4d   : > { %v319_v32 = vld [vmem:[%s4073_s29 + $0x200] sm:$0xff]  ;;  %316 = vst [vmem:[%s4078_s22 + $0xf0] sm:$0xff] %v315_v30  ;;  %318 = vst [vmem:[%s4078_s22 + $0xf8] sm:$0xff] %v317_v31  ;;  %v321_v33 = vld [vmem:[%s4073_s29 + $0x208] sm:$0xff] }
  0x4e   : > { %320 = vst [vmem:[%s4078_s22 + $0x100] sm:$0xff] %v319_v32  ;;  %v323_v34 = vld [vmem:[%s4073_s29 + $0x220] sm:$0xff]  ;;  %v325_v35 = vld [vmem:[%s4073_s29 + $0x228] sm:$0xff]  ;;  %322 = vst [vmem:[%s4078_s22 + $0x108] sm:$0xff] %v321_v33 }
  0x4f   : > { %324 = vst [vmem:[%s4078_s22 + $0x110] sm:$0xff] %v323_v34  ;;  %326 = vst [vmem:[%s4078_s22 + $0x118] sm:$0xff] %v325_v35  ;;  %v327_v36 = vld [vmem:[%s4073_s29 + $0x240] sm:$0xff]  ;;  %v329_v37 = vld [vmem:[%s4073_s29 + $0x248] sm:$0xff] }
  0x50   : > { %v331_v38 = vld [vmem:[%s4073_s29 + $0x260] sm:$0xff]  ;;  %328 = vst [vmem:[%s4078_s22 + $0x120] sm:$0xff] %v327_v36  ;;  %330 = vst [vmem:[%s4078_s22 + $0x128] sm:$0xff] %v329_v37  ;;  %v333_v39 = vld [vmem:[%s4073_s29 + $0x268] sm:$0xff] }
  0x51   : > { %332 = vst [vmem:[%s4078_s22 + $0x130] sm:$0xff] %v331_v38  ;;  %v335_v40 = vld [vmem:[%s4073_s29 + $0x280] sm:$0xff]  ;;  %v337_v41 = vld [vmem:[%s4073_s29 + $0x288] sm:$0xff]  ;;  %334 = vst [vmem:[%s4078_s22 + $0x138] sm:$0xff] %v333_v39 }
  0x52   : > { %336 = vst [vmem:[%s4078_s22 + $0x140] sm:$0xff] %v335_v40  ;;  %338 = vst [vmem:[%s4078_s22 + $0x148] sm:$0xff] %v337_v41  ;;  %v339_v42 = vld [vmem:[%s4073_s29 + $0x2a0] sm:$0xff]  ;;  %v341_v43 = vld [vmem:[%s4073_s29 + $0x2a8] sm:$0xff] }
  0x53   : > { %v343_v44 = vld [vmem:[%s4073_s29 + $0x2c0] sm:$0xff]  ;;  %340 = vst [vmem:[%s4078_s22 + $0x150] sm:$0xff] %v339_v42  ;;  %342 = vst [vmem:[%s4078_s22 + $0x158] sm:$0xff] %v341_v43  ;;  %v345_v45 = vld [vmem:[%s4073_s29 + $0x2c8] sm:$0xff] }
  0x54   : > { %344 = vst [vmem:[%s4078_s22 + $0x160] sm:$0xff] %v343_v44  ;;  %v347_v46 = vld [vmem:[%s4073_s29 + $0x2e0] sm:$0xff]  ;;  %v349_v47 = vld [vmem:[%s4073_s29 + $0x2e8] sm:$0xff]  ;;  %346 = vst [vmem:[%s4078_s22 + $0x168] sm:$0xff] %v345_v45 }
  0x55   : > { %348 = vst [vmem:[%s4078_s22 + $0x170] sm:$0xff] %v347_v46  ;;  %350 = vst [vmem:[%s4078_s22 + $0x178] sm:$0xff] %v349_v47  ;;  %v351_v48 = vld [vmem:[%s4073_s29 + $0x300] sm:$0xff]  ;;  %v353_v49 = vld [vmem:[%s4073_s29 + $0x308] sm:$0xff] }
  0x56   : > { %v355_v50 = vld [vmem:[%s4073_s29 + $0x320] sm:$0xff]  ;;  %352 = vst [vmem:[%s4078_s22 + $0x180] sm:$0xff] %v351_v48  ;;  %354 = vst [vmem:[%s4078_s22 + $0x188] sm:$0xff] %v353_v49  ;;  %v357_v51 = vld [vmem:[%s4073_s29 + $0x328] sm:$0xff] }
  0x57   : > { %356 = vst [vmem:[%s4078_s22 + $0x190] sm:$0xff] %v355_v50  ;;  %v359_v52 = vld [vmem:[%s4073_s29 + $0x340] sm:$0xff]  ;;  %v361_v53 = vld [vmem:[%s4073_s29 + $0x348] sm:$0xff]  ;;  %358 = vst [vmem:[%s4078_s22 + $0x198] sm:$0xff] %v357_v51 }
  0x58   : > { %360 = vst [vmem:[%s4078_s22 + $0x1a0] sm:$0xff] %v359_v52  ;;  %362 = vst [vmem:[%s4078_s22 + $0x1a8] sm:$0xff] %v361_v53  ;;  %v363_v54 = vld [vmem:[%s4073_s29 + $0x360] sm:$0xff]  ;;  %v365_v55 = vld [vmem:[%s4073_s29 + $0x368] sm:$0xff] }
  0x59   : > { %v367_v56 = vld [vmem:[%s4073_s29 + $0x380] sm:$0xff]  ;;  %364 = vst [vmem:[%s4078_s22 + $0x1b0] sm:$0xff] %v363_v54  ;;  %366 = vst [vmem:[%s4078_s22 + $0x1b8] sm:$0xff] %v365_v55  ;;  %v369_v57 = vld [vmem:[%s4073_s29 + $0x388] sm:$0xff] }
  0x5a   : > { %368 = vst [vmem:[%s4078_s22 + $0x1c0] sm:$0xff] %v367_v56  ;;  %v371_v58 = vld [vmem:[%s4073_s29 + $0x3a0] sm:$0xff]  ;;  %v373_v59 = vld [vmem:[%s4073_s29 + $0x3a8] sm:$0xff]  ;;  %370 = vst [vmem:[%s4078_s22 + $0x1c8] sm:$0xff] %v369_v57 }
  0x5b   : > { %372 = vst [vmem:[%s4078_s22 + $0x1d0] sm:$0xff] %v371_v58  ;;  %374 = vst [vmem:[%s4078_s22 + $0x1d8] sm:$0xff] %v373_v59  ;;  %v375_v60 = vld [vmem:[%s4073_s29 + $0x3c0] sm:$0xff]  ;;  %v377_v61 = vld [vmem:[%s4073_s29 + $0x3c8] sm:$0xff] }
  0x5c   : > { %v379_v62 = vld [vmem:[%s4073_s29 + $0x3e0] sm:$0xff]  ;;  %376 = vst [vmem:[%s4078_s22 + $0x1e0] sm:$0xff] %v375_v60  ;;  %378 = vst [vmem:[%s4078_s22 + $0x1e8] sm:$0xff] %v377_v61  ;;  %v381_v63 = vld [vmem:[%s4073_s29 + $0x3e8] sm:$0xff] }
  0x5d   : > { %380 = vst [vmem:[%s4078_s22 + $0x1f0] sm:$0xff] %v379_v62  ;;  %v383_v0 = vld [vmem:[%s4073_s29 + $0x400] sm:$0xff]  ;;  %v385_v1 = vld [vmem:[%s4073_s29 + $0x408] sm:$0xff]  ;;  %382 = vst [vmem:[%s4078_s22 + $0x1f8] sm:$0xff] %v381_v63 }
  0x5e   : > { %384 = vst [vmem:[%s4078_s22 + $0x200] sm:$0xff] %v383_v0  ;;  %386 = vst [vmem:[%s4078_s22 + $0x208] sm:$0xff] %v385_v1  ;;  %v387_v2 = vld [vmem:[%s4073_s29 + $0x420] sm:$0xff]  ;;  %v389_v3 = vld [vmem:[%s4073_s29 + $0x428] sm:$0xff] }
  0x5f   : > { %v391_v4 = vld [vmem:[%s4073_s29 + $0x440] sm:$0xff]  ;;  %388 = vst [vmem:[%s4078_s22 + $0x210] sm:$0xff] %v387_v2  ;;  %390 = vst [vmem:[%s4078_s22 + $0x218] sm:$0xff] %v389_v3  ;;  %v393_v5 = vld [vmem:[%s4073_s29 + $0x448] sm:$0xff] }
  0x60   : > { %392 = vst [vmem:[%s4078_s22 + $0x220] sm:$0xff] %v391_v4  ;;  %v395_v6 = vld [vmem:[%s4073_s29 + $0x460] sm:$0xff]  ;;  %v397_v7 = vld [vmem:[%s4073_s29 + $0x468] sm:$0xff]  ;;  %394 = vst [vmem:[%s4078_s22 + $0x228] sm:$0xff] %v393_v5 }
  0x61   : > { %396 = vst [vmem:[%s4078_s22 + $0x230] sm:$0xff] %v395_v6  ;;  %398 = vst [vmem:[%s4078_s22 + $0x238] sm:$0xff] %v397_v7  ;;  %v399_v8 = vld [vmem:[%s4073_s29 + $0x480] sm:$0xff]  ;;  %v401_v9 = vld [vmem:[%s4073_s29 + $0x488] sm:$0xff] }
  0x62   : > { %v403_v10 = vld [vmem:[%s4073_s29 + $0x4a0] sm:$0xff]  ;;  %400 = vst [vmem:[%s4078_s22 + $0x240] sm:$0xff] %v399_v8  ;;  %402 = vst [vmem:[%s4078_s22 + $0x248] sm:$0xff] %v401_v9  ;;  %v405_v11 = vld [vmem:[%s4073_s29 + $0x4a8] sm:$0xff] }
  0x63   : > { %404 = vst [vmem:[%s4078_s22 + $0x250] sm:$0xff] %v403_v10  ;;  %v407_v12 = vld [vmem:[%s4073_s29 + $0x4c0] sm:$0xff]  ;;  %v409_v13 = vld [vmem:[%s4073_s29 + $0x4c8] sm:$0xff]  ;;  %406 = vst [vmem:[%s4078_s22 + $0x258] sm:$0xff] %v405_v11 }
  0x64   : > { %408 = vst [vmem:[%s4078_s22 + $0x260] sm:$0xff] %v407_v12  ;;  %410 = vst [vmem:[%s4078_s22 + $0x268] sm:$0xff] %v409_v13  ;;  %v411_v14 = vld [vmem:[%s4073_s29 + $0x4e0] sm:$0xff]  ;;  %v413_v15 = vld [vmem:[%s4073_s29 + $0x4e8] sm:$0xff] }
  0x65   : > { %v415_v16 = vld [vmem:[%s4073_s29 + $0x500] sm:$0xff]  ;;  %412 = vst [vmem:[%s4078_s22 + $0x270] sm:$0xff] %v411_v14  ;;  %414 = vst [vmem:[%s4078_s22 + $0x278] sm:$0xff] %v413_v15  ;;  %v417_v17 = vld [vmem:[%s4073_s29 + $0x508] sm:$0xff] }
  0x66   : > { %416 = vst [vmem:[%s4078_s22 + $0x280] sm:$0xff] %v415_v16  ;;  %v419_v18 = vld [vmem:[%s4073_s29 + $0x520] sm:$0xff]  ;;  %v421_v19 = vld [vmem:[%s4073_s29 + $0x528] sm:$0xff]  ;;  %418 = vst [vmem:[%s4078_s22 + $0x288] sm:$0xff] %v417_v17 }
  0x67   : > { %420 = vst [vmem:[%s4078_s22 + $0x290] sm:$0xff] %v419_v18  ;;  %422 = vst [vmem:[%s4078_s22 + $0x298] sm:$0xff] %v421_v19  ;;  %v423_v20 = vld [vmem:[%s4073_s29 + $0x540] sm:$0xff]  ;;  %v425_v21 = vld [vmem:[%s4073_s29 + $0x548] sm:$0xff] }
  0x68   : > { %v427_v22 = vld [vmem:[%s4073_s29 + $0x560] sm:$0xff]  ;;  %424 = vst [vmem:[%s4078_s22 + $0x2a0] sm:$0xff] %v423_v20  ;;  %426 = vst [vmem:[%s4078_s22 + $0x2a8] sm:$0xff] %v425_v21  ;;  %v429_v23 = vld [vmem:[%s4073_s29 + $0x568] sm:$0xff] }
  0x69   : > { %428 = vst [vmem:[%s4078_s22 + $0x2b0] sm:$0xff] %v427_v22  ;;  %v431_v24 = vld [vmem:[%s4073_s29 + $0x580] sm:$0xff]  ;;  %v433_v25 = vld [vmem:[%s4073_s29 + $0x588] sm:$0xff]  ;;  %430 = vst [vmem:[%s4078_s22 + $0x2b8] sm:$0xff] %v429_v23 }
  0x6a   : > { %432 = vst [vmem:[%s4078_s22 + $0x2c0] sm:$0xff] %v431_v24  ;;  %434 = vst [vmem:[%s4078_s22 + $0x2c8] sm:$0xff] %v433_v25  ;;  %v435_v26 = vld [vmem:[%s4073_s29 + $0x5a0] sm:$0xff]  ;;  %v437_v27 = vld [vmem:[%s4073_s29 + $0x5a8] sm:$0xff] }
  0x6b   : > { %v439_v28 = vld [vmem:[%s4073_s29 + $0x5c0] sm:$0xff]  ;;  %436 = vst [vmem:[%s4078_s22 + $0x2d0] sm:$0xff] %v435_v26  ;;  %438 = vst [vmem:[%s4078_s22 + $0x2d8] sm:$0xff] %v437_v27  ;;  %v441_v29 = vld [vmem:[%s4073_s29 + $0x5c8] sm:$0xff] }
  0x6c   : > { %440 = vst [vmem:[%s4078_s22 + $0x2e0] sm:$0xff] %v439_v28  ;;  %v443_v30 = vld [vmem:[%s4073_s29 + $0x5e0] sm:$0xff]  ;;  %v445_v31 = vld [vmem:[%s4073_s29 + $0x5e8] sm:$0xff]  ;;  %442 = vst [vmem:[%s4078_s22 + $0x2e8] sm:$0xff] %v441_v29 }
  0x6d   : > { %444 = vst [vmem:[%s4078_s22 + $0x2f0] sm:$0xff] %v443_v30  ;;  %446 = vst [vmem:[%s4078_s22 + $0x2f8] sm:$0xff] %v445_v31  ;;  %v447_v32 = vld [vmem:[%s4073_s29 + $0x600] sm:$0xff]  ;;  %v449_v33 = vld [vmem:[%s4073_s29 + $0x608] sm:$0xff] }
  0x6e   : > { %v451_v34 = vld [vmem:[%s4073_s29 + $0x620] sm:$0xff]  ;;  %448 = vst [vmem:[%s4078_s22 + $0x300] sm:$0xff] %v447_v32  ;;  %450 = vst [vmem:[%s4078_s22 + $0x308] sm:$0xff] %v449_v33  ;;  %v453_v35 = vld [vmem:[%s4073_s29 + $0x628] sm:$0xff] }
  0x6f   : > { %452 = vst [vmem:[%s4078_s22 + $0x310] sm:$0xff] %v451_v34  ;;  %v455_v36 = vld [vmem:[%s4073_s29 + $0x640] sm:$0xff]  ;;  %v457_v37 = vld [vmem:[%s4073_s29 + $0x648] sm:$0xff]  ;;  %454 = vst [vmem:[%s4078_s22 + $0x318] sm:$0xff] %v453_v35 }
  0x70   : > { %456 = vst [vmem:[%s4078_s22 + $0x320] sm:$0xff] %v455_v36  ;;  %458 = vst [vmem:[%s4078_s22 + $0x328] sm:$0xff] %v457_v37  ;;  %v459_v38 = vld [vmem:[%s4073_s29 + $0x660] sm:$0xff]  ;;  %v461_v39 = vld [vmem:[%s4073_s29 + $0x668] sm:$0xff] }
  0x71   : > { %v463_v40 = vld [vmem:[%s4073_s29 + $0x680] sm:$0xff]  ;;  %460 = vst [vmem:[%s4078_s22 + $0x330] sm:$0xff] %v459_v38  ;;  %462 = vst [vmem:[%s4078_s22 + $0x338] sm:$0xff] %v461_v39  ;;  %v465_v41 = vld [vmem:[%s4073_s29 + $0x688] sm:$0xff] }
  0x72   : > { %464 = vst [vmem:[%s4078_s22 + $0x340] sm:$0xff] %v463_v40  ;;  %v467_v42 = vld [vmem:[%s4073_s29 + $0x6a0] sm:$0xff]  ;;  %v469_v43 = vld [vmem:[%s4073_s29 + $0x6a8] sm:$0xff]  ;;  %466 = vst [vmem:[%s4078_s22 + $0x348] sm:$0xff] %v465_v41 }
  0x73   : > { %468 = vst [vmem:[%s4078_s22 + $0x350] sm:$0xff] %v467_v42  ;;  %470 = vst [vmem:[%s4078_s22 + $0x358] sm:$0xff] %v469_v43  ;;  %v471_v44 = vld [vmem:[%s4073_s29 + $0x6c0] sm:$0xff]  ;;  %v473_v45 = vld [vmem:[%s4073_s29 + $0x6c8] sm:$0xff] }
  0x74   : > { %v475_v46 = vld [vmem:[%s4073_s29 + $0x6e0] sm:$0xff]  ;;  %472 = vst [vmem:[%s4078_s22 + $0x360] sm:$0xff] %v471_v44  ;;  %474 = vst [vmem:[%s4078_s22 + $0x368] sm:$0xff] %v473_v45  ;;  %v477_v47 = vld [vmem:[%s4073_s29 + $0x6e8] sm:$0xff] }
  0x75   : > { %476 = vst [vmem:[%s4078_s22 + $0x370] sm:$0xff] %v475_v46  ;;  %v479_v48 = vld [vmem:[%s4073_s29 + $0x700] sm:$0xff]  ;;  %v481_v49 = vld [vmem:[%s4073_s29 + $0x708] sm:$0xff]  ;;  %478 = vst [vmem:[%s4078_s22 + $0x378] sm:$0xff] %v477_v47 }
  0x76   : > { %480 = vst [vmem:[%s4078_s22 + $0x380] sm:$0xff] %v479_v48  ;;  %482 = vst [vmem:[%s4078_s22 + $0x388] sm:$0xff] %v481_v49  ;;  %v483_v50 = vld [vmem:[%s4073_s29 + $0x720] sm:$0xff]  ;;  %v485_v51 = vld [vmem:[%s4073_s29 + $0x728] sm:$0xff] }
  0x77   : > { %v487_v52 = vld [vmem:[%s4073_s29 + $0x740] sm:$0xff]  ;;  %484 = vst [vmem:[%s4078_s22 + $0x390] sm:$0xff] %v483_v50  ;;  %486 = vst [vmem:[%s4078_s22 + $0x398] sm:$0xff] %v485_v51  ;;  %v489_v53 = vld [vmem:[%s4073_s29 + $0x748] sm:$0xff] }
  0x78   : > { %488 = vst [vmem:[%s4078_s22 + $0x3a0] sm:$0xff] %v487_v52  ;;  %v491_v54 = vld [vmem:[%s4073_s29 + $0x760] sm:$0xff]  ;;  %v493_v55 = vld [vmem:[%s4073_s29 + $0x768] sm:$0xff]  ;;  %490 = vst [vmem:[%s4078_s22 + $0x3a8] sm:$0xff] %v489_v53 }
  0x79   : > { %492 = vst [vmem:[%s4078_s22 + $0x3b0] sm:$0xff] %v491_v54  ;;  %494 = vst [vmem:[%s4078_s22 + $0x3b8] sm:$0xff] %v493_v55  ;;  %v495_v56 = vld [vmem:[%s4073_s29 + $0x780] sm:$0xff]  ;;  %v497_v57 = vld [vmem:[%s4073_s29 + $0x788] sm:$0xff] }
  0x7a   : > { %v499_v58 = vld [vmem:[%s4073_s29 + $0x7a0] sm:$0xff]  ;;  %496 = vst [vmem:[%s4078_s22 + $0x3c0] sm:$0xff] %v495_v56  ;;  %498 = vst [vmem:[%s4078_s22 + $0x3c8] sm:$0xff] %v497_v57  ;;  %v501_v59 = vld [vmem:[%s4073_s29 + $0x7a8] sm:$0xff] }
  0x7b   : > { %500 = vst [vmem:[%s4078_s22 + $0x3d0] sm:$0xff] %v499_v58  ;;  %v503_v60 = vld [vmem:[%s4073_s29 + $0x7c0] sm:$0xff]  ;;  %v505_v61 = vld [vmem:[%s4073_s29 + $0x7c8] sm:$0xff]  ;;  %502 = vst [vmem:[%s4078_s22 + $0x3d8] sm:$0xff] %v501_v59 }
  0x7c   : > { %504 = vst [vmem:[%s4078_s22 + $0x3e0] sm:$0xff] %v503_v60  ;;  %506 = vst [vmem:[%s4078_s22 + $0x3e8] sm:$0xff] %v505_v61  ;;  %v507_v62 = vld [vmem:[%s4073_s29 + $0x7e0] sm:$0xff]  ;;  %v509_v63 = vld [vmem:[%s4073_s29 + $0x7e8] sm:$0xff] }
  0x7d   : > { %508 = vst [vmem:[%s4078_s22 + $0x3f0] sm:$0xff] %v507_v62  ;;  %510 = vst [vmem:[%s4078_s22 + $0x3f8] sm:$0xff] %v509_v63 }
  0x7e PF: > { %p3215_p3 = scmp.ge.s32.totalorder %s3958_s15, 1  ;;  %p524_p4 = scmp.lt.s32.totalorder %s3958_s15, 5 }
  0x80   : > { %p525_p5 = pnand %p3215_p3, %p524_p4 }
  0x81   : > { %s531_s30 = sand.u32 (!%p525_p5), 1, %s3934_s1   ;;  %s3217_s8 = sshll.u32 (!%p525_p5), %s3946_s12, 2 }
  0x82   : > { %528 = sbr.rel (%p525_p5) target bundleno = 1272 (0x4f8), region = 59  ;;  %s3216_s9 = sshll.u32 (!%p525_p5), %s531_s30, 10 }
  0x83   : > { %p573_p6 = scmp.lt.s32.totalorder (!%p525_p5), %s3217_s8, 7  ;;  %p578_p7 = scmp.lt.s32.totalorder (!%p525_p5), %s3946_s12, 1 }
  0x84   : > { %s4349_s25 = scalar_lea.vmem (!%p525_p5), [#allocation6], %s3216_s9  ;;  %p3220_p8 = scmp.ne.s32.totalorder (!%p525_p5), %s3942_s11, 0 }
  0x87   : > { %s4883_s8 = smov (!%p573_p6, %s3217_s8), 7  ;;  %586 = sbr.rel (%p3220_p8) target bundleno = 173 (0xad), region = 67 }
  0x88   : > { %s579_s0 = scalar_select %p578_p7, %s3946_s12, 1 }
  0x89   : > { %s3218_s19 = sshll.u32 %s4883_s8, 2 }
  0x8a   : > { %s4342_s23 = scalar_lea.vmem %s4867_s6, %s3218_s19  ;;  %s3219_s24 = sshll.u32 %s579_s0, 3 }
  0x8b   : > { %s4347_s28 = scalar_lea.vmem %s4868_s7, %s3219_s24 }
  0x8c   : > { %v3962_v0 = vmov 0.0  }
  0x8d   : > { %587 = vst [vmem:[#allocation2 + $0xb0] sm:$0xff] %v3962_v0  ;;  %588 = vst [vmem:[#allocation2 + $0x1b0] sm:$0xff] %v3962_v0 }
  0x8e   : > { %589 = vst [vmem:[#allocation2 + $0xd8] sm:$0xff] %v3962_v0  ;;  %590 = vst [vmem:[#allocation2 + $0x18] sm:$0xff] %v3962_v0 }
  0x8f   : > { %591 = vst [vmem:[#allocation2 + $0x50] sm:$0xff] %v3962_v0  ;;  %592 = vst [vmem:[#allocation2 + $0x168] sm:$0xff] %v3962_v0 }
  0x90   : > { %593 = vst [vmem:[#allocation2 + $0x130] sm:$0xff] %v3962_v0  ;;  %594 = vst [vmem:[#allocation2 + $0x48] sm:$0xff] %v3962_v0 }
  0x91   : > { %595 = vst [vmem:[#allocation2 + $0x180] sm:$0xff] %v3962_v0  ;;  %596 = vst [vmem:[#allocation2 + $0x110] sm:$0xff] %v3962_v0 }
  0x92   : > { %597 = vst [vmem:[#allocation2 + $0x118] sm:$0xff] %v3962_v0  ;;  %598 = vst [vmem:[#allocation2 + $0x98] sm:$0xff] %v3962_v0 }
  0x93   : > { %599 = vst [vmem:[#allocation2 + $0x120] sm:$0xff] %v3962_v0  ;;  %600 = vst [vmem:[#allocation2 + $0x150] sm:$0xff] %v3962_v0 }
  0x94   : > { %601 = vst [vmem:[#allocation2 + $0x108] sm:$0xff] %v3962_v0  ;;  %602 = vst [vmem:[#allocation2 + $0x60] sm:$0xff] %v3962_v0 }
  0x95   : > { %603 = vst [vmem:[#allocation2 + $0xe0] sm:$0xff] %v3962_v0  ;;  %604 = vst [vmem:[#allocation2 + $0x188] sm:$0xff] %v3962_v0 }
  0x96   : > { %605 = vst [vmem:[#allocation2 + $0x138] sm:$0xff] %v3962_v0  ;;  %606 = vst [vmem:[#allocation2 + $0x140] sm:$0xff] %v3962_v0 }
  0x97   : > { %607 = vst [vmem:[#allocation2 + $0x80] sm:$0xff] %v3962_v0  ;;  %608 = vst [vmem:[#allocation2 + $0x1a8] sm:$0xff] %v3962_v0 }
  0x98   : > { %609 = vst [vmem:[#allocation2 + $0x1b8] sm:$0xff] %v3962_v0  ;;  %610 = vst [vmem:[#allocation2 + $0x28] sm:$0xff] %v3962_v0 }
  0x99   : > { %611 = vst [vmem:[#allocation2 + $0x1e8] sm:$0xff] %v3962_v0  ;;  %612 = vst [vmem:[#allocation2 + $0xf8] sm:$0xff] %v3962_v0 }
  0x9a   : > { %613 = vst [vmem:[#allocation2 + $0x160] sm:$0xff] %v3962_v0  ;;  %614 = vst [vmem:[#allocation2 + $0x30] sm:$0xff] %v3962_v0 }
  0x9b   : > { %615 = vst [vmem:[#allocation2 + $0x1e0] sm:$0xff] %v3962_v0  ;;  %616 = vst [vmem:[#allocation2] sm:$0xff] %v3962_v0 }
  0x9c   : > { %617 = vst [vmem:[#allocation2 + $0xf0] sm:$0xff] %v3962_v0  ;;  %618 = vst [vmem:[#allocation2 + $0x8] sm:$0xff] %v3962_v0 }
  0x9d   : > { %619 = vst [vmem:[#allocation2 + $0x148] sm:$0xff] %v3962_v0  ;;  %620 = vst [vmem:[#allocation2 + $0x1d0] sm:$0xff] %v3962_v0 }
  0x9e   : > { %621 = vst [vmem:[#allocation2 + $0x100] sm:$0xff] %v3962_v0  ;;  %622 = vst [vmem:[#allocation2 + $0xc8] sm:$0xff] %v3962_v0 }
  0x9f   : > { %623 = vst [vmem:[#allocation2 + $0x40] sm:$0xff] %v3962_v0  ;;  %624 = vst [vmem:[#allocation2 + $0x1f8] sm:$0xff] %v3962_v0 }
  0xa0   : > { %625 = vst [vmem:[#allocation2 + $0x20] sm:$0xff] %v3962_v0  ;;  %626 = vst [vmem:[#allocation2 + $0x128] sm:$0xff] %v3962_v0 }
  0xa1   : > { %627 = vst [vmem:[#allocation2 + $0x1a0] sm:$0xff] %v3962_v0  ;;  %628 = vst [vmem:[#allocation2 + $0x1f0] sm:$0xff] %v3962_v0 }
  0xa2   : > { %629 = vst [vmem:[#allocation2 + $0xe8] sm:$0xff] %v3962_v0  ;;  %630 = vst [vmem:[#allocation2 + $0x78] sm:$0xff] %v3962_v0 }
  0xa3   : > { %631 = vst [vmem:[#allocation2 + $0x70] sm:$0xff] %v3962_v0  ;;  %632 = vst [vmem:[#allocation2 + $0x90] sm:$0xff] %v3962_v0 }
  0xa4   : > { %633 = vst [vmem:[#allocation2 + $0x1d8] sm:$0xff] %v3962_v0  ;;  %634 = vst [vmem:[#allocation2 + $0xd0] sm:$0xff] %v3962_v0 }
  0xa5   : > { %635 = vst [vmem:[#allocation2 + $0xb8] sm:$0xff] %v3962_v0  ;;  %636 = vst [vmem:[#allocation2 + $0x88] sm:$0xff] %v3962_v0 }
  0xa6   : > { %637 = vst [vmem:[#allocation2 + $0xa8] sm:$0xff] %v3962_v0  ;;  %638 = vst [vmem:[#allocation2 + $0x1c8] sm:$0xff] %v3962_v0 }
  0xa7   : > { %639 = vst [vmem:[#allocation2 + $0x170] sm:$0xff] %v3962_v0  ;;  %640 = vst [vmem:[#allocation2 + $0x178] sm:$0xff] %v3962_v0 }
  0xa8   : > { %641 = vst [vmem:[#allocation2 + $0x68] sm:$0xff] %v3962_v0  ;;  %642 = vst [vmem:[#allocation2 + $0x190] sm:$0xff] %v3962_v0 }
  0xa9   : > { %643 = vst [vmem:[#allocation2 + $0x198] sm:$0xff] %v3962_v0  ;;  %644 = vst [vmem:[#allocation2 + $0x38] sm:$0xff] %v3962_v0 }
  0xaa   : > { %645 = vst [vmem:[#allocation2 + $0xc0] sm:$0xff] %v3962_v0  ;;  %646 = vst [vmem:[#allocation2 + $0x1c0] sm:$0xff] %v3962_v0 }
  0xab   : > { %647 = vst [vmem:[#allocation2 + $0x158] sm:$0xff] %v3962_v0  ;;  %648 = vst [vmem:[#allocation2 + $0x10] sm:$0xff] %v3962_v0 }
  0xac   : > { %649 = vst [vmem:[#allocation2 + $0x58] sm:$0xff] %v3962_v0  ;;  %650 = vst [vmem:[#allocation2 + $0xa0] sm:$0xff] %v3962_v0 }
  0xad PF: > { %s651_s1 = sld [smem:[#allocation5 + %s3946_s12]] }
  0xb3   : > { %p3221_p9 = scmp.ge.s32.totalorder %s3942_s11, %s651_s1 }
  0xb4   : > { %s656_s29 = sshra.s32 (!%p3221_p9), %s3942_s11, 7  ;;  %s661_s22 = sand.u32 (!%p3221_p9), 127, %s3942_s11 }
  0xb5   : > { %655 = sbr.rel (%p3221_p9) target bundleno = 709 (0x2c5), region = 71  ;;  %s658_s30 = sadd.s32 (!%p3221_p9), %s3946_s12, %s656_s29 }
  0xb6   : > { %s3222_s8 = sshll.u32 (!%p3221_p9), %s658_s30, 7 }
  0xb7   : > { %s662_s9 = sadd.s32 (!%p3221_p9), %s3222_s8, %s661_s22 }
  0xb8   : > { %s663_s0 = sld [smem:[#allocation4 + %s662_s9]] (!%p3221_p9) }
  0xba   : > { %v3963_v1 = vmov 0   ;;  %v3676_v2 = vld [vmem:[%s4349_s25 + $0x4] ss:$16 sps:$4 sm:$0xff]   ;;  %v3679_v3 = vld [vmem:[%s4349_s25 + $0xc] ss:$16 sps:$4 sm:$0xff]  }
  0xbb   : > { %1757 = vmatprep.subr.bf16.mxu0 %v3963_v1  ;;  %2046 = vmatprep.subr.bf16.mxu1 %v3963_v1  ;;  %v3674_v36 = vld [vmem:[%s4349_s25] ss:$16 sps:$4 sm:$0xff]   ;;  %v3677_v37 = vld [vmem:[%s4349_s25 + $0x8] ss:$16 sps:$4 sm:$0xff]   ;;  %v3680_v38 = vld [vmem:[%s4349_s25 + $0x24] ss:$16 sps:$4 sm:$0xff]  }
  0xbc   : > { %1789 = vmatprep.mubr.bf16.mxu0 %v3676_v2  ;;  %2078 = vmatprep.mubr.bf16.mxu1 %v3679_v3  ;;  %v3682_v39 = vld [vmem:[%s4349_s25 + $0x2c] ss:$16 sps:$4 sm:$0xff]   ;;  %v3684_v40 = vld [vmem:[%s4349_s25 + $0x20] ss:$16 sps:$4 sm:$0xff]   ;;  %v3685_v41 = vld [vmem:[%s4349_s25 + $0x28] ss:$16 sps:$4 sm:$0xff]  }
  0xbd   : > { %v3686_v42 = vld [vmem:[%s4349_s25 + $0x44] ss:$16 sps:$4 sm:$0xff]   ;;  %v3688_v43 = vld [vmem:[%s4349_s25 + $0x4c] ss:$16 sps:$4 sm:$0xff]   ;;  %v3690_v44 = vld [vmem:[%s4349_s25 + $0x40] ss:$16 sps:$4 sm:$0xff]  }
  0xbe   : > { %s3223_s19 = sshll.u32 %s663_s0, 9  ;;  %v3691_v45 = vld [vmem:[%s4349_s25 + $0x48] ss:$16 sps:$4 sm:$0xff]   ;;  %v3692_v46 = vld [vmem:[%s4349_s25 + $0x64] ss:$16 sps:$4 sm:$0xff]  }
  0xbf   : > { %s665_s20 = sshra.s32 %s3223_s19, 3  ;;  %v3694_v47 = vld [vmem:[%s4349_s25 + $0x6c] ss:$16 sps:$4 sm:$0xff]   ;;  %v3696_v48 = vld [vmem:[%s4349_s25 + $0x60] ss:$16 sps:$4 sm:$0xff]  }
  0xc0   : > { %s3224_s21 = sshll.u32 %s665_s20, 2  ;;  %v3697_v49 = vld [vmem:[%s4349_s25 + $0x68] ss:$16 sps:$4 sm:$0xff]   ;;  %v3698_v50 = vld [vmem:[%s4349_s25 + $0x84] ss:$16 sps:$4 sm:$0xff]  }
  0xc1   : > { %s4428_s27 = scalar_lea.vmem %s4864_s3, %s3224_s21  ;;  %v3700_v51 = vld [vmem:[%s4349_s25 + $0x8c] ss:$16 sps:$4 sm:$0xff]   ;;  %v3702_v52 = vld [vmem:[%s4349_s25 + $0x80] ss:$16 sps:$4 sm:$0xff]   ;;  %v3703_v53 = vld [vmem:[%s4349_s25 + $0x88] ss:$16 sps:$4 sm:$0xff]  }
  0xc2   : > { %v3642_v4 = vld [vmem:[%s4428_s27 + $0x38] sm:$0xff]   ;;  %v3644_v6 = vld [vmem:[%s4428_s27 + $0x30] sm:$0xff]   ;;  %v3646_v8 = vld [vmem:[%s4428_s27 + $0x28] sm:$0xff]  }
  0xc3   : > { %v3643_v5 = vld [vmem:[%s4428_s27 + $0xb8] sm:$0xff]   ;;  %1758 = vmatpush1.bf16.msra.mxu0 %v3642_v4  ;;  %v3645_v7 = vld [vmem:[%s4428_s27 + $0xb0] sm:$0xff]   ;;  %v3647_v9 = vld [vmem:[%s4428_s27 + $0xa8] sm:$0xff]  }
  0xc4   : > { %2047 = vmatpush1.bf16.msra.mxu1 %v3643_v5  ;;  %1759 = vmatprep.subr.bf16.mxu0 %v3963_v1  ;;  %v3648_v10 = vld [vmem:[%s4428_s27 + $0x20] sm:$0xff]   ;;  %v3650_v12 = vld [vmem:[%s4428_s27 + $0x18] sm:$0xff]   ;;  %v3652_v14 = vld [vmem:[%s4428_s27 + $0x10] sm:$0xff]  }
  0xc5   : > { %2048 = vmatprep.subr.bf16.mxu1 %v3963_v1  ;;  %v3649_v11 = vld [vmem:[%s4428_s27 + $0xa0] sm:$0xff]   ;;  %v3651_v13 = vld [vmem:[%s4428_s27 + $0x98] sm:$0xff]   ;;  %v3653_v15 = vld [vmem:[%s4428_s27 + $0x90] sm:$0xff]  }
  0xc6   : > { %v3654_v16 = vld [vmem:[%s4428_s27 + $0x8] sm:$0xff]   ;;  %v3656_v18 = vld [vmem:[%s4428_s27] sm:$0xff]   ;;  %v3658_v20 = vld [vmem:[%s4428_s27 + $0x78] sm:$0xff]  }
  0xc7   : > { %1760 = vmatpush1.bf16.msra.mxu0 %v3644_v6  ;;  %v3655_v17 = vld [vmem:[%s4428_s27 + $0x88] sm:$0xff]   ;;  %v3657_v19 = vld [vmem:[%s4428_s27 + $0x80] sm:$0xff]   ;;  %v3659_v21 = vld [vmem:[%s4428_s27 + $0xf8] sm:$0xff]  }
  0xc8   : > { %2049 = vmatpush1.bf16.msra.mxu1 %v3645_v7  ;;  %1761 = vmatprep.subr.bf16.mxu0 %v3963_v1  ;;  %v3660_v22 = vld [vmem:[%s4428_s27 + $0x70] sm:$0xff]   ;;  %v3662_v24 = vld [vmem:[%s4428_s27 + $0x68] sm:$0xff]   ;;  %v3664_v26 = vld [vmem:[%s4428_s27 + $0x60] sm:$0xff]  }
  0xc9   : > { %2050 = vmatprep.subr.bf16.mxu1 %v3963_v1  ;;  %v3661_v23 = vld [vmem:[%s4428_s27 + $0xf0] sm:$0xff]   ;;  %v3663_v25 = vld [vmem:[%s4428_s27 + $0xe8] sm:$0xff]   ;;  %v3665_v27 = vld [vmem:[%s4428_s27 + $0xe0] sm:$0xff]  }
  0xca   : > { %v3666_v28 = vld [vmem:[%s4428_s27 + $0x58] sm:$0xff]   ;;  %v3668_v30 = vld [vmem:[%s4428_s27 + $0x50] sm:$0xff]   ;;  %v3670_v32 = vld [vmem:[%s4428_s27 + $0x48] sm:$0xff]  }
  0xcb   : > { %1762 = vmatpush1.bf16.msra.mxu0 %v3646_v8  ;;  %v3667_v29 = vld [vmem:[%s4428_s27 + $0xd8] sm:$0xff]   ;;  %v3669_v31 = vld [vmem:[%s4428_s27 + $0xd0] sm:$0xff]   ;;  %v3671_v33 = vld [vmem:[%s4428_s27 + $0xc8] sm:$0xff]  }
  0xcc   : > { %2051 = vmatpush1.bf16.msra.mxu1 %v3647_v9  ;;  %1763 = vmatprep.subr.bf16.mxu0 %v3963_v1  ;;  %v3672_v34 = vld [vmem:[%s4428_s27 + $0x40] sm:$0xff]   ;;  %v3706_v55 = vld [vmem:[%s4349_s25 + $0xac] ss:$16 sps:$4 sm:$0xff]   ;;  %v3709_v57 = vld [vmem:[%s4349_s25 + $0xa8] ss:$16 sps:$4 sm:$0xff]  }
  0xcd   : > { %2052 = vmatprep.subr.bf16.mxu1 %v3963_v1  ;;  %v3673_v35 = vld [vmem:[%s4428_s27 + $0xc0] sm:$0xff]   ;;  %v3712_v59 = vld [vmem:[%s4349_s25 + $0xcc] ss:$16 sps:$4 sm:$0xff]   ;;  %v3715_v61 = vld [vmem:[%s4349_s25 + $0xc8] ss:$16 sps:$4 sm:$0xff]  }
  0xce   : > { %v3704_v54 = vld [vmem:[%s4349_s25 + $0xa4] ss:$16 sps:$4 sm:$0xff]   ;;  %v3708_v56 = vld [vmem:[%s4349_s25 + $0xa0] ss:$16 sps:$4 sm:$0xff]   ;;  %v3718_v63 = vld [vmem:[%s4349_s25 + $0xec] ss:$16 sps:$4 sm:$0xff]  }
  0xcf   : > { %1764 = vmatpush1.bf16.msra.mxu0 %v3648_v10  ;;  %v3710_v58 = vld [vmem:[%s4349_s25 + $0xc4] ss:$16 sps:$4 sm:$0xff]   ;;  %v3714_v60 = vld [vmem:[%s4349_s25 + $0xc0] ss:$16 sps:$4 sm:$0xff]   ;;  %v3724_v3 = vld [vmem:[%s4349_s25 + $0x10c] ss:$16 sps:$4 sm:$0xff]  }
  0xd0   : > { %2053 = vmatpush1.bf16.msra.mxu1 %v3649_v11  ;;  %1765 = vmatprep.subr.bf16.mxu0 %v3963_v1  ;;  %v3716_v62 = vld [vmem:[%s4349_s25 + $0xe4] ss:$16 sps:$4 sm:$0xff]   ;;  %v3720_v0 = vld [vmem:[%s4349_s25 + $0xe0] ss:$16 sps:$4 sm:$0xff]   ;;  %v3727_v5 = vld [vmem:[%s4349_s25 + $0x108] ss:$16 sps:$4 sm:$0xff]  }
  0xd1   : > { %2054 = vmatprep.subr.bf16.mxu1 %v3963_v1  ;;  %v3722_v2 = vld [vmem:[%s4349_s25 + $0x104] ss:$16 sps:$4 sm:$0xff]   ;;  %v3726_v4 = vld [vmem:[%s4349_s25 + $0x100] ss:$16 sps:$4 sm:$0xff]   ;;  %v3730_v7 = vld [vmem:[%s4349_s25 + $0x12c] ss:$16 sps:$4 sm:$0xff]  }
  0xd2   : > { %v3728_v6 = vld [vmem:[%s4349_s25 + $0x124] ss:$16 sps:$4 sm:$0xff]   ;;  %v3732_v8 = vld [vmem:[%s4349_s25 + $0x120] ss:$16 sps:$4 sm:$0xff]   ;;  %v3733_v9 = vld [vmem:[%s4349_s25 + $0x128] ss:$16 sps:$4 sm:$0xff]  }
  0xd3   : > { %1766 = vmatpush1.bf16.msra.mxu0 %v3650_v12  ;;  %v3734_v10 = vld [vmem:[%s4349_s25 + $0x144] ss:$16 sps:$4 sm:$0xff]   ;;  %v3736_v11 = vld [vmem:[%s4349_s25 + $0x14c] ss:$16 sps:$4 sm:$0xff]   ;;  %v3738_v12 = vld [vmem:[%s4349_s25 + $0x140] ss:$16 sps:$4 sm:$0xff]  }
  0xd4   : > { %2055 = vmatpush1.bf16.msra.mxu1 %v3651_v13  ;;  %1767 = vmatprep.subr.bf16.mxu0 %v3963_v1  ;;  %v3739_v13 = vld [vmem:[%s4349_s25 + $0x148] ss:$16 sps:$4 sm:$0xff]  }
  0xd5   : > { %2056 = vmatprep.subr.bf16.mxu1 %v3963_v1 }
  0xd7   : > { %1768 = vmatpush1.bf16.msra.mxu0 %v3652_v14  ;;  %v3740_v14 = vld [vmem:[%s4349_s25 + $0x164] ss:$16 sps:$4 sm:$0xff]  }
  0xd8   : > { %2057 = vmatpush1.bf16.msra.mxu1 %v3653_v15  ;;  %1769 = vmatprep.subr.bf16.mxu0 %v3963_v1  ;;  %v3742_v15 = vld [vmem:[%s4349_s25 + $0x16c] ss:$16 sps:$4 sm:$0xff]  }
  0xd9   : > { %2058 = vmatprep.subr.bf16.mxu1 %v3963_v1 }
  0xdb   : > { %1770 = vmatpush1.bf16.msra.mxu0 %v3654_v16  ;;  %v3744_v16 = vld [vmem:[%s4349_s25 + $0x160] ss:$16 sps:$4 sm:$0xff]  }
  0xdc   : > { %2059 = vmatpush1.bf16.msra.mxu1 %v3655_v17  ;;  %1771 = vmatprep.subr.bf16.mxu0 %v3963_v1  ;;  %v3745_v17 = vld [vmem:[%s4349_s25 + $0x168] ss:$16 sps:$4 sm:$0xff]  }
  0xdd   : > { %2060 = vmatprep.subr.bf16.mxu1 %v3963_v1 }
  0xdf   : > { %1772 = vmatpush1.bf16.msra.mxu0 %v3656_v18  ;;  %v3746_v18 = vld [vmem:[%s4349_s25 + $0x184] ss:$16 sps:$4 sm:$0xff]  }
  0xe0   : > { %2061 = vmatpush1.bf16.msra.mxu1 %v3657_v19  ;;  %1773 = vmatprep.subr.bf16.mxu0 %v3963_v1  ;;  %v3748_v19 = vld [vmem:[%s4349_s25 + $0x18c] ss:$16 sps:$4 sm:$0xff]  }
  0xe1   : > { %2062 = vmatprep.subr.bf16.mxu1 %v3963_v1 }
  0xe3   : > { %1774 = vmatpush2.bf16.msra.mxu0 %v3658_v20  ;;  %v3750_v20 = vld [vmem:[%s4349_s25 + $0x180] ss:$16 sps:$4 sm:$0xff]  }
  0xe4   : > { %2063 = vmatpush2.bf16.msra.mxu1 %v3659_v21  ;;  %1775 = vmatprep.subr.bf16.mxu0 %v3963_v1  ;;  %v3751_v21 = vld [vmem:[%s4349_s25 + $0x188] ss:$16 sps:$4 sm:$0xff]  }
  0xe5   : > { %2064 = vmatprep.subr.bf16.mxu1 %v3963_v1 }
  0xe7   : > { %1776 = vmatpush2.bf16.msra.mxu0 %v3660_v22  ;;  %v3752_v22 = vld [vmem:[%s4349_s25 + $0x1a4] ss:$16 sps:$4 sm:$0xff]  }
  0xe8   : > { %2065 = vmatpush2.bf16.msra.mxu1 %v3661_v23  ;;  %1777 = vmatprep.subr.bf16.mxu0 %v3963_v1  ;;  %v3754_v23 = vld [vmem:[%s4349_s25 + $0x1ac] ss:$16 sps:$4 sm:$0xff]  }
  0xe9   : > { %2066 = vmatprep.subr.bf16.mxu1 %v3963_v1 }
  0xeb   : > { %1778 = vmatpush2.bf16.msra.mxu0 %v3662_v24  ;;  %v3756_v24 = vld [vmem:[%s4349_s25 + $0x1a0] ss:$16 sps:$4 sm:$0xff]  }
  0xec   : > { %2067 = vmatpush2.bf16.msra.mxu1 %v3663_v25  ;;  %1779 = vmatprep.subr.bf16.mxu0 %v3963_v1  ;;  %v3757_v25 = vld [vmem:[%s4349_s25 + $0x1a8] ss:$16 sps:$4 sm:$0xff]  }
  0xed   : > { %2068 = vmatprep.subr.bf16.mxu1 %v3963_v1 }
  0xef   : > { %1780 = vmatpush2.bf16.msra.mxu0 %v3664_v26  ;;  %v3758_v26 = vld [vmem:[%s4349_s25 + $0x1c4] ss:$16 sps:$4 sm:$0xff]  }
  0xf0   : > { %2069 = vmatpush2.bf16.msra.mxu1 %v3665_v27  ;;  %1781 = vmatprep.subr.bf16.mxu0 %v3963_v1  ;;  %v3760_v27 = vld [vmem:[%s4349_s25 + $0x1cc] ss:$16 sps:$4 sm:$0xff]  }
  0xf1   : > { %2070 = vmatprep.subr.bf16.mxu1 %v3963_v1 }
  0xf3   : > { %1782 = vmatpush2.bf16.msra.mxu0 %v3666_v28  ;;  %v3762_v28 = vld [vmem:[%s4349_s25 + $0x1c0] ss:$16 sps:$4 sm:$0xff]  }
  0xf4   : > { %2071 = vmatpush2.bf16.msra.mxu1 %v3667_v29  ;;  %1783 = vmatprep.subr.bf16.mxu0 %v3963_v1  ;;  %v3763_v29 = vld [vmem:[%s4349_s25 + $0x1c8] ss:$16 sps:$4 sm:$0xff]  }
  0xf5   : > { %2072 = vmatprep.subr.bf16.mxu1 %v3963_v1 }
  0xf7   : > { %1784 = vmatpush2.bf16.msra.mxu0 %v3668_v30  ;;  %v3764_v30 = vld [vmem:[%s4349_s25 + $0x1e4] ss:$16 sps:$4 sm:$0xff]  }
  0xf8   : > { %2073 = vmatpush2.bf16.msra.mxu1 %v3669_v31  ;;  %1785 = vmatprep.subr.bf16.mxu0 %v3963_v1  ;;  %v3766_v31 = vld [vmem:[%s4349_s25 + $0x1ec] ss:$16 sps:$4 sm:$0xff]  }
  0xf9   : > { %2074 = vmatprep.subr.bf16.mxu1 %v3963_v1 }
  0xfb   : > { %1786 = vmatpush2.bf16.msra.mxu0 %v3670_v32  ;;  %v3768_v32 = vld [vmem:[%s4349_s25 + $0x1e0] ss:$16 sps:$4 sm:$0xff]  }
  0xfc   : > { %2075 = vmatpush2.bf16.msra.mxu1 %v3671_v33  ;;  %1787 = vmatprep.subr.bf16.mxu0 %v3963_v1  ;;  %v3769_v33 = vld [vmem:[%s4349_s25 + $0x1e8] ss:$16 sps:$4 sm:$0xff]  }
  0xfd   : > { %2076 = vmatprep.subr.bf16.mxu1 %v3963_v1  ;;  %v3721_v1 = vld [vmem:[%s4349_s25 + $0xe8] ss:$16 sps:$4 sm:$0xff]  }
  0xff   : > { %1788 = vmatpush2.bf16.msra.mxu0 %v3672_v34  ;;  %v3770_v34 = vld [vmem:[%s4349_s25 + $0x204] ss:$16 sps:$4 sm:$0xff]  }
 0x100   : > { %2077 = vmatpush2.bf16.msra.mxu1 %v3673_v35  ;;  %v3772_v35 = vld [vmem:[%s4349_s25 + $0x20c] ss:$16 sps:$4 sm:$0xff]  }
 0x102   : > { %1790 = vmatmul.mubr.bf16.vlgmr.msra.gmra.mxu0 %v3674_v36  ;;  %v3774_v36 = vld [vmem:[%s4349_s25 + $0x200] ss:$16 sps:$4 sm:$0xff]  }
 0x103   : > { %2079 = vmatmul.mubr.bf16.vlgmr.msra.gmra.mxu1 %v3677_v37  ;;  %1797 = vmatprep.mubr.bf16.mxu0 %v3680_v38  ;;  %v3775_v37 = vld [vmem:[%s4349_s25 + $0x208] ss:$16 sps:$4 sm:$0xff]   ;;  %v3776_v38 = vld [vmem:[%s4349_s25 + $0x224] ss:$16 sps:$4 sm:$0xff]  }
 0x104   : > { %2086 = vmatprep.mubr.bf16.mxu1 %v3682_v39  ;;  %v3778_v39 = vld [vmem:[%s4349_s25 + $0x22c] ss:$16 sps:$4 sm:$0xff]  }
 0x10a   : > { %1798 = vmatmul.mubr.bf16.gmra.mxu0 %v3684_v40  ;;  %v3780_v40 = vld [vmem:[%s4349_s25 + $0x220] ss:$16 sps:$4 sm:$0xff]  }
 0x10b   : > { %2087 = vmatmul.mubr.bf16.gmra.mxu1 %v3685_v41  ;;  %1805 = vmatprep.mubr.bf16.mxu0 %v3686_v42  ;;  %v3781_v41 = vld [vmem:[%s4349_s25 + $0x228] ss:$16 sps:$4 sm:$0xff]   ;;  %v3782_v42 = vld [vmem:[%s4349_s25 + $0x244] ss:$16 sps:$4 sm:$0xff]  }
 0x10c   : > { %2094 = vmatprep.mubr.bf16.mxu1 %v3688_v43  ;;  %v3784_v43 = vld [vmem:[%s4349_s25 + $0x24c] ss:$16 sps:$4 sm:$0xff]  }
 0x112   : > { %1806 = vmatmul.mubr.bf16.gmra.mxu0 %v3690_v44  ;;  %v3786_v44 = vld [vmem:[%s4349_s25 + $0x240] ss:$16 sps:$4 sm:$0xff]  }
 0x113   : > { %2095 = vmatmul.mubr.bf16.gmra.mxu1 %v3691_v45  ;;  %1813 = vmatprep.mubr.bf16.mxu0 %v3692_v46  ;;  %v3787_v45 = vld [vmem:[%s4349_s25 + $0x248] ss:$16 sps:$4 sm:$0xff]   ;;  %v3788_v46 = vld [vmem:[%s4349_s25 + $0x264] ss:$16 sps:$4 sm:$0xff]  }
 0x114   : > { %2102 = vmatprep.mubr.bf16.mxu1 %v3694_v47  ;;  %v3790_v47 = vld [vmem:[%s4349_s25 + $0x26c] ss:$16 sps:$4 sm:$0xff]  }
 0x11a   : > { %1814 = vmatmul.mubr.bf16.gmra.mxu0 %v3696_v48  ;;  %v3792_v48 = vld [vmem:[%s4349_s25 + $0x260] ss:$16 sps:$4 sm:$0xff]  }
 0x11b   : > { %2103 = vmatmul.mubr.bf16.gmra.mxu1 %v3697_v49  ;;  %1821 = vmatprep.mubr.bf16.mxu0 %v3698_v50  ;;  %v3793_v49 = vld [vmem:[%s4349_s25 + $0x268] ss:$16 sps:$4 sm:$0xff]   ;;  %v3794_v50 = vld [vmem:[%s4349_s25 + $0x284] ss:$16 sps:$4 sm:$0xff]  }
 0x11c   : > { %2110 = vmatprep.mubr.bf16.mxu1 %v3700_v51  ;;  %v3796_v51 = vld [vmem:[%s4349_s25 + $0x28c] ss:$16 sps:$4 sm:$0xff]  }
 0x122   : > { %1822 = vmatmul.mubr.bf16.gmra.mxu0 %v3702_v52  ;;  %v3798_v52 = vld [vmem:[%s4349_s25 + $0x280] ss:$16 sps:$4 sm:$0xff]  }
 0x123   : > { %2111 = vmatmul.mubr.bf16.gmra.mxu1 %v3703_v53  ;;  %1829 = vmatprep.mubr.bf16.mxu0 %v3704_v54  ;;  %v3799_v53 = vld [vmem:[%s4349_s25 + $0x288] ss:$16 sps:$4 sm:$0xff]   ;;  %v3800_v54 = vld [vmem:[%s4349_s25 + $0x2a4] ss:$16 sps:$4 sm:$0xff]  }
 0x124   : > { %2118 = vmatprep.mubr.bf16.mxu1 %v3706_v55  ;;  %v3802_v55 = vld [vmem:[%s4349_s25 + $0x2ac] ss:$16 sps:$4 sm:$0xff]  }
 0x12a   : > { %1830 = vmatmul.mubr.bf16.gmra.mxu0 %v3708_v56  ;;  %v3804_v56 = vld [vmem:[%s4349_s25 + $0x2a0] ss:$16 sps:$4 sm:$0xff]  }
 0x12b   : > { %2119 = vmatmul.mubr.bf16.gmra.mxu1 %v3709_v57  ;;  %1837 = vmatprep.mubr.bf16.mxu0 %v3710_v58  ;;  %v3805_v57 = vld [vmem:[%s4349_s25 + $0x2a8] ss:$16 sps:$4 sm:$0xff]   ;;  %v3806_v58 = vld [vmem:[%s4349_s25 + $0x2c4] ss:$16 sps:$4 sm:$0xff]  }
 0x12c   : > { %2126 = vmatprep.mubr.bf16.mxu1 %v3712_v59  ;;  %v3808_v59 = vld [vmem:[%s4349_s25 + $0x2cc] ss:$16 sps:$4 sm:$0xff]  }
 0x132   : > { %1838 = vmatmul.mubr.bf16.gmra.mxu0 %v3714_v60  ;;  %v3810_v60 = vld [vmem:[%s4349_s25 + $0x2c0] ss:$16 sps:$4 sm:$0xff]  }
 0x133   : > { %2127 = vmatmul.mubr.bf16.gmra.mxu1 %v3715_v61  ;;  %1845 = vmatprep.mubr.bf16.mxu0 %v3716_v62  ;;  %v3811_v61 = vld [vmem:[%s4349_s25 + $0x2c8] ss:$16 sps:$4 sm:$0xff]   ;;  %v3812_v62 = vld [vmem:[%s4349_s25 + $0x2e4] ss:$16 sps:$4 sm:$0xff]  }
 0x134   : > { %2134 = vmatprep.mubr.bf16.mxu1 %v3718_v63  ;;  %v3814_v63 = vld [vmem:[%s4349_s25 + $0x2ec] ss:$16 sps:$4 sm:$0xff]  }
 0x13a   : > { %1846 = vmatmul.mubr.bf16.gmra.mxu0 %v3720_v0  ;;  %v3816_v0 = vld [vmem:[%s4349_s25 + $0x2e0] ss:$16 sps:$4 sm:$0xff]  }
 0x13b   : > { %2135 = vmatmul.mubr.bf16.gmra.mxu1 %v3721_v1  ;;  %1853 = vmatprep.mubr.bf16.mxu0 %v3722_v2  ;;  %v3817_v1 = vld [vmem:[%s4349_s25 + $0x2e8] ss:$16 sps:$4 sm:$0xff]   ;;  %v3818_v2 = vld [vmem:[%s4349_s25 + $0x304] ss:$16 sps:$4 sm:$0xff]  }
 0x13c   : > { %2142 = vmatprep.mubr.bf16.mxu1 %v3724_v3  ;;  %v3820_v3 = vld [vmem:[%s4349_s25 + $0x30c] ss:$16 sps:$4 sm:$0xff]  }
 0x142   : > { %1854 = vmatmul.mubr.bf16.gmra.mxu0 %v3726_v4  ;;  %v3822_v4 = vld [vmem:[%s4349_s25 + $0x300] ss:$16 sps:$4 sm:$0xff]  }
 0x143   : > { %2143 = vmatmul.mubr.bf16.gmra.mxu1 %v3727_v5  ;;  %1861 = vmatprep.mubr.bf16.mxu0 %v3728_v6  ;;  %v3823_v5 = vld [vmem:[%s4349_s25 + $0x308] ss:$16 sps:$4 sm:$0xff]   ;;  %v3824_v6 = vld [vmem:[%s4349_s25 + $0x324] ss:$16 sps:$4 sm:$0xff]  }
 0x144   : > { %2150 = vmatprep.mubr.bf16.mxu1 %v3730_v7  ;;  %v3826_v7 = vld [vmem:[%s4349_s25 + $0x32c] ss:$16 sps:$4 sm:$0xff]  }
 0x14a   : > { %1862 = vmatmul.mubr.bf16.gmra.mxu0 %v3732_v8 }
 0x14b   : > { %2151 = vmatmul.mubr.bf16.gmra.mxu1 %v3733_v9  ;;  %1869 = vmatprep.mubr.bf16.mxu0 %v3734_v10  ;;  %v733_v9 = vld [vmem:[#allocation2 + $0xb0] sm:$0xff] }
 0x14c   : > { %2158 = vmatprep.mubr.bf16.mxu1 %v3736_v11 }
 0x152   : > { %1870 = vmatmul.mubr.bf16.gmra.mxu0 %v3738_v12 }
 0x153   : > { %2159 = vmatmul.mubr.bf16.gmra.mxu1 %v3739_v13  ;;  %1877 = vmatprep.mubr.bf16.mxu0 %v3740_v14 }
 0x154   : > { %2166 = vmatprep.mubr.bf16.mxu1 %v3742_v15 }
 0x15a   : > { %1878 = vmatmul.mubr.bf16.gmra.mxu0 %v3744_v16  ;;  %v3828_v16 = vld [vmem:[%s4349_s25 + $0x320] ss:$16 sps:$4 sm:$0xff]  }
 0x15b   : > { %2167 = vmatmul.mubr.bf16.gmra.mxu1 %v3745_v17  ;;  %1885 = vmatprep.mubr.bf16.mxu0 %v3746_v18  ;;  %v734_v17 = vld [vmem:[#allocation2 + $0x1b0] sm:$0xff] }
 0x15c   : > { %2174 = vmatprep.mubr.bf16.mxu1 %v3748_v19  ;;  %v3829_v19 = vld [vmem:[%s4349_s25 + $0x328] ss:$16 sps:$4 sm:$0xff]  }
 0x162   : > { %1886 = vmatmul.mubr.bf16.gmra.mxu0 %v3750_v20  ;;  %v3830_v20 = vld [vmem:[%s4349_s25 + $0x344] ss:$16 sps:$4 sm:$0xff]  }
 0x163   : > { %2175 = vmatmul.mubr.bf16.gmra.mxu1 %v3751_v21  ;;  %1893 = vmatprep.mubr.bf16.mxu0 %v3752_v22 }
 0x164   : > { %2182 = vmatprep.mubr.bf16.mxu1 %v3754_v23  ;;  %v3832_v23 = vld [vmem:[%s4349_s25 + $0x34c] ss:$16 sps:$4 sm:$0xff]  }
 0x16a   : > { %1894 = vmatmul.mubr.bf16.gmra.mxu0 %v3756_v24 }
 0x16b   : > { %2183 = vmatmul.mubr.bf16.gmra.mxu1 %v3757_v25  ;;  %1901 = vmatprep.mubr.bf16.mxu0 %v3758_v26 }
 0x16c   : > { %2190 = vmatprep.mubr.bf16.mxu1 %v3760_v27  ;;  %v735_v27 = vld [vmem:[#allocation2 + $0xd8] sm:$0xff] }
 0x172   : > { %1902 = vmatmul.mubr.bf16.gmra.mxu0 %v3762_v28 }
 0x173   : > { %2191 = vmatmul.mubr.bf16.gmra.mxu1 %v3763_v29  ;;  %1909 = vmatprep.mubr.bf16.mxu0 %v3764_v30 }
 0x174   : > { %2198 = vmatprep.mubr.bf16.mxu1 %v3766_v31 }
 0x17a   : > { %1910 = vmatmul.mubr.bf16.gmra.mxu0 %v3768_v32 }
 0x17b   : > { %2199 = vmatmul.mubr.bf16.gmra.mxu1 %v3769_v33  ;;  %1917 = vmatprep.mubr.bf16.mxu0 %v3770_v34  ;;  %v3834_v34 = vld [vmem:[%s4349_s25 + $0x340] ss:$16 sps:$4 sm:$0xff]  }
 0x17c   : > { %2206 = vmatprep.mubr.bf16.mxu1 %v3772_v35  ;;  %v736_v35 = vld [vmem:[#allocation2 + $0x18] sm:$0xff] }
 0x182   : > { %1918 = vmatmul.mubr.bf16.gmra.mxu0 %v3774_v36 }
 0x183   : > { %2207 = vmatmul.mubr.bf16.gmra.mxu1 %v3775_v37  ;;  %1925 = vmatprep.mubr.bf16.mxu0 %v3776_v38  ;;  %v3835_v37 = vld [vmem:[%s4349_s25 + $0x348] ss:$16 sps:$4 sm:$0xff]   ;;  %v3836_v38 = vld [vmem:[%s4349_s25 + $0x364] ss:$16 sps:$4 sm:$0xff]  }
 0x184   : > { %2214 = vmatprep.mubr.bf16.mxu1 %v3778_v39 }
 0x18a   : > { %1926 = vmatmul.mubr.bf16.gmra.mxu0 %v3780_v40 }
 0x18b   : > { %2215 = vmatmul.mubr.bf16.gmra.mxu1 %v3781_v41  ;;  %1933 = vmatprep.mubr.bf16.mxu0 %v3782_v42  ;;  %v3838_v41 = vld [vmem:[%s4349_s25 + $0x36c] ss:$16 sps:$4 sm:$0xff]  }
 0x18c   : > { %2222 = vmatprep.mubr.bf16.mxu1 %v3784_v43 }
 0x192   : > { %1934 = vmatmul.mubr.bf16.gmra.mxu0 %v3786_v44 }
 0x193   : > { %2223 = vmatmul.mubr.bf16.gmra.mxu1 %v3787_v45  ;;  %1941 = vmatprep.mubr.bf16.mxu0 %v3788_v46  ;;  %v737_v45 = vld [vmem:[#allocation2 + $0x50] sm:$0xff] }
 0x194   : > { %2230 = vmatprep.mubr.bf16.mxu1 %v3790_v47 }
 0x19a   : > { %1942 = vmatmul.mubr.bf16.gmra.mxu0 %v3792_v48 }
 0x19b   : > { %2231 = vmatmul.mubr.bf16.gmra.mxu1 %v3793_v49  ;;  %1949 = vmatprep.mubr.bf16.mxu0 %v3794_v50 }
 0x19c   : > { %2238 = vmatprep.mubr.bf16.mxu1 %v3796_v51 }
 0x1a2   : > { %1950 = vmatmul.mubr.bf16.gmra.mxu0 %v3798_v52  ;;  %v3840_v52 = vld [vmem:[%s4349_s25 + $0x360] ss:$16 sps:$4 sm:$0xff]  }
 0x1a3   : > { %2239 = vmatmul.mubr.bf16.gmra.mxu1 %v3799_v53  ;;  %1957 = vmatprep.mubr.bf16.mxu0 %v3800_v54  ;;  %v738_v53 = vld [vmem:[#allocation2 + $0x168] sm:$0xff] }
 0x1a4   : > { %2246 = vmatprep.mubr.bf16.mxu1 %v3802_v55  ;;  %v3841_v55 = vld [vmem:[%s4349_s25 + $0x368] ss:$16 sps:$4 sm:$0xff]  }
 0x1aa   : > { %1958 = vmatmul.mubr.bf16.gmra.mxu0 %v3804_v56  ;;  %v3844_v56 = vld [vmem:[%s4349_s25 + $0x384] ss:$16 sps:$4 sm:$0xff]  }
 0x1ab   : > { %2247 = vmatmul.mubr.bf16.gmra.mxu1 %v3805_v57  ;;  %1965 = vmatprep.mubr.bf16.mxu0 %v3806_v58 }
 0x1ac   : > { %2254 = vmatprep.mubr.bf16.mxu1 %v3808_v59  ;;  %v3847_v59 = vld [vmem:[%s4349_s25 + $0x38c] ss:$16 sps:$4 sm:$0xff]  }
 0x1b2   : > { %1966 = vmatmul.mubr.bf16.gmra.mxu0 %v3810_v60 }
 0x1b3   : > { %2255 = vmatmul.mubr.bf16.gmra.mxu1 %v3811_v61  ;;  %1973 = vmatprep.mubr.bf16.mxu0 %v3812_v62 }
 0x1b4   : > { %2262 = vmatprep.mubr.bf16.mxu1 %v3814_v63  ;;  %v739_v63 = vld [vmem:[#allocation2 + $0x130] sm:$0xff] }
 0x1ba   : > { %1974 = vmatmul.mubr.bf16.gmra.mxu0 %v3816_v0 }
 0x1bb   : > { %2263 = vmatmul.mubr.bf16.gmra.mxu1 %v3817_v1  ;;  %1981 = vmatprep.mubr.bf16.mxu0 %v3818_v2 }
 0x1bc   : > { %2270 = vmatprep.mubr.bf16.mxu1 %v3820_v3 }
 0x1c2   : > { %v1791_v8 = vpop.f32.mrf.mxu0  ;;  %1982 = vmatmul.mubr.bf16.gmra.mxu0 %v3822_v4 }
 0x1c3   : > { %v2080_v10 = vpop.f32.mrf.mxu1  ;;  %2271 = vmatmul.mubr.bf16.gmra.mxu1 %v3823_v5  ;;  %1989 = vmatprep.mubr.bf16.mxu0 %v3824_v6  ;;  %v3842_v6 = vld [vmem:[%s4349_s25 + $0x380] ss:$16 sps:$4 sm:$0xff]  }
 0x1c4   : > { %v2081_v11 = vadd.f32 %v2080_v10, %v1791_v8  ;;  %v1793_v12 = vpop.f32.mrf.mxu0  ;;  %2278 = vmatprep.mubr.bf16.mxu1 %v3826_v7  ;;  %v740_v7 = vld [vmem:[#allocation2 + $0x48] sm:$0xff]  ;;  %v3850_v10 = vld [vmem:[%s4349_s25 + $0x3a4] ss:$16 sps:$4 sm:$0xff]  }
 0x1c5   : > { %v2082_v13 = vpop.f32.mrf.mxu1 }
 0x1c6   : > { %v2335_v14 = vadd.f32 %v2081_v11, %v733_v9  ;;  %v1794_v15 = vpop.f32.mrf.mxu0  ;;  %v3845_v9 = vld [vmem:[%s4349_s25 + $0x388] ss:$16 sps:$4 sm:$0xff]   ;;  %v3853_v13 = vld [vmem:[%s4349_s25 + $0x3ac] ss:$16 sps:$4 sm:$0xff]  }
 0x1c7   : > { %v2083_v18 = vpop.f32.mrf.mxu1 }
 0x1c8   : > { %2399 = vst [vmem:[#allocation2 + $0xb0] sm:$0xff] %v2335_v14  ;;  %v2084_v21 = vadd.f32 %v2083_v18, %v1794_v15  ;;  %v1796_v22 = vpop.f32.mrf.mxu0 }
 0x1c9   : > { %v2085_v24 = vpop.f32.mrf.mxu1 }
 0x1ca   : > { %v2336_v25 = vadd.f32 %v2084_v21, %v734_v17  ;;  %v1799_v26 = vpop.f32.mrf.mxu0  ;;  %1990 = vmatmul.mubr.bf16.gmra.mxu0 %v3828_v16  ;;  %v741_v17 = vld [vmem:[#allocation2 + $0x180] sm:$0xff] }
 0x1cb   : > { %v2088_v28 = vpop.f32.mrf.mxu1  ;;  %2279 = vmatmul.mubr.bf16.gmra.mxu1 %v3829_v19  ;;  %1997 = vmatprep.mubr.bf16.mxu0 %v3830_v20  ;;  %v3848_v24 = vld [vmem:[%s4349_s25 + $0x3a0] ss:$16 sps:$4 sm:$0xff]  }
 0x1cc   : > { %2400 = vst [vmem:[#allocation2 + $0x1b0] sm:$0xff] %v2336_v25  ;;  %v2089_v29 = vadd.f32 %v2088_v28, %v1799_v26  ;;  %v1801_v30 = vpop.f32.mrf.mxu0  ;;  %2286 = vmatprep.mubr.bf16.mxu1 %v3832_v23  ;;  %v742_v25 = vld [vmem:[#allocation2 + $0x110] sm:$0xff] }
 0x1cd   : > { %v2090_v31 = vpop.f32.mrf.mxu1  ;;  %v3856_v28 = vld [vmem:[%s4349_s25 + $0x3c4] ss:$16 sps:$4 sm:$0xff]  }
 0x1ce   : > { %v2337_v32 = vadd.f32 %v2089_v29, %v735_v27  ;;  %v1802_v33 = vpop.f32.mrf.mxu0  ;;  %v3851_v27 = vld [vmem:[%s4349_s25 + $0x3a8] ss:$16 sps:$4 sm:$0xff]   ;;  %v3859_v31 = vld [vmem:[%s4349_s25 + $0x3cc] ss:$16 sps:$4 sm:$0xff]  }
 0x1cf   : > { %v2091_v36 = vpop.f32.mrf.mxu1 }
 0x1d0   : > { %2401 = vst [vmem:[#allocation2 + $0xd8] sm:$0xff] %v2337_v32  ;;  %v2092_v39 = vadd.f32 %v2091_v36, %v1802_v33  ;;  %v1804_v40 = vpop.f32.mrf.mxu0 }
 0x1d1   : > { %v2093_v42 = vpop.f32.mrf.mxu1 }
 0x1d2   : > { %v2338_v43 = vadd.f32 %v2092_v39, %v736_v35  ;;  %v1807_v44 = vpop.f32.mrf.mxu0  ;;  %1998 = vmatmul.mubr.bf16.gmra.mxu0 %v3834_v34  ;;  %v743_v35 = vld [vmem:[#allocation2 + $0x118] sm:$0xff]  ;;  %v3854_v42 = vld [vmem:[%s4349_s25 + $0x3c0] ss:$16 sps:$4 sm:$0xff]  }
 0x1d3   : > { %v2096_v46 = vpop.f32.mrf.mxu1  ;;  %2287 = vmatmul.mubr.bf16.gmra.mxu1 %v3835_v37  ;;  %2005 = vmatprep.mubr.bf16.mxu0 %v3836_v38 }
 0x1d4   : > { %2402 = vst [vmem:[#allocation2 + $0x18] sm:$0xff] %v2338_v43  ;;  %v2097_v47 = vadd.f32 %v2096_v46, %v1807_v44  ;;  %v1809_v48 = vpop.f32.mrf.mxu0  ;;  %2294 = vmatprep.mubr.bf16.mxu1 %v3838_v41  ;;  %v744_v43 = vld [vmem:[#allocation2 + $0x98] sm:$0xff]  ;;  %v3862_v46 = vld [vmem:[%s4349_s25 + $0x3e4] ss:$16 sps:$4 sm:$0xff]  }
 0x1d5   : > { %v2098_v49 = vpop.f32.mrf.mxu1 }
 0x1d6   : > { %v2339_v50 = vadd.f32 %v2097_v47, %v737_v45  ;;  %v1810_v51 = vpop.f32.mrf.mxu0  ;;  %v3857_v45 = vld [vmem:[%s4349_s25 + $0x3c8] ss:$16 sps:$4 sm:$0xff]   ;;  %v3865_v49 = vld [vmem:[%s4349_s25 + $0x3ec] ss:$16 sps:$4 sm:$0xff]  }
 0x1d7   : > { %v2099_v54 = vpop.f32.mrf.mxu1 }
 0x1d8   : > { %2403 = vst [vmem:[#allocation2 + $0x50] sm:$0xff] %v2339_v50  ;;  %v2100_v57 = vadd.f32 %v2099_v54, %v1810_v51  ;;  %v1812_v58 = vpop.f32.mrf.mxu0 }
 0x1d9   : > { %v2101_v60 = vpop.f32.mrf.mxu1 }
 0x1da   : > { %v2340_v61 = vadd.f32 %v2100_v57, %v738_v53  ;;  %v1815_v62 = vpop.f32.mrf.mxu0  ;;  %2006 = vmatmul.mubr.bf16.gmra.mxu0 %v3840_v52  ;;  %v745_v53 = vld [vmem:[#allocation2 + $0x120] sm:$0xff] }
 0x1db   : > { %v2104_v0 = vpop.f32.mrf.mxu1  ;;  %2295 = vmatmul.mubr.bf16.gmra.mxu1 %v3841_v55  ;;  %2013 = vmatprep.mubr.bf16.mxu0 %v3844_v56  ;;  %v3860_v60 = vld [vmem:[%s4349_s25 + $0x3e0] ss:$16 sps:$4 sm:$0xff]  }
 0x1dc   : > { %2404 = vst [vmem:[#allocation2 + $0x168] sm:$0xff] %v2340_v61  ;;  %v2105_v1 = vadd.f32 %v2104_v0, %v1815_v62  ;;  %v1817_v2 = vpop.f32.mrf.mxu0  ;;  %2302 = vmatprep.mubr.bf16.mxu1 %v3847_v59  ;;  %v746_v61 = vld [vmem:[#allocation2 + $0x150] sm:$0xff] }
 0x1dd   : > { %v2106_v3 = vpop.f32.mrf.mxu1 }
 0x1de   : > { %v2341_v4 = vadd.f32 %v2105_v1, %v739_v63  ;;  %v1818_v5 = vpop.f32.mrf.mxu0  ;;  %v3863_v63 = vld [vmem:[%s4349_s25 + $0x3e8] ss:$16 sps:$4 sm:$0xff]  }
 0x1df   : > { %v2107_v8 = vpop.f32.mrf.mxu1 }
 0x1e0   : > { %2405 = vst [vmem:[#allocation2 + $0x130] sm:$0xff] %v2341_v4  ;;  %v2108_v11 = vadd.f32 %v2107_v8, %v1818_v5  ;;  %v1820_v12 = vpop.f32.mrf.mxu0  ;;  %v747_v5 = vld [vmem:[#allocation2 + $0x108] sm:$0xff] }
 0x1e1   : > { %v2109_v14 = vpop.f32.mrf.mxu1  ;;  %v748_v12 = vld [vmem:[#allocation2 + $0x60] sm:$0xff] }
 0x1e2   : > { %v2342_v15 = vadd.f32 %v2108_v11, %v740_v7  ;;  %v1823_v16 = vpop.f32.mrf.mxu0  ;;  %2014 = vmatmul.mubr.bf16.gmra.mxu0 %v3842_v6 }
 0x1e3   : > { %v2112_v18 = vpop.f32.mrf.mxu1  ;;  %2303 = vmatmul.mubr.bf16.gmra.mxu1 %v3845_v9  ;;  %2021 = vmatprep.mubr.bf16.mxu0 %v3850_v10 }
 0x1e4   : > { %2406 = vst [vmem:[#allocation2 + $0x48] sm:$0xff] %v2342_v15  ;;  %v2113_v19 = vadd.f32 %v2112_v18, %v1823_v16  ;;  %v1825_v20 = vpop.f32.mrf.mxu0  ;;  %2310 = vmatprep.mubr.bf16.mxu1 %v3853_v13 }
 0x1e5   : > { %v2114_v21 = vpop.f32.mrf.mxu1 }
 0x1e6   : > { %v2343_v22 = vadd.f32 %v2113_v19, %v741_v17  ;;  %v1826_v23 = vpop.f32.mrf.mxu0  ;;  %v749_v19 = vld [vmem:[#allocation2 + $0xe0] sm:$0xff] }
 0x1e7   : > { %v2115_v26 = vpop.f32.mrf.mxu1 }
 0x1e8   : > { %2407 = vst [vmem:[#allocation2 + $0x180] sm:$0xff] %v2343_v22  ;;  %v2116_v29 = vadd.f32 %v2115_v26, %v1826_v23  ;;  %v1828_v30 = vpop.f32.mrf.mxu0  ;;  %v750_v26 = vld [vmem:[#allocation2 + $0x188] sm:$0xff] }
 0x1e9   : > { %v2117_v32 = vpop.f32.mrf.mxu1 }
 0x1ea   : > { %v2344_v33 = vadd.f32 %v2116_v29, %v742_v25  ;;  %v1831_v34 = vpop.f32.mrf.mxu0  ;;  %2022 = vmatmul.mubr.bf16.gmra.mxu0 %v3848_v24 }
 0x1eb   : > { %v2120_v36 = vpop.f32.mrf.mxu1  ;;  %2311 = vmatmul.mubr.bf16.gmra.mxu1 %v3851_v27  ;;  %2029 = vmatprep.mubr.bf16.mxu0 %v3856_v28 }
 0x1ec   : > { %2408 = vst [vmem:[#allocation2 + $0x110] sm:$0xff] %v2344_v33  ;;  %v2121_v37 = vadd.f32 %v2120_v36, %v1831_v34  ;;  %v1833_v38 = vpop.f32.mrf.mxu0  ;;  %2318 = vmatprep.mubr.bf16.mxu1 %v3859_v31  ;;  %v751_v33 = vld [vmem:[#allocation2 + $0x138] sm:$0xff] }
 0x1ed   : > { %v2122_v39 = vpop.f32.mrf.mxu1 }
 0x1ee   : > { %v2345_v40 = vadd.f32 %v2121_v37, %v743_v35  ;;  %v1834_v41 = vpop.f32.mrf.mxu0 }
 0x1ef   : > { %v2123_v44 = vpop.f32.mrf.mxu1 }
 0x1f0   : > { %2409 = vst [vmem:[#allocation2 + $0x118] sm:$0xff] %v2345_v40  ;;  %v2124_v47 = vadd.f32 %v2123_v44, %v1834_v41  ;;  %v1836_v48 = vpop.f32.mrf.mxu0  ;;  %v752_v40 = vld [vmem:[#allocation2 + $0x140] sm:$0xff] }
 0x1f1   : > { %v2125_v50 = vpop.f32.mrf.mxu1 }
 0x1f2   : > { %v2346_v51 = vadd.f32 %v2124_v47, %v744_v43  ;;  %v1839_v52 = vpop.f32.mrf.mxu0  ;;  %2030 = vmatmul.mubr.bf16.gmra.mxu0 %v3854_v42  ;;  %v753_v47 = vld [vmem:[#allocation2 + $0x80] sm:$0xff] }
 0x1f3   : > { %v2128_v54 = vpop.f32.mrf.mxu1  ;;  %2319 = vmatmul.mubr.bf16.gmra.mxu1 %v3857_v45  ;;  %2037 = vmatprep.mubr.bf16.mxu0 %v3862_v46 }
 0x1f4   : > { %2410 = vst [vmem:[#allocation2 + $0x98] sm:$0xff] %v2346_v51  ;;  %v2129_v55 = vadd.f32 %v2128_v54, %v1839_v52  ;;  %v1841_v56 = vpop.f32.mrf.mxu0  ;;  %2326 = vmatprep.mubr.bf16.mxu1 %v3865_v49  ;;  %v754_v54 = vld [vmem:[#allocation2 + $0x1a8] sm:$0xff] }
 0x1f5   : > { %v2130_v57 = vpop.f32.mrf.mxu1 }
 0x1f6   : > { %v2347_v58 = vadd.f32 %v2129_v55, %v745_v53  ;;  %v1842_v59 = vpop.f32.mrf.mxu0 }
 0x1f7   : > { %v2131_v62 = vpop.f32.mrf.mxu1 }
 0x1f8   : > { %2411 = vst [vmem:[#allocation2 + $0x120] sm:$0xff] %v2347_v58  ;;  %v2132_v0 = vadd.f32 %v2131_v62, %v1842_v59  ;;  %v1844_v1 = vpop.f32.mrf.mxu0 }
 0x1f9   : > { %v2133_v2 = vpop.f32.mrf.mxu1 }
 0x1fa   : > { %v2348_v3 = vadd.f32 %v2132_v0, %v746_v61  ;;  %v1847_v4 = vpop.f32.mrf.mxu0  ;;  %2038 = vmatmul.mubr.bf16.gmra.mxu0 %v3860_v60  ;;  %v755_v61 = vld [vmem:[#allocation2 + $0x1b8] sm:$0xff] }
 0x1fb   : > { %v2136_v6 = vpop.f32.mrf.mxu1  ;;  %2327 = vmatmul.mubr.bf16.gmra.mxu1 %v3863_v63 }
 0x1fc   : > { %2412 = vst [vmem:[#allocation2 + $0x150] sm:$0xff] %v2348_v3  ;;  %v2137_v7 = vadd.f32 %v2136_v6, %v1847_v4  ;;  %v1849_v8 = vpop.f32.mrf.mxu0  ;;  %v756_v4 = vld [vmem:[#allocation2 + $0x28] sm:$0xff] }
 0x1fd   : > { %v2138_v9 = vpop.f32.mrf.mxu1 }
 0x1fe   : > { %v2349_v10 = vadd.f32 %v2137_v7, %v747_v5  ;;  %v1850_v11 = vpop.f32.mrf.mxu0 }
 0x1ff   : > { %v2139_v13 = vpop.f32.mrf.mxu1 }
 0x200   : > { %2413 = vst [vmem:[#allocation2 + $0x108] sm:$0xff] %v2349_v10  ;;  %v2140_v14 = vadd.f32 %v2139_v13, %v1850_v11  ;;  %v1852_v15 = vpop.f32.mrf.mxu0  ;;  %v757_v11 = vld [vmem:[#allocation2 + $0x1e8] sm:$0xff] }
 0x201   : > { %v2141_v16 = vpop.f32.mrf.mxu1 }
 0x202   : > { %v2350_v17 = vadd.f32 %v2140_v14, %v748_v12  ;;  %v1855_v18 = vpop.f32.mrf.mxu0 }
 0x203   : > { %v2144_v20 = vpop.f32.mrf.mxu1 }
 0x204   : > { %2414 = vst [vmem:[#allocation2 + $0x60] sm:$0xff] %v2350_v17  ;;  %v2145_v21 = vadd.f32 %v2144_v20, %v1855_v18  ;;  %v1857_v22 = vpop.f32.mrf.mxu0  ;;  %v758_v18 = vld [vmem:[#allocation2 + $0xf8] sm:$0xff] }
 0x205   : > { %v2146_v23 = vpop.f32.mrf.mxu1 }
 0x206   : > { %v2351_v24 = vadd.f32 %v2145_v21, %v749_v19  ;;  %v1858_v25 = vpop.f32.mrf.mxu0 }
 0x207   : > { %v2147_v27 = vpop.f32.mrf.mxu1 }
 0x208   : > { %2415 = vst [vmem:[#allocation2 + $0xe0] sm:$0xff] %v2351_v24  ;;  %v2148_v28 = vadd.f32 %v2147_v27, %v1858_v25  ;;  %v1860_v29 = vpop.f32.mrf.mxu0  ;;  %v759_v25 = vld [vmem:[#allocation2 + $0x160] sm:$0xff] }
 0x209   : > { %v2149_v30 = vpop.f32.mrf.mxu1 }
 0x20a   : > { %v2352_v31 = vadd.f32 %v2148_v28, %v750_v26  ;;  %v1863_v32 = vpop.f32.mrf.mxu0 }
 0x20b   : > { %v2152_v34 = vpop.f32.mrf.mxu1 }
 0x20c   : > { %2416 = vst [vmem:[#allocation2 + $0x188] sm:$0xff] %v2352_v31  ;;  %v2153_v35 = vadd.f32 %v2152_v34, %v1863_v32  ;;  %v1865_v36 = vpop.f32.mrf.mxu0  ;;  %v760_v32 = vld [vmem:[#allocation2 + $0x30] sm:$0xff] }
 0x20d   : > { %v2154_v37 = vpop.f32.mrf.mxu1 }
 0x20e   : > { %v2353_v38 = vadd.f32 %v2153_v35, %v751_v33  ;;  %v1866_v39 = vpop.f32.mrf.mxu0 }
 0x20f   : > { %v2155_v41 = vpop.f32.mrf.mxu1 }
 0x210   : > { %2417 = vst [vmem:[#allocation2 + $0x138] sm:$0xff] %v2353_v38  ;;  %v2156_v42 = vadd.f32 %v2155_v41, %v1866_v39  ;;  %v1868_v43 = vpop.f32.mrf.mxu0  ;;  %v761_v39 = vld [vmem:[#allocation2 + $0x1e0] sm:$0xff] }
 0x211   : > { %v2157_v44 = vpop.f32.mrf.mxu1 }
 0x212   : > { %v2354_v45 = vadd.f32 %v2156_v42, %v752_v40  ;;  %v1871_v46 = vpop.f32.mrf.mxu0 }
 0x213   : > { %v2160_v48 = vpop.f32.mrf.mxu1 }
 0x214   : > { %2418 = vst [vmem:[#allocation2 + $0x140] sm:$0xff] %v2354_v45  ;;  %v2161_v49 = vadd.f32 %v2160_v48, %v1871_v46  ;;  %v1873_v50 = vpop.f32.mrf.mxu0  ;;  %v762_v46 = vld [vmem:[#allocation2] sm:$0xff] }
 0x215   : > { %v2162_v51 = vpop.f32.mrf.mxu1 }
 0x216   : > { %v2355_v52 = vadd.f32 %v2161_v49, %v753_v47  ;;  %v1874_v53 = vpop.f32.mrf.mxu0 }
 0x217   : > { %v2163_v55 = vpop.f32.mrf.mxu1 }
 0x218   : > { %2419 = vst [vmem:[#allocation2 + $0x80] sm:$0xff] %v2355_v52  ;;  %v2164_v56 = vadd.f32 %v2163_v55, %v1874_v53  ;;  %v1876_v57 = vpop.f32.mrf.mxu0  ;;  %v763_v53 = vld [vmem:[#allocation2 + $0xf0] sm:$0xff] }
 0x219   : > { %v2165_v58 = vpop.f32.mrf.mxu1 }
 0x21a   : > { %v2356_v59 = vadd.f32 %v2164_v56, %v754_v54  ;;  %v1879_v60 = vpop.f32.mrf.mxu0 }
 0x21b   : > { %v2168_v62 = vpop.f32.mrf.mxu1 }
 0x21c   : > { %2420 = vst [vmem:[#allocation2 + $0x1a8] sm:$0xff] %v2356_v59  ;;  %v2169_v63 = vadd.f32 %v2168_v62, %v1879_v60  ;;  %v1881_v0 = vpop.f32.mrf.mxu0  ;;  %v764_v60 = vld [vmem:[#allocation2 + $0x8] sm:$0xff] }
 0x21d   : > { %v2170_v1 = vpop.f32.mrf.mxu1 }
 0x21e   : > { %v2357_v2 = vadd.f32 %v2169_v63, %v755_v61  ;;  %v1882_v3 = vpop.f32.mrf.mxu0 }
 0x21f   : > { %v2171_v5 = vpop.f32.mrf.mxu1 }
 0x220   : > { %2421 = vst [vmem:[#allocation2 + $0x1b8] sm:$0xff] %v2357_v2  ;;  %v2172_v6 = vadd.f32 %v2171_v5, %v1882_v3  ;;  %v1884_v7 = vpop.f32.mrf.mxu0  ;;  %v765_v3 = vld [vmem:[#allocation2 + $0x148] sm:$0xff] }
 0x221   : > { %v2173_v8 = vpop.f32.mrf.mxu1 }
 0x222   : > { %v2358_v9 = vadd.f32 %v2172_v6, %v756_v4  ;;  %v1887_v10 = vpop.f32.mrf.mxu0 }
 0x223   : > { %v2176_v12 = vpop.f32.mrf.mxu1 }
 0x224   : > { %2422 = vst [vmem:[#allocation2 + $0x28] sm:$0xff] %v2358_v9  ;;  %v2177_v13 = vadd.f32 %v2176_v12, %v1887_v10  ;;  %v1889_v14 = vpop.f32.mrf.mxu0  ;;  %v766_v10 = vld [vmem:[#allocation2 + $0x1d0] sm:$0xff] }
 0x225   : > { %v2178_v15 = vpop.f32.mrf.mxu1 }
 0x226   : > { %v2359_v16 = vadd.f32 %v2177_v13, %v757_v11  ;;  %v1890_v17 = vpop.f32.mrf.mxu0 }
 0x227   : > { %v2179_v19 = vpop.f32.mrf.mxu1 }
 0x228   : > { %2423 = vst [vmem:[#allocation2 + $0x1e8] sm:$0xff] %v2359_v16  ;;  %v2180_v20 = vadd.f32 %v2179_v19, %v1890_v17  ;;  %v1892_v21 = vpop.f32.mrf.mxu0  ;;  %v767_v17 = vld [vmem:[#allocation2 + $0x100] sm:$0xff] }
 0x229   : > { %v2181_v22 = vpop.f32.mrf.mxu1 }
 0x22a   : > { %v2360_v23 = vadd.f32 %v2180_v20, %v758_v18  ;;  %v1895_v24 = vpop.f32.mrf.mxu0 }
 0x22b   : > { %v2184_v26 = vpop.f32.mrf.mxu1 }
 0x22c   : > { %2424 = vst [vmem:[#allocation2 + $0xf8] sm:$0xff] %v2360_v23  ;;  %v2185_v27 = vadd.f32 %v2184_v26, %v1895_v24  ;;  %v1897_v28 = vpop.f32.mrf.mxu0  ;;  %v768_v24 = vld [vmem:[#allocation2 + $0xc8] sm:$0xff] }
 0x22d   : > { %v2186_v29 = vpop.f32.mrf.mxu1 }
 0x22e   : > { %v2361_v30 = vadd.f32 %v2185_v27, %v759_v25  ;;  %v1898_v31 = vpop.f32.mrf.mxu0 }
 0x22f   : > { %v2187_v33 = vpop.f32.mrf.mxu1 }
 0x230   : > { %2425 = vst [vmem:[#allocation2 + $0x160] sm:$0xff] %v2361_v30  ;;  %v2188_v34 = vadd.f32 %v2187_v33, %v1898_v31  ;;  %v1900_v35 = vpop.f32.mrf.mxu0  ;;  %v769_v31 = vld [vmem:[#allocation2 + $0x40] sm:$0xff] }
 0x231   : > { %v2189_v36 = vpop.f32.mrf.mxu1 }
 0x232   : > { %v2362_v37 = vadd.f32 %v2188_v34, %v760_v32  ;;  %v1903_v38 = vpop.f32.mrf.mxu0 }
 0x233   : > { %v2192_v40 = vpop.f32.mrf.mxu1 }
 0x234   : > { %2426 = vst [vmem:[#allocation2 + $0x30] sm:$0xff] %v2362_v37  ;;  %v2193_v41 = vadd.f32 %v2192_v40, %v1903_v38  ;;  %v1905_v42 = vpop.f32.mrf.mxu0  ;;  %v770_v38 = vld [vmem:[#allocation2 + $0x1f8] sm:$0xff] }
 0x235   : > { %v2194_v43 = vpop.f32.mrf.mxu1 }
 0x236   : > { %v2363_v44 = vadd.f32 %v2193_v41, %v761_v39  ;;  %v1906_v45 = vpop.f32.mrf.mxu0 }
 0x237   : > { %v2195_v47 = vpop.f32.mrf.mxu1 }
 0x238   : > { %2427 = vst [vmem:[#allocation2 + $0x1e0] sm:$0xff] %v2363_v44  ;;  %v2196_v48 = vadd.f32 %v2195_v47, %v1906_v45  ;;  %v1908_v49 = vpop.f32.mrf.mxu0  ;;  %v771_v45 = vld [vmem:[#allocation2 + $0x20] sm:$0xff] }
 0x239   : > { %v2197_v50 = vpop.f32.mrf.mxu1 }
 0x23a   : > { %v2364_v51 = vadd.f32 %v2196_v48, %v762_v46  ;;  %v1911_v52 = vpop.f32.mrf.mxu0 }
 0x23b   : > { %v2200_v54 = vpop.f32.mrf.mxu1 }
 0x23c   : > { %2428 = vst [vmem:[#allocation2] sm:$0xff] %v2364_v51  ;;  %v2201_v55 = vadd.f32 %v2200_v54, %v1911_v52  ;;  %v1913_v56 = vpop.f32.mrf.mxu0  ;;  %v772_v52 = vld [vmem:[#allocation2 + $0x128] sm:$0xff] }
 0x23d   : > { %v2202_v57 = vpop.f32.mrf.mxu1 }
 0x23e   : > { %v2365_v58 = vadd.f32 %v2201_v55, %v763_v53  ;;  %v1914_v59 = vpop.f32.mrf.mxu0 }
 0x23f   : > { %v2203_v61 = vpop.f32.mrf.mxu1 }
 0x240   : > { %2429 = vst [vmem:[#allocation2 + $0xf0] sm:$0xff] %v2365_v58  ;;  %v2204_v62 = vadd.f32 %v2203_v61, %v1914_v59  ;;  %v1916_v63 = vpop.f32.mrf.mxu0  ;;  %v773_v59 = vld [vmem:[#allocation2 + $0x1a0] sm:$0xff] }
 0x241   : > { %v2205_v0 = vpop.f32.mrf.mxu1 }
 0x242   : > { %v2366_v1 = vadd.f32 %v2204_v62, %v764_v60  ;;  %v1919_v2 = vpop.f32.mrf.mxu0 }
 0x243   : > { %v2208_v4 = vpop.f32.mrf.mxu1 }
 0x244   : > { %2430 = vst [vmem:[#allocation2 + $0x8] sm:$0xff] %v2366_v1  ;;  %v2209_v5 = vadd.f32 %v2208_v4, %v1919_v2  ;;  %v1921_v6 = vpop.f32.mrf.mxu0  ;;  %v774_v2 = vld [vmem:[#allocation2 + $0x1f0] sm:$0xff] }
 0x245   : > { %v2210_v7 = vpop.f32.mrf.mxu1 }
 0x246   : > { %v2367_v8 = vadd.f32 %v2209_v5, %v765_v3  ;;  %v1922_v9 = vpop.f32.mrf.mxu0 }
 0x247   : > { %v2211_v11 = vpop.f32.mrf.mxu1 }
 0x248   : > { %2431 = vst [vmem:[#allocation2 + $0x148] sm:$0xff] %v2367_v8  ;;  %v2212_v12 = vadd.f32 %v2211_v11, %v1922_v9  ;;  %v1924_v13 = vpop.f32.mrf.mxu0  ;;  %v775_v9 = vld [vmem:[#allocation2 + $0xe8] sm:$0xff] }
 0x249   : > { %v2213_v14 = vpop.f32.mrf.mxu1 }
 0x24a   : > { %v2368_v15 = vadd.f32 %v2212_v12, %v766_v10  ;;  %v1927_v16 = vpop.f32.mrf.mxu0 }
 0x24b   : > { %v2216_v18 = vpop.f32.mrf.mxu1 }
 0x24c   : > { %2432 = vst [vmem:[#allocation2 + $0x1d0] sm:$0xff] %v2368_v15  ;;  %v2217_v19 = vadd.f32 %v2216_v18, %v1927_v16  ;;  %v1929_v20 = vpop.f32.mrf.mxu0  ;;  %v776_v16 = vld [vmem:[#allocation2 + $0x78] sm:$0xff] }
 0x24d   : > { %v2218_v21 = vpop.f32.mrf.mxu1 }
 0x24e   : > { %v2369_v22 = vadd.f32 %v2217_v19, %v767_v17  ;;  %v1930_v23 = vpop.f32.mrf.mxu0 }
 0x24f   : > { %v2219_v25 = vpop.f32.mrf.mxu1 }
 0x250   : > { %2433 = vst [vmem:[#allocation2 + $0x100] sm:$0xff] %v2369_v22  ;;  %v2220_v26 = vadd.f32 %v2219_v25, %v1930_v23  ;;  %v1932_v27 = vpop.f32.mrf.mxu0  ;;  %v777_v23 = vld [vmem:[#allocation2 + $0x70] sm:$0xff] }
 0x251   : > { %v2221_v28 = vpop.f32.mrf.mxu1 }
 0x252   : > { %v2370_v29 = vadd.f32 %v2220_v26, %v768_v24  ;;  %v1935_v30 = vpop.f32.mrf.mxu0 }
 0x253   : > { %v2224_v32 = vpop.f32.mrf.mxu1 }
 0x254   : > { %2434 = vst [vmem:[#allocation2 + $0xc8] sm:$0xff] %v2370_v29  ;;  %v2225_v33 = vadd.f32 %v2224_v32, %v1935_v30  ;;  %v1937_v34 = vpop.f32.mrf.mxu0  ;;  %v778_v30 = vld [vmem:[#allocation2 + $0x90] sm:$0xff] }
 0x255   : > { %v2226_v35 = vpop.f32.mrf.mxu1 }
 0x256   : > { %v2371_v36 = vadd.f32 %v2225_v33, %v769_v31  ;;  %v1938_v37 = vpop.f32.mrf.mxu0 }
 0x257   : > { %v2227_v39 = vpop.f32.mrf.mxu1 }
 0x258   : > { %2435 = vst [vmem:[#allocation2 + $0x40] sm:$0xff] %v2371_v36  ;;  %v2228_v40 = vadd.f32 %v2227_v39, %v1938_v37  ;;  %v1940_v41 = vpop.f32.mrf.mxu0  ;;  %v779_v37 = vld [vmem:[#allocation2 + $0x1d8] sm:$0xff] }
 0x259   : > { %v2229_v42 = vpop.f32.mrf.mxu1 }
 0x25a   : > { %v2372_v43 = vadd.f32 %v2228_v40, %v770_v38  ;;  %v1943_v44 = vpop.f32.mrf.mxu0 }
 0x25b   : > { %v2232_v46 = vpop.f32.mrf.mxu1 }
 0x25c   : > { %2436 = vst [vmem:[#allocation2 + $0x1f8] sm:$0xff] %v2372_v43  ;;  %v2233_v47 = vadd.f32 %v2232_v46, %v1943_v44  ;;  %v1945_v48 = vpop.f32.mrf.mxu0  ;;  %v780_v44 = vld [vmem:[#allocation2 + $0xd0] sm:$0xff] }
 0x25d   : > { %v2234_v49 = vpop.f32.mrf.mxu1 }
 0x25e   : > { %v2373_v50 = vadd.f32 %v2233_v47, %v771_v45  ;;  %v1946_v51 = vpop.f32.mrf.mxu0 }
 0x25f   : > { %v2235_v53 = vpop.f32.mrf.mxu1 }
 0x260   : > { %2437 = vst [vmem:[#allocation2 + $0x20] sm:$0xff] %v2373_v50  ;;  %v2236_v54 = vadd.f32 %v2235_v53, %v1946_v51  ;;  %v1948_v55 = vpop.f32.mrf.mxu0  ;;  %v781_v51 = vld [vmem:[#allocation2 + $0xb8] sm:$0xff] }
 0x261   : > { %v2237_v56 = vpop.f32.mrf.mxu1 }
 0x262   : > { %v2374_v57 = vadd.f32 %v2236_v54, %v772_v52  ;;  %v1951_v58 = vpop.f32.mrf.mxu0 }
 0x263   : > { %v2240_v60 = vpop.f32.mrf.mxu1 }
 0x264   : > { %2438 = vst [vmem:[#allocation2 + $0x128] sm:$0xff] %v2374_v57  ;;  %v2241_v61 = vadd.f32 %v2240_v60, %v1951_v58  ;;  %v1953_v62 = vpop.f32.mrf.mxu0  ;;  %v782_v58 = vld [vmem:[#allocation2 + $0x88] sm:$0xff] }
 0x265   : > { %v2242_v63 = vpop.f32.mrf.mxu1 }
 0x266   : > { %v2375_v0 = vadd.f32 %v2241_v61, %v773_v59  ;;  %v1954_v1 = vpop.f32.mrf.mxu0 }
 0x267   : > { %v2243_v3 = vpop.f32.mrf.mxu1 }
 0x268   : > { %2439 = vst [vmem:[#allocation2 + $0x1a0] sm:$0xff] %v2375_v0  ;;  %v2244_v4 = vadd.f32 %v2243_v3, %v1954_v1  ;;  %v1956_v5 = vpop.f32.mrf.mxu0  ;;  %v783_v1 = vld [vmem:[#allocation2 + $0xa8] sm:$0xff] }
 0x269   : > { %v2245_v6 = vpop.f32.mrf.mxu1 }
 0x26a   : > { %v2376_v7 = vadd.f32 %v2244_v4, %v774_v2  ;;  %v1959_v8 = vpop.f32.mrf.mxu0 }
 0x26b   : > { %v2248_v10 = vpop.f32.mrf.mxu1 }
 0x26c   : > { %2440 = vst [vmem:[#allocation2 + $0x1f0] sm:$0xff] %v2376_v7  ;;  %v2249_v11 = vadd.f32 %v2248_v10, %v1959_v8  ;;  %v1961_v12 = vpop.f32.mrf.mxu0  ;;  %v784_v8 = vld [vmem:[#allocation2 + $0x1c8] sm:$0xff] }
 0x26d   : > { %v2250_v13 = vpop.f32.mrf.mxu1 }
 0x26e   : > { %v2377_v14 = vadd.f32 %v2249_v11, %v775_v9  ;;  %v1962_v15 = vpop.f32.mrf.mxu0 }
 0x26f   : > { %v2251_v17 = vpop.f32.mrf.mxu1 }
 0x270   : > { %2441 = vst [vmem:[#allocation2 + $0xe8] sm:$0xff] %v2377_v14  ;;  %v2252_v18 = vadd.f32 %v2251_v17, %v1962_v15  ;;  %v1964_v19 = vpop.f32.mrf.mxu0  ;;  %v785_v15 = vld [vmem:[#allocation2 + $0x170] sm:$0xff] }
 0x271   : > { %v2253_v20 = vpop.f32.mrf.mxu1 }
 0x272   : > { %v2378_v21 = vadd.f32 %v2252_v18, %v776_v16  ;;  %v1967_v22 = vpop.f32.mrf.mxu0 }
 0x273   : > { %v2256_v24 = vpop.f32.mrf.mxu1 }
 0x274   : > { %2442 = vst [vmem:[#allocation2 + $0x78] sm:$0xff] %v2378_v21  ;;  %v2257_v25 = vadd.f32 %v2256_v24, %v1967_v22  ;;  %v1969_v26 = vpop.f32.mrf.mxu0  ;;  %v786_v22 = vld [vmem:[#allocation2 + $0x178] sm:$0xff] }
 0x275   : > { %v2258_v27 = vpop.f32.mrf.mxu1 }
 0x276   : > { %v2379_v28 = vadd.f32 %v2257_v25, %v777_v23  ;;  %v1970_v29 = vpop.f32.mrf.mxu0 }
 0x277   : > { %v2259_v31 = vpop.f32.mrf.mxu1 }
 0x278   : > { %2443 = vst [vmem:[#allocation2 + $0x70] sm:$0xff] %v2379_v28  ;;  %v2260_v32 = vadd.f32 %v2259_v31, %v1970_v29  ;;  %v1972_v33 = vpop.f32.mrf.mxu0  ;;  %v787_v29 = vld [vmem:[#allocation2 + $0x68] sm:$0xff] }
 0x279   : > { %v2261_v34 = vpop.f32.mrf.mxu1 }
 0x27a   : > { %v2380_v35 = vadd.f32 %v2260_v32, %v778_v30  ;;  %v1975_v36 = vpop.f32.mrf.mxu0 }
 0x27b   : > { %v2264_v38 = vpop.f32.mrf.mxu1 }
 0x27c   : > { %2444 = vst [vmem:[#allocation2 + $0x90] sm:$0xff] %v2380_v35  ;;  %v2265_v39 = vadd.f32 %v2264_v38, %v1975_v36  ;;  %v1977_v40 = vpop.f32.mrf.mxu0  ;;  %v788_v36 = vld [vmem:[#allocation2 + $0x190] sm:$0xff] }
 0x27d   : > { %v2266_v41 = vpop.f32.mrf.mxu1 }
 0x27e   : > { %v2381_v42 = vadd.f32 %v2265_v39, %v779_v37  ;;  %v1978_v43 = vpop.f32.mrf.mxu0 }
 0x27f   : > { %v2267_v45 = vpop.f32.mrf.mxu1 }
 0x280   : > { %2445 = vst [vmem:[#allocation2 + $0x1d8] sm:$0xff] %v2381_v42  ;;  %v2268_v46 = vadd.f32 %v2267_v45, %v1978_v43  ;;  %v1980_v47 = vpop.f32.mrf.mxu0  ;;  %v789_v43 = vld [vmem:[#allocation2 + $0x198] sm:$0xff] }
 0x281   : > { %v2269_v48 = vpop.f32.mrf.mxu1 }
 0x282   : > { %v2382_v49 = vadd.f32 %v2268_v46, %v780_v44  ;;  %v1983_v50 = vpop.f32.mrf.mxu0 }
 0x283   : > { %v2272_v52 = vpop.f32.mrf.mxu1 }
 0x284   : > { %2446 = vst [vmem:[#allocation2 + $0xd0] sm:$0xff] %v2382_v49  ;;  %v2273_v53 = vadd.f32 %v2272_v52, %v1983_v50  ;;  %v1985_v54 = vpop.f32.mrf.mxu0  ;;  %v790_v50 = vld [vmem:[#allocation2 + $0x38] sm:$0xff] }
 0x285   : > { %v2274_v55 = vpop.f32.mrf.mxu1 }
 0x286   : > { %v2383_v56 = vadd.f32 %v2273_v53, %v781_v51  ;;  %v1986_v57 = vpop.f32.mrf.mxu0 }
 0x287   : > { %v2275_v59 = vpop.f32.mrf.mxu1 }
 0x288   : > { %2447 = vst [vmem:[#allocation2 + $0xb8] sm:$0xff] %v2383_v56  ;;  %v2276_v60 = vadd.f32 %v2275_v59, %v1986_v57  ;;  %v1988_v61 = vpop.f32.mrf.mxu0  ;;  %v791_v57 = vld [vmem:[#allocation2 + $0xc0] sm:$0xff] }
 0x289   : > { %v2277_v62 = vpop.f32.mrf.mxu1 }
 0x28a   : > { %v2384_v63 = vadd.f32 %v2276_v60, %v782_v58  ;;  %v1991_v0 = vpop.f32.mrf.mxu0 }
 0x28b   : > { %v2280_v2 = vpop.f32.mrf.mxu1 }
 0x28c   : > { %2448 = vst [vmem:[#allocation2 + $0x88] sm:$0xff] %v2384_v63  ;;  %v2281_v3 = vadd.f32 %v2280_v2, %v1991_v0  ;;  %v1993_v4 = vpop.f32.mrf.mxu0  ;;  %v792_v0 = vld [vmem:[#allocation2 + $0x1c0] sm:$0xff] }
 0x28d   : > { %v2282_v5 = vpop.f32.mrf.mxu1 }
 0x28e   : > { %v2385_v6 = vadd.f32 %v2281_v3, %v783_v1  ;;  %v1994_v7 = vpop.f32.mrf.mxu0 }
 0x28f   : > { %v2283_v9 = vpop.f32.mrf.mxu1 }
 0x290   : > { %2449 = vst [vmem:[#allocation2 + $0xa8] sm:$0xff] %v2385_v6  ;;  %v2284_v10 = vadd.f32 %v2283_v9, %v1994_v7  ;;  %v1996_v11 = vpop.f32.mrf.mxu0  ;;  %v793_v7 = vld [vmem:[#allocation2 + $0x158] sm:$0xff] }
 0x291   : > { %v2285_v12 = vpop.f32.mrf.mxu1 }
 0x292   : > { %v2386_v13 = vadd.f32 %v2284_v10, %v784_v8  ;;  %v1999_v14 = vpop.f32.mrf.mxu0 }
 0x293   : > { %v2288_v16 = vpop.f32.mrf.mxu1 }
 0x294   : > { %2450 = vst [vmem:[#allocation2 + $0x1c8] sm:$0xff] %v2386_v13  ;;  %v2289_v17 = vadd.f32 %v2288_v16, %v1999_v14  ;;  %v2001_v18 = vpop.f32.mrf.mxu0  ;;  %v794_v14 = vld [vmem:[#allocation2 + $0x10] sm:$0xff] }
 0x295   : > { %v2290_v19 = vpop.f32.mrf.mxu1 }
 0x296   : > { %v2387_v20 = vadd.f32 %v2289_v17, %v785_v15  ;;  %v2002_v21 = vpop.f32.mrf.mxu0 }
 0x297   : > { %v2291_v23 = vpop.f32.mrf.mxu1 }
 0x298   : > { %2451 = vst [vmem:[#allocation2 + $0x170] sm:$0xff] %v2387_v20  ;;  %v2292_v24 = vadd.f32 %v2291_v23, %v2002_v21  ;;  %v2004_v25 = vpop.f32.mrf.mxu0  ;;  %v795_v21 = vld [vmem:[#allocation2 + $0x58] sm:$0xff] }
 0x299   : > { %v2293_v26 = vpop.f32.mrf.mxu1 }
 0x29a   : > { %v2388_v27 = vadd.f32 %v2292_v24, %v786_v22  ;;  %v2007_v28 = vpop.f32.mrf.mxu0 }
 0x29b   : > { %v2296_v30 = vpop.f32.mrf.mxu1 }
 0x29c   : > { %2452 = vst [vmem:[#allocation2 + $0x178] sm:$0xff] %v2388_v27  ;;  %v2297_v31 = vadd.f32 %v2296_v30, %v2007_v28  ;;  %v2009_v32 = vpop.f32.mrf.mxu0  ;;  %v796_v28 = vld [vmem:[#allocation2 + $0xa0] sm:$0xff] }
 0x29d   : > { %v2298_v33 = vpop.f32.mrf.mxu1 }
 0x29e   : > { %v2389_v34 = vadd.f32 %v2297_v31, %v787_v29  ;;  %v2010_v35 = vpop.f32.mrf.mxu0 }
 0x29f   : > { %v2299_v37 = vpop.f32.mrf.mxu1 }
 0x2a0   : > { %2453 = vst [vmem:[#allocation2 + $0x68] sm:$0xff] %v2389_v34  ;;  %v2300_v38 = vadd.f32 %v2299_v37, %v2010_v35  ;;  %v2012_v39 = vpop.f32.mrf.mxu0 }
 0x2a1   : > { %v2301_v40 = vpop.f32.mrf.mxu1 }
 0x2a2   : > { %v2390_v41 = vadd.f32 %v2300_v38, %v788_v36  ;;  %v2015_v42 = vpop.f32.mrf.mxu0 }
 0x2a3   : > { %v2304_v44 = vpop.f32.mrf.mxu1 }
 0x2a4   : > { %2454 = vst [vmem:[#allocation2 + $0x190] sm:$0xff] %v2390_v41  ;;  %v2305_v45 = vadd.f32 %v2304_v44, %v2015_v42  ;;  %v2017_v46 = vpop.f32.mrf.mxu0 }
 0x2a5   : > { %v2306_v47 = vpop.f32.mrf.mxu1 }
 0x2a6   : > { %v2391_v48 = vadd.f32 %v2305_v45, %v789_v43  ;;  %v2018_v49 = vpop.f32.mrf.mxu0 }
 0x2a7   : > { %v2307_v51 = vpop.f32.mrf.mxu1 }
 0x2a8   : > { %2455 = vst [vmem:[#allocation2 + $0x198] sm:$0xff] %v2391_v48  ;;  %v2308_v52 = vadd.f32 %v2307_v51, %v2018_v49  ;;  %v2020_v53 = vpop.f32.mrf.mxu0 }
 0x2a9   : > { %v2309_v54 = vpop.f32.mrf.mxu1 }
 0x2aa   : > { %v2392_v55 = vadd.f32 %v2308_v52, %v790_v50  ;;  %v2023_v56 = vpop.f32.mrf.mxu0 }
 0x2ab   : > { %v2312_v58 = vpop.f32.mrf.mxu1 }
 0x2ac   : > { %2456 = vst [vmem:[#allocation2 + $0x38] sm:$0xff] %v2392_v55  ;;  %v2313_v59 = vadd.f32 %v2312_v58, %v2023_v56  ;;  %v2025_v60 = vpop.f32.mrf.mxu0 }
 0x2ad   : > { %v2314_v61 = vpop.f32.mrf.mxu1 }
 0x2ae   : > { %v2393_v62 = vadd.f32 %v2313_v59, %v791_v57  ;;  %v2026_v63 = vpop.f32.mrf.mxu0 }
 0x2af   : > { %v2315_v1 = vpop.f32.mrf.mxu1 }
 0x2b0   : > { %2457 = vst [vmem:[#allocation2 + $0xc0] sm:$0xff] %v2393_v62  ;;  %v2316_v2 = vadd.f32 %v2315_v1, %v2026_v63  ;;  %v2028_v3 = vpop.f32.mrf.mxu0 }
 0x2b1   : > { %v2317_v4 = vpop.f32.mrf.mxu1 }
 0x2b2   : > { %v2394_v5 = vadd.f32 %v2316_v2, %v792_v0  ;;  %v2031_v6 = vpop.f32.mrf.mxu0 }
 0x2b3   : > { %v2320_v8 = vpop.f32.mrf.mxu1 }
 0x2b4   : > { %2458 = vst [vmem:[#allocation2 + $0x1c0] sm:$0xff] %v2394_v5  ;;  %v2321_v9 = vadd.f32 %v2320_v8, %v2031_v6  ;;  %v2033_v10 = vpop.f32.mrf.mxu0 }
 0x2b5   : > { %v2322_v11 = vpop.f32.mrf.mxu1 }
 0x2b6   : > { %v2395_v12 = vadd.f32 %v2321_v9, %v793_v7  ;;  %v2034_v13 = vpop.f32.mrf.mxu0 }
 0x2b7   : > { %v2323_v15 = vpop.f32.mrf.mxu1 }
 0x2b8   : > { %2459 = vst [vmem:[#allocation2 + $0x158] sm:$0xff] %v2395_v12  ;;  %v2324_v16 = vadd.f32 %v2323_v15, %v2034_v13  ;;  %v2036_v17 = vpop.f32.mrf.mxu0 }
 0x2b9   : > { %v2325_v18 = vpop.f32.mrf.mxu1 }
 0x2ba   : > { %v2396_v19 = vadd.f32 %v2324_v16, %v794_v14  ;;  %v2039_v20 = vpop.f32.mrf.mxu0 }
 0x2bb   : > { %v2328_v22 = vpop.f32.mrf.mxu1 }
 0x2bc   : > { %2460 = vst [vmem:[#allocation2 + $0x10] sm:$0xff] %v2396_v19  ;;  %v2329_v23 = vadd.f32 %v2328_v22, %v2039_v20  ;;  %v2041_v24 = vpop.f32.mrf.mxu0 }
 0x2bd   : > { %v2330_v25 = vpop.f32.mrf.mxu1 }
 0x2be   : > { %v2397_v26 = vadd.f32 %v2329_v23, %v795_v21  ;;  %v2042_v27 = vpop.f32.mrf.mxu0 }
 0x2bf   : > { %v2331_v29 = vpop.f32.mrf.mxu1 }
 0x2c0   : > { %2461 = vst [vmem:[#allocation2 + $0x58] sm:$0xff] %v2397_v26  ;;  %v2332_v30 = vadd.f32 %v2331_v29, %v2042_v27  ;;  %v2044_v31 = vpop.f32.mrf.mxu0 }
 0x2c1   : > { %v2333_v32 = vpop.f32.mrf.mxu1 }
 0x2c2   : > { %v2398_v33 = vadd.f32 %v2332_v30, %v796_v28 }
 0x2c4   : > { %2462 = vst [vmem:[#allocation2 + $0xa0] sm:$0xff] %v2398_v33 }
 0x2c5 PF: > { %p3385_p10 = scmp.ne.s32.totalorder %s3942_s11, 1 }
 0x2c7   : > { %2466 = sbr.rel (%p3385_p10) target bundleno = 1272 (0x4f8), region = 75 }
 0x2cc   : > { %v3866_v34 = vld [vmem:[%s4865_s4 + $0x38] sm:$0xff]   ;;  %v3867_v35 = vld [vmem:[%s4865_s4 + $0x30] sm:$0xff]   ;;  %v3868_v36 = vld [vmem:[%s4865_s4 + $0x28] sm:$0xff]  }
 0x2cd   : > { %3486 = vmatprep.subr.bf16.mxu0 %v3866_v34  ;;  %3566 = vmatprep.subr.bf16.mxu1 %v3866_v34  ;;  %v3869_v37 = vld [vmem:[%s4865_s4 + $0x20] sm:$0xff]   ;;  %v2467_v38 = vld [vmem:[#allocation2 + $0xb0] sm:$0xff]  ;;  %v3870_v41 = vld [vmem:[%s4865_s4 + $0x18] sm:$0xff]  }
 0x2ce   : > { %3487 = vmatpush3.bf16.msra.mxu0 %v3866_v34  ;;  %3574 = vmatpush3.bf16.msra.mxu1 %v3866_v34  ;;  %v2468_v39 = vld [vmem:[#allocation2 + $0x1b0] sm:$0xff]  ;;  %v3872_v46 = vld [vmem:[%s4865_s4 + $0x8] sm:$0xff]   ;;  %v3873_v47 = vld [vmem:[%s4865_s4] sm:$0xff]  }
 0x2cf   : > { %3488 = vmatprep.subr.bf16.mxu0 %v3867_v35  ;;  %3567 = vmatprep.subr.bf16.mxu1 %v3867_v35  ;;  %v2531_v40 = vpack.c.bf16 %v2468_v39, %v2467_v38  ;;  %v3871_v42 = vld [vmem:[%s4865_s4 + $0x10] sm:$0xff]   ;;  %v2469_v48 = vld [vmem:[#allocation2 + $0xd8] sm:$0xff]  ;;  %v2472_v51 = vld [vmem:[#allocation2 + $0x168] sm:$0xff] }
 0x2d0   : > { %v2511_v43 = vld [vmem:[#allocation2 + $0x70] sm:$0xff]  ;;  %v2470_v49 = vld [vmem:[#allocation2 + $0x18] sm:$0xff]  ;;  %v2516_v55 = vld [vmem:[#allocation2 + $0x88] sm:$0xff] }
 0x2d1   : > { %3502 = vmatprep.mubr.bf16.mxu0 %v2531_v40  ;;  %v2512_v44 = vld [vmem:[#allocation2 + $0x90] sm:$0xff]  ;;  %v2513_v52 = vld [vmem:[#allocation2 + $0x1d8] sm:$0xff]  ;;  %v2532_v56 = vpack.c.bf16 %v2470_v49, %v2469_v48  ;;  %v2474_v61 = vld [vmem:[#allocation2 + $0x48] sm:$0xff] }
 0x2d2   : > { %3489 = vmatpush3.bf16.msra.mxu0 %v3867_v35  ;;  %3575 = vmatpush3.bf16.msra.mxu1 %v3867_v35  ;;  %v2553_v45 = vpack.c.bf16 %v2512_v44, %v2511_v43  ;;  %v2471_v50 = vld [vmem:[#allocation2 + $0x50] sm:$0xff]  ;;  %v2515_v54 = vld [vmem:[#allocation2 + $0xb8] sm:$0xff]  ;;  %v2475_v62 = vld [vmem:[#allocation2 + $0x180] sm:$0xff] }
 0x2d3   : > { %3490 = vmatprep.subr.bf16.mxu0 %v3868_v36  ;;  %3568 = vmatprep.subr.bf16.mxu1 %v3868_v36  ;;  %v2514_v53 = vld [vmem:[#allocation2 + $0xd0] sm:$0xff]  ;;  %v2533_v57 = vpack.c.bf16 %v2472_v51, %v2471_v50  ;;  %v2555_v59 = vpack.c.bf16 %v2516_v55, %v2515_v54  ;;  %v2517_v0 = vld [vmem:[#allocation2 + $0xa8] sm:$0xff]  ;;  %v2520_v3 = vld [vmem:[#allocation2 + $0x178] sm:$0xff] }
 0x2d4   : > { %3546 = vmatprep.mubr.bf16.mxu1 %v2553_v45  ;;  %v2554_v58 = vpack.c.bf16 %v2514_v53, %v2513_v52  ;;  %v2473_v60 = vld [vmem:[#allocation2 + $0x130] sm:$0xff]  ;;  %v2518_v1 = vld [vmem:[#allocation2 + $0x1c8] sm:$0xff]  ;;  %v2477_v8 = vld [vmem:[#allocation2 + $0x118] sm:$0xff] }
 0x2d5   : > { %v2476_v63 = vld [vmem:[#allocation2 + $0x110] sm:$0xff]  ;;  %v2534_v4 = vpack.c.bf16 %v2474_v61, %v2473_v60  ;;  %v2556_v6 = vpack.c.bf16 %v2518_v1, %v2517_v0  ;;  %v2478_v9 = vld [vmem:[#allocation2 + $0x98] sm:$0xff]  ;;  %v2479_v10 = vld [vmem:[#allocation2 + $0x120] sm:$0xff] }
 0x2d6   : > { %3491 = vmatpush3.bf16.msra.mxu0 %v3868_v36  ;;  %3576 = vmatpush3.bf16.msra.mxu1 %v3868_v36  ;;  %v2519_v2 = vld [vmem:[#allocation2 + $0x170] sm:$0xff]  ;;  %v2535_v5 = vpack.c.bf16 %v2476_v63, %v2475_v62  ;;  %v2521_v12 = vld [vmem:[#allocation2 + $0x68] sm:$0xff]  ;;  %v2523_v14 = vld [vmem:[#allocation2 + $0x198] sm:$0xff]  ;;  %v2536_v16 = vpack.c.bf16 %v2478_v9, %v2477_v8 }
 0x2d7   : > { %3492 = vmatprep.subr.bf16.mxu0 %v3869_v37  ;;  %3569 = vmatprep.subr.bf16.mxu1 %v3869_v37  ;;  %v2557_v7 = vpack.c.bf16 %v2520_v3, %v2519_v2  ;;  %v2480_v11 = vld [vmem:[#allocation2 + $0x150] sm:$0xff]  ;;  %v2524_v15 = vld [vmem:[#allocation2 + $0x38] sm:$0xff]  ;;  %v2481_v20 = vld [vmem:[#allocation2 + $0x108] sm:$0xff] }
 0x2d8   : > { %v2522_v13 = vld [vmem:[#allocation2 + $0x190] sm:$0xff]  ;;  %v2537_v17 = vpack.c.bf16 %v2480_v11, %v2479_v10  ;;  %v2559_v19 = vpack.c.bf16 %v2524_v15, %v2523_v14  ;;  %v2482_v21 = vld [vmem:[#allocation2 + $0x60] sm:$0xff]  ;;  %v2484_v23 = vld [vmem:[#allocation2 + $0x188] sm:$0xff] }
 0x2d9   : > { %v2558_v18 = vpack.c.bf16 %v2522_v13, %v2521_v12  ;;  %v2483_v22 = vld [vmem:[#allocation2 + $0xe0] sm:$0xff]  ;;  %v2527_v26 = vld [vmem:[#allocation2 + $0x158] sm:$0xff]  ;;  %v2528_v27 = vld [vmem:[#allocation2 + $0x10] sm:$0xff]  ;;  %v2538_v28 = vpack.c.bf16 %v2482_v21, %v2481_v20 }
 0x2da   : > { %3493 = vmatpush3.bf16.msra.mxu0 %v3869_v37  ;;  %3577 = vmatpush3.bf16.msra.mxu1 %v3869_v37  ;;  %v2525_v24 = vld [vmem:[#allocation2 + $0xc0] sm:$0xff]  ;;  %v2539_v29 = vpack.c.bf16 %v2484_v23, %v2483_v22  ;;  %v2561_v31 = vpack.c.bf16 %v2528_v27, %v2527_v26  ;;  %v2485_v32 = vld [vmem:[#allocation2 + $0x138] sm:$0xff]  ;;  %v2488_v35 = vld [vmem:[#allocation2 + $0x1a8] sm:$0xff] }
 0x2db   : > { %3494 = vmatprep.subr.bf16.mxu0 %v3870_v41  ;;  %3570 = vmatprep.subr.bf16.mxu1 %v3870_v41  ;;  %v2526_v25 = vld [vmem:[#allocation2 + $0x1c0] sm:$0xff]  ;;  %v2529_v36 = vld [vmem:[#allocation2 + $0x58] sm:$0xff]  ;;  %v2491_v43 = vld [vmem:[#allocation2 + $0x1e8] sm:$0xff] }
 0x2dc   : > { %v2560_v30 = vpack.c.bf16 %v2526_v25, %v2525_v24  ;;  %v2486_v33 = vld [vmem:[#allocation2 + $0x140] sm:$0xff]  ;;  %v2492_v44 = vld [vmem:[#allocation2 + $0xf8] sm:$0xff]  ;;  %v2494_v48 = vld [vmem:[#allocation2 + $0x30] sm:$0xff] }
 0x2dd   : > { %v2487_v34 = vld [vmem:[#allocation2 + $0x80] sm:$0xff]  ;;  %v2540_v38 = vpack.c.bf16 %v2486_v33, %v2485_v32  ;;  %v2497_v53 = vld [vmem:[#allocation2 + $0xf0] sm:$0xff]  ;;  %v2498_v54 = vld [vmem:[#allocation2 + $0x8] sm:$0xff] }
 0x2de   : > { %3495 = vmatpush3.bf16.msra.mxu0 %v3870_v41  ;;  %3578 = vmatpush3.bf16.msra.mxu1 %v3870_v41  ;;  %v2530_v37 = vld [vmem:[#allocation2 + $0xa0] sm:$0xff]  ;;  %v2541_v39 = vpack.c.bf16 %v2488_v35, %v2487_v34  ;;  %v2489_v41 = vld [vmem:[#allocation2 + $0x1b8] sm:$0xff]  ;;  %v2499_v55 = vld [vmem:[#allocation2 + $0x148] sm:$0xff] }
 0x2df   : > { %3496 = vmatprep.subr.bf16.mxu0 %v3871_v42  ;;  %3571 = vmatprep.subr.bf16.mxu1 %v3871_v42  ;;  %v2562_v40 = vpack.c.bf16 %v2530_v37, %v2529_v36  ;;  %v2495_v49 = vld [vmem:[#allocation2 + $0x1e0] sm:$0xff]  ;;  %v2502_v60 = vld [vmem:[#allocation2 + $0xc8] sm:$0xff]  ;;  %v2504_v62 = vld [vmem:[#allocation2 + $0x1f8] sm:$0xff] }
 0x2e0   : > { %v2496_v50 = vld [vmem:[#allocation2] sm:$0xff]  ;;  %v2506_v2 = vld [vmem:[#allocation2 + $0x128] sm:$0xff]  ;;  %v2510_v8 = vld [vmem:[#allocation2 + $0x78] sm:$0xff] }
 0x2e1   : > { %v2545_v52 = vpack.c.bf16 %v2496_v50, %v2495_v49  ;;  %v2503_v61 = vld [vmem:[#allocation2 + $0x40] sm:$0xff] }
 0x2e2   : > { %3497 = vmatpush3.bf16.msra.mxu0 %v3871_v42  ;;  %3579 = vmatpush3.bf16.msra.mxu1 %v3871_v42  ;;  %v2490_v42 = vld [vmem:[#allocation2 + $0x28] sm:$0xff]  ;;  %v2549_v0 = vpack.c.bf16 %v2504_v62, %v2503_v61  ;;  %v2505_v1 = vld [vmem:[#allocation2 + $0x20] sm:$0xff] }
 0x2e3   : > { %3498 = vmatprep.subr.bf16.mxu0 %v3872_v46  ;;  %3572 = vmatprep.subr.bf16.mxu1 %v3872_v46  ;;  %v2542_v45 = vpack.c.bf16 %v2490_v42, %v2489_v41  ;;  %v2507_v3 = vld [vmem:[#allocation2 + $0x1a0] sm:$0xff] }
 0x2e4   : > { %v4644_v10 = vld [vmem:[%s4342_s23] sm:$0xff] }
 0x2e5   : > { %v3396_v11 = vcombine.high %v4644_v10, %v4644_v10  ;;  %v4651_v13 = vld [vmem:[%s4866_s5] ss:$0 sm:$0xff] }
 0x2e6   : > { %3499 = vmatpush3.bf16.msra.mxu0 %v3872_v46  ;;  %3580 = vmatpush3.bf16.msra.mxu1 %v3872_v46  ;;  %v2543_v46 = vpack.c.bf16 %v2492_v44, %v2491_v43 }
 0x2e7   : > { %3500 = vmatprep.subr.bf16.mxu0 %v3873_v47  ;;  %3573 = vmatprep.subr.bf16.mxu1 %v3873_v47 }
 0x2ea   : > { %3501 = vmatpush3.bf16.msra.mxu0 %v3873_v47  ;;  %3581 = vmatpush3.bf16.msra.mxu1 %v3873_v47  ;;  %v2493_v47 = vld [vmem:[#allocation2 + $0x160] sm:$0xff] }
 0x2eb   : > { %v2544_v51 = vpack.c.bf16 %v2494_v48, %v2493_v47 }
 0x2ed   : > { %3503 = vmatmul.mubr.bf16.vlgmr.msra.gmra.mxu0 %v2532_v56  ;;  %3547 = vmatmul.mubr.bf16.vlgmr.msra.gmra.mxu1 %v2554_v58  ;;  %v2500_v56 = vld [vmem:[#allocation2 + $0x1d0] sm:$0xff] }
 0x2ee   : > { %3506 = vmatprep.mubr.bf16.mxu0 %v2533_v57  ;;  %3550 = vmatprep.mubr.bf16.mxu1 %v2555_v59  ;;  %v2546_v57 = vpack.c.bf16 %v2498_v54, %v2497_v53  ;;  %v2547_v58 = vpack.c.bf16 %v2500_v56, %v2499_v55  ;;  %v2501_v59 = vld [vmem:[#allocation2 + $0x100] sm:$0xff] }
 0x2ef   : > { %v2548_v63 = vpack.c.bf16 %v2502_v60, %v2501_v59 }
 0x2f5   : > { %3507 = vmatmul.mubr.bf16.gmra.mxu0 %v2534_v4  ;;  %3551 = vmatmul.mubr.bf16.gmra.mxu1 %v2556_v6  ;;  %v2508_v4 = vld [vmem:[#allocation2 + $0x1f0] sm:$0xff] }
 0x2f6   : > { %3510 = vmatprep.mubr.bf16.mxu0 %v2535_v5  ;;  %3554 = vmatprep.mubr.bf16.mxu1 %v2557_v7  ;;  %v2550_v5 = vpack.c.bf16 %v2506_v2, %v2505_v1  ;;  %v2551_v6 = vpack.c.bf16 %v2508_v4, %v2507_v3  ;;  %v2509_v7 = vld [vmem:[#allocation2 + $0xe8] sm:$0xff] }
 0x2f7   : > { %v2552_v9 = vpack.c.bf16 %v2510_v8, %v2509_v7 }
 0x2fd   : > { %3511 = vmatmul.mubr.bf16.gmra.mxu0 %v2536_v16  ;;  %3555 = vmatmul.mubr.bf16.gmra.mxu1 %v2558_v18 }
 0x2fe   : > { %3514 = vmatprep.mubr.bf16.mxu0 %v2537_v17  ;;  %3558 = vmatprep.mubr.bf16.mxu1 %v2559_v19 }
 0x305   : > { %3515 = vmatmul.mubr.bf16.gmra.mxu0 %v2538_v28  ;;  %3559 = vmatmul.mubr.bf16.gmra.mxu1 %v2560_v30 }
 0x306   : > { %3518 = vmatprep.mubr.bf16.mxu0 %v2539_v29  ;;  %3562 = vmatprep.mubr.bf16.mxu1 %v2561_v31 }
 0x30d   : > { %3519 = vmatmul.mubr.bf16.gmra.mxu0 %v2540_v38  ;;  %3563 = vmatmul.mubr.bf16.gmra.mxu1 %v2562_v40 }
 0x30e   : > { %3522 = vmatprep.mubr.bf16.mxu0 %v2541_v39  ;;  %3067 = vmatprep.mubr.bf16.mxu1 %v3396_v11 }
 0x315   : > { %3523 = vmatmul.mubr.bf16.gmra.mxu0 %v2542_v45 }
 0x316   : > { %3526 = vmatprep.mubr.bf16.mxu0 %v2543_v46 }
 0x31d   : > { %3527 = vmatmul.mubr.bf16.gmra.mxu0 %v2544_v51 }
 0x31e   : > { %3530 = vmatprep.mubr.bf16.mxu0 %v2545_v52 }
 0x325   : > { %3531 = vmatmul.mubr.bf16.gmra.mxu0 %v2546_v57 }
 0x326   : > { %3534 = vmatprep.mubr.bf16.mxu0 %v2547_v58 }
 0x32d   : > { %3535 = vmatmul.mubr.bf16.gmra.mxu0 %v2548_v63 }
 0x32e   : > { %3538 = vmatprep.mubr.bf16.mxu0 %v2549_v0 }
 0x335   : > { %3539 = vmatmul.mubr.bf16.gmra.mxu0 %v2550_v5 }
 0x336   : > { %3542 = vmatprep.mubr.bf16.mxu0 %v2551_v6 }
 0x33d   : > { %3543 = vmatmul.mubr.bf16.gmra.mxu0 %v2552_v9 }
 0x3ad   : > { %v3504_v12 = vpop.f32.mrf.mxu0  ;;  %v4662_v31 = vpop.f32.mrf.mxu1 }
 0x3ae   : > { %v2677_v15 = vadd.f32 %v3504_v12, %v4651_v13 }
 0x3af   : > { %v2668_v14 = vpop.f32.mrf.mxu0  ;;  %v4669_v39 = vpop.f32.mrf.mxu1 }
 0x3b0   : > { %v2669_v17 = vadd.f32 %v4651_v13, %v2668_v14  ;;  %v2925_v20 = vmax.f32 %v2677_v15, 0.0 }
 0x3b1   : > { %v3505_v16 = vpop.f32.mrf.mxu0  ;;  %v4677_v46 = vpop.f32.mrf.mxu1 }
 0x3b2   : > { %v2680_v18 = vadd.f32 %v3505_v16, %v4651_v13  ;;  %v2923_v24 = vmax.f32 %v2669_v17, 0.0 }
 0x3b3   : > { %v2671_v19 = vpop.f32.mrf.mxu0  ;;  %v4681_v49 = vpop.f32.mrf.mxu1 }
 0x3b4   : > { %v2926_v21 = vmax.f32 %v2680_v18, 0.0  ;;  %v2672_v22 = vadd.f32 %v4651_v13, %v2671_v19 }
 0x3b5   : > { %v3508_v23 = vpop.f32.mrf.mxu0  ;;  %v4683_v52 = vpop.f32.mrf.mxu1 }
 0x3b6   : > { %v4657_v25 = vpack.c.bf16 %v2926_v21, %v2925_v20  ;;  %v2924_v26 = vmax.f32 %v2672_v22, 0.0  ;;  %v2693_v29 = vadd.f32 %v3508_v23, %v4651_v13 }
 0x3b7   : > { %v2684_v27 = vpop.f32.mrf.mxu0  ;;  %v4687_v55 = vpop.f32.mrf.mxu1 }
 0x3b8   : > { %v4659_v28 = vpack.c.bf16 %v2924_v26, %v2923_v24  ;;  %v2685_v32 = vadd.f32 %v4651_v13, %v2684_v27  ;;  %v2929_v35 = vmax.f32 %v2693_v29, 0.0 }
 0x3b9   : > { %v3509_v30 = vpop.f32.mrf.mxu0  ;;  %v4693_v58 = vpop.f32.mrf.mxu1 }
 0x3ba   : > { %v2696_v33 = vadd.f32 %v3509_v30, %v4651_v13  ;;  %v2927_v40 = vmax.f32 %v2685_v32, 0.0 }
 0x3bb   : > { %v2687_v34 = vpop.f32.mrf.mxu0  ;;  %v4699_v61 = vpop.f32.mrf.mxu1 }
 0x3bc   : > { %v2930_v36 = vmax.f32 %v2696_v33, 0.0  ;;  %v2688_v37 = vadd.f32 %v4651_v13, %v2687_v34 }
 0x3bd   : > { %v4667_v38 = vpop.f32.mrf.mxu0  ;;  %v4703_v0 = vpop.f32.mrf.mxu1 }
 0x3be   : > { %v4671_v41 = vpack.c.bf16 %v2930_v36, %v2929_v35  ;;  %v2928_v42 = vmax.f32 %v2688_v37, 0.0 }
 0x3bf   : > { %v4673_v43 = vpop.f32.mrf.mxu0  ;;  %v4707_v3 = vpop.f32.mrf.mxu1 }
 0x3c0   : > { %v4675_v44 = vpack.c.bf16 %v2928_v42, %v2927_v40 }
 0x3c1   : > { %v3513_v45 = vpop.f32.mrf.mxu0  ;;  %v4709_v6 = vpop.f32.mrf.mxu1 }
 0x3c2   : > { %v2712_v40 = vadd.f32 %v3513_v45, %v4651_v13 }
 0x3c3   : > { %v4679_v47 = vpop.f32.mrf.mxu0  ;;  %v4711_v9 = vpop.f32.mrf.mxu1 }
 0x3c5   : > { %v3516_v48 = vpop.f32.mrf.mxu0  ;;  %v4716_v17 = vpop.f32.mrf.mxu1 }
 0x3c6   : > { %v2725_v15 = vadd.f32 %v3516_v48, %v4651_v13 }
 0x3c7   : > { %v2716_v50 = vpop.f32.mrf.mxu0  ;;  %v4726_v33 = vpop.f32.mrf.mxu1 }
 0x3c8   : > { %v2937_v29 = vmax.f32 %v2725_v15, 0.0  ;;  %v2717_v30 = vadd.f32 %v4651_v13, %v2716_v50  ;;  %v2709_v50 = vadd.f32 %v4667_v38, %v4651_v13  ;;  %v2934_v15 = vmax.f32 %v2712_v40, 0.0 }
 0x3c9   : > { %v3517_v51 = vpop.f32.mrf.mxu0 }
 0x3ca   : > { %v2728_v11 = vadd.f32 %v3517_v51, %v4651_v13 }
 0x3cb   : > { %v2719_v53 = vpop.f32.mrf.mxu0 }
 0x3cc   : > { %v2938_v20 = vmax.f32 %v2728_v11, 0.0  ;;  %v2720_v21 = vadd.f32 %v4651_v13, %v2719_v53  ;;  %v2935_v11 = vmax.f32 %v2717_v30, 0.0 }
 0x3cd   : > { %v4685_v54 = vpop.f32.mrf.mxu0 }
 0x3ce   : > { %v2996_v42 = vpack.c.bf16 %v2938_v20, %v2937_v29  ;;  %v2936_v48 = vmax.f32 %v2720_v21, 0.0  ;;  %v2933_v21 = vmax.f32 %v2709_v50, 0.0 }
 0x3cf   : > { %v4689_v56 = vpop.f32.mrf.mxu0 }
 0x3d1   : > { %v4691_v57 = vpop.f32.mrf.mxu0 }
 0x3d2   : > { %v2744_v40 = vadd.f32 %v4691_v57, %v4651_v13 }
 0x3d3   : > { %v4695_v59 = vpop.f32.mrf.mxu0 }
 0x3d4   : > { %v2942_v50 = vmax.f32 %v2744_v40, 0.0 }
 0x3d5   : > { %v4697_v60 = vpop.f32.mrf.mxu0 }
 0x3d7   : > { %v4701_v62 = vpop.f32.mrf.mxu0 }
 0x3d9   : > { %v3525_v63 = vpop.f32.mrf.mxu0 }
 0x3db   : > { %v4705_v1 = vpop.f32.mrf.mxu0 }
 0x3dd   : > { %v3528_v2 = vpop.f32.mrf.mxu0 }
 0x3de   : > { %v2773_v34 = vadd.f32 %v3528_v2, %v4651_v13  ;;  %v4735_v2 = vpop.f32.mrf.mxu1 }
 0x3df   : > { %v2764_v4 = vpop.f32.mrf.mxu0 }
 0x3e0   : > { %v2765_v45 = vadd.f32 %v4651_v13, %v2764_v4 }
 0x3e1   : > { %v3529_v5 = vpop.f32.mrf.mxu0 }
 0x3e2   : > { %v2776_v23 = vadd.f32 %v3529_v5, %v4651_v13 }
 0x3e3   : > { %v2767_v7 = vpop.f32.mrf.mxu0 }
 0x3e4   : > { %v2950_v53 = vmax.f32 %v2776_v23, 0.0  ;;  %v2768_v5 = vadd.f32 %v4651_v13, %v2767_v7  ;;  %v2995_v7 = vpack.c.bf16 %v2936_v48, %v2935_v11  ;;  %v4747_v23 = vpop.f32.mrf.mxu1 }
 0x3e5   : > { %v3532_v8 = vpop.f32.mrf.mxu0 }
 0x3e6   : > { %v2789_v14 = vadd.f32 %v3532_v8, %v4651_v13  ;;  %v2948_v20 = vmax.f32 %v2768_v5, 0.0  ;;  %v2741_v5 = vadd.f32 %v4685_v54, %v4651_v13 }
 0x3e7   : > { %v2780_v12 = vpop.f32.mrf.mxu0 }
 0x3e8   : > { %v2781_v18 = vadd.f32 %v4651_v13, %v2780_v12  ;;  %v2953_v24 = vmax.f32 %v2789_v14, 0.0  ;;  %v2949_v14 = vmax.f32 %v2773_v34, 0.0 }
 0x3e9   : > { %v3533_v16 = vpop.f32.mrf.mxu0 }
 0x3ea   : > { %v2792_v19 = vadd.f32 %v3533_v16, %v4651_v13  ;;  %v2951_v35 = vmax.f32 %v2781_v18, 0.0  ;;  %v2704_v16 = vadd.f32 %v4651_v13, %v4679_v47  ;;  %v3002_v38 = vpack.c.bf16 %v2950_v53, %v2949_v14 }
 0x3eb   : > { %v2783_v22 = vpop.f32.mrf.mxu0  ;;  %v2947_v47 = vmax.f32 %v2765_v45, 0.0  ;;  %v2941_v45 = vmax.f32 %v2741_v5, 0.0  ;;  %v2896_v5 = vadd.f32 %v4651_v13, %v4747_v23 }
 0x3ec   : > { %v2954_v26 = vmax.f32 %v2792_v19, 0.0  ;;  %v2784_v27 = vadd.f32 %v4651_v13, %v2783_v22  ;;  %v2760_v19 = vadd.f32 %v3525_v63, %v4651_v13  ;;  %v2701_v22 = vadd.f32 %v4651_v13, %v4673_v43 }
 0x3ed   : > { %v4724_v32 = vpop.f32.mrf.mxu0  ;;  %v2752_v63 = vadd.f32 %v4651_v13, %v4705_v1  ;;  %v3001_v30 = vpack.c.bf16 %v2948_v20, %v2947_v47  ;;  %v2998_v54 = vpack.c.bf16 %v2942_v50, %v2941_v45 }
 0x3ee   : > { %v3004_v36 = vpack.c.bf16 %v2954_v26, %v2953_v24  ;;  %v2952_v37 = vmax.f32 %v2784_v27, 0.0  ;;  %v2757_v24 = vadd.f32 %v4697_v60, %v4651_v13  ;;  %v2994_v26 = vpack.c.bf16 %v2934_v15, %v2933_v21 }
 0x3ef   : > { %v4730_v51 = vpop.f32.mrf.mxu0  ;;  %v2932_v27 = vmax.f32 %v2704_v16, 0.0  ;;  %v2946_v29 = vmax.f32 %v2760_v19, 0.0  ;;  %v2931_v43 = vmax.f32 %v2701_v22, 0.0  ;;  %v2944_v48 = vmax.f32 %v2752_v63, 0.0 }
 0x3f0   : > { %v3003_v8 = vpack.c.bf16 %v2952_v37, %v2951_v35  ;;  %3442 = vmatprep.subr.bf16.mxu1 %v3004_v36  ;;  %v3564_v35 = vpop.f32.mrf.mxu1  ;;  %v2945_v36 = vmax.f32 %v2757_v24, 0.0  ;;  %v2749_v37 = vadd.f32 %v4651_v13, %v4701_v62  ;;  %v2736_v62 = vadd.f32 %v4651_v13, %v4695_v59 }
 0x3f1   : > { %3443 = vmatpush3.bf16.msra.mxu1 %v2996_v42  ;;  %v4737_v12 = vpop.f32.mrf.mxu0  ;;  %v2993_v60 = vpack.c.bf16 %v2932_v27, %v2931_v43  ;;  %v2733_v15 = vadd.f32 %v4651_v13, %v4689_v56  ;;  %v2917_v16 = vadd.f32 %v3564_v35, %v4651_v13  ;;  %v2856_v56 = vadd.f32 %v4677_v46, %v4651_v13 }
 0x3f2   : > { %3444 = vmatprep.subr.bf16.mxu1 %v3003_v8  ;;  %v3000_v42 = vpack.c.bf16 %v2946_v29, %v2945_v36  ;;  %v2908_v1 = vpop.f32.mrf.mxu1  ;;  %v2943_v8 = vmax.f32 %v2749_v37, 0.0  ;;  %v2848_v29 = vadd.f32 %v4651_v13, %v4681_v49  ;;  %v3395_v43 = vcombine.low %v4644_v10, %v4644_v10 }
 0x3f3   : > { %v4742_v18 = vpop.f32.mrf.mxu0  ;;  %v2939_v20 = vmax.f32 %v2733_v15, 0.0  ;;  %v2985_v21 = vmax.f32 %v2917_v16, 0.0  ;;  %v2909_v24 = vadd.f32 %v4651_v13, %v2908_v1  ;;  %v2970_v63 = vmax.f32 %v2856_v56, 0.0 }
 0x3f4   : > { %v2999_v11 = vpack.c.bf16 %v2944_v48, %v2943_v8  ;;  %v3565_v57 = vpop.f32.mrf.mxu1  ;;  %v2968_v40 = vmax.f32 %v2848_v29, 0.0  ;;  %v2888_v15 = vadd.f32 %v4709_v6, %v4651_v13  ;;  %v2880_v6 = vadd.f32 %v4651_v13, %v4711_v9 }
 0x3f5   : > { %3445 = vmatpush3.bf16.msra.mxu1 %v2995_v7  ;;  %v4749_v4 = vpop.f32.mrf.mxu0  ;;  %v2940_v7 = vmax.f32 %v2736_v62, 0.0  ;;  %v2920_v19 = vadd.f32 %v3565_v57, %v4651_v13  ;;  %v2983_v35 = vmax.f32 %v2909_v24, 0.0  ;;  %v2885_v62 = vadd.f32 %v4703_v0, %v4651_v13 }
 0x3f6   : > { %3446 = vmatprep.subr.bf16.mxu1 %v3002_v38  ;;  %v2911_v59 = vpop.f32.mrf.mxu1  ;;  %v2978_v56 = vmax.f32 %v2888_v15, 0.0 }
 0x3f7   : > { %v4755_v34 = vpop.f32.mrf.mxu0  ;;  %v2997_v22 = vpack.c.bf16 %v2940_v7, %v2939_v20  ;;  %v2986_v47 = vmax.f32 %v2920_v19, 0.0  ;;  %v2977_v7 = vmax.f32 %v2885_v62, 0.0  ;;  %v2821_v19 = vadd.f32 %v4749_v4, %v4651_v13 }
 0x3f9   : > { %3447 = vmatpush3.bf16.msra.mxu1 %v2994_v26  ;;  %v4761_v53 = vpop.f32.mrf.mxu0  ;;  %v2912_v26 = vadd.f32 %v4651_v13, %v2911_v59  ;;  %v3020_v36 = vpack.c.bf16 %v2986_v47, %v2985_v21  ;;  %v2961_v4 = vmax.f32 %v2821_v19, 0.0  ;;  %v3016_v9 = vpack.c.bf16 %v2978_v56, %v2977_v7 }
 0x3fa   : > { %3448 = vmatprep.subr.bf16.mxu1 %v3001_v30  ;;  %v2901_v30 = vadd.f32 %v4716_v17, %v4651_v13  ;;  %v2824_v0 = vadd.f32 %v4761_v53, %v4651_v13  ;;  %v2813_v53 = vadd.f32 %v4651_v13, %v4755_v34  ;;  %v2808_v34 = vadd.f32 %v4737_v12, %v4651_v13 }
 0x3fb   : > { %v4767_v14 = vpop.f32.mrf.mxu0  ;;  %v2800_v12 = vadd.f32 %v4651_v13, %v4742_v18 }
 0x3fc   : > { %v2981_v17 = vmax.f32 %v2901_v30, 0.0  ;;  %v2962_v24 = vmax.f32 %v2824_v0, 0.0  ;;  %v2816_v47 = vadd.f32 %v4651_v13, %v4767_v14  ;;  %v2861_v14 = vadd.f32 %v4651_v13, %v4687_v55 }
 0x3fd   : > { %3449 = vmatpush3.bf16.msra.mxu1 %v2993_v60  ;;  %v3544_v38 = vpop.f32.mrf.mxu0 }
 0x3fe   : > { %3450 = vmatprep.subr.bf16.mxu1 %v3000_v42  ;;  %v2837_v48 = vadd.f32 %v3544_v38, %v4651_v13  ;;  %v2960_v30 = vmax.f32 %v2816_v47, 0.0 }
 0x3ff   : > { %v2828_v27 = vpop.f32.mrf.mxu0 }
 0x400   : > { %v2829_v57 = vadd.f32 %v4651_v13, %v2828_v27 }
 0x401   : > { %3451 = vmatpush3.bf16.msra.mxu1 %v4671_v41  ;;  %v2853_v41 = vadd.f32 %v4662_v31, %v4651_v13  ;;  %v4787_v31 = vld [vmem:[%s4342_s23 + $0x8] sm:$0xff]  ;;  %v3545_v37 = vpop.f32.mrf.mxu0 }
 0x402   : > { %3452 = vmatprep.subr.bf16.mxu1 %v2999_v11  ;;  %v3398_v49 = vcombine.high %v4787_v31, %v4787_v31  ;;  %v2840_v10 = vadd.f32 %v3545_v37, %v4651_v13  ;;  %v2965_v11 = vmax.f32 %v2837_v48, 0.0  ;;  %v2963_v38 = vmax.f32 %v2829_v57, 0.0 }
 0x403   : > { %v2969_v46 = vmax.f32 %v2853_v41, 0.0  ;;  %v2831_v8 = vpop.f32.mrf.mxu0  ;;  %v2877_v41 = vadd.f32 %v4651_v13, %v4707_v3  ;;  %v2872_v3 = vadd.f32 %v4693_v58, %v4651_v13  ;;  %v2864_v58 = vadd.f32 %v4651_v13, %v4699_v61 }
 0x404   : > { %v2966_v45 = vmax.f32 %v2840_v10, 0.0  ;;  %v2971_v37 = vmax.f32 %v2861_v14, 0.0  ;;  %v2956_v61 = vmax.f32 %v2800_v12, 0.0 }
 0x405   : > { %3453 = vmatpush3.bf16.msra.mxu1 %v4675_v44  ;;  %v2845_v44 = vadd.f32 %v4651_v13, %v4669_v39  ;;  %v2984_v39 = vmax.f32 %v2912_v26, 0.0  ;;  %v3012_v42 = vpack.c.bf16 %v2970_v63, %v2969_v46  ;;  %v2975_v27 = vmax.f32 %v2877_v41, 0.0 }
 0x406   : > { %3454 = vmatprep.subr.bf16.mxu1 %v2998_v54  ;;  %v2980_v54 = vmax.f32 %v2896_v5, 0.0  ;;  %v3010_v59 = vpack.c.bf16 %v2966_v45, %v2965_v11  ;;  %v2959_v46 = vmax.f32 %v2813_v53, 0.0  ;;  %v3008_v63 = vpack.c.bf16 %v2962_v24, %v2961_v4 }
 0x407   : > { %v2967_v60 = vmax.f32 %v2845_v44, 0.0  ;;  %v2976_v44 = vmax.f32 %v2880_v6, 0.0 }
 0x409   : > { %3455 = vmatpush3.bf16.msra.mxu1 %v4657_v25  ;;  %v2904_v25 = vadd.f32 %v4735_v2, %v4651_v13  ;;  %v2893_v2 = vadd.f32 %v4651_v13, %v4726_v33  ;;  %v3011_v50 = vpack.c.bf16 %v2968_v40, %v2967_v60  ;;  %v2832_v33 = vadd.f32 %v4651_v13, %v2831_v8 }
 0x40a   : > { %3456 = vmatprep.subr.bf16.mxu1 %v2997_v22  ;;  %v2869_v22 = vadd.f32 %v4683_v52, %v4651_v13  ;;  %v2805_v52 = vadd.f32 %v4724_v32, %v4651_v13  ;;  %v2797_v32 = vadd.f32 %v4651_v13, %v4730_v51  ;;  %v2972_v60 = vmax.f32 %v2864_v58, 0.0 }
 0x40b   : > { %v2982_v1 = vmax.f32 %v2904_v25, 0.0  ;;  %v2979_v23 = vmax.f32 %v2893_v2, 0.0  ;;  %v2964_v20 = vmax.f32 %v2832_v33, 0.0  ;;  %v3015_v25 = vpack.c.bf16 %v2976_v44, %v2975_v27 }
 0x40c   : > { %v2973_v29 = vmax.f32 %v2869_v22, 0.0  ;;  %v2955_v55 = vmax.f32 %v2797_v32, 0.0  ;;  %v3397_v51 = vcombine.low %v4787_v31, %v4787_v31 }
 0x40d   : > { %3457 = vmatpush3.bf16.msra.mxu1 %v4659_v28  ;;  %v3019_v28 = vpack.c.bf16 %v2984_v39, %v2983_v35  ;;  %v3018_v16 = vpack.c.bf16 %v2982_v1, %v2981_v17  ;;  %v3017_v21 = vpack.c.bf16 %v2980_v54, %v2979_v23  ;;  %v3009_v26 = vpack.c.bf16 %v2964_v20, %v2963_v38 }
 0x40e   : > { %3464 = vmatprep.subr.bf16.mxu1 %v3020_v36  ;;  %v2957_v35 = vmax.f32 %v2805_v52, 0.0  ;;  %v2958_v36 = vmax.f32 %v2808_v34, 0.0  ;;  %v3007_v39 = vpack.c.bf16 %v2960_v30, %v2959_v46  ;;  %v3005_v17 = vpack.c.bf16 %v2956_v61, %v2955_v55 }
 0x410   : > { %3068 = vmatmul.mubr.bf16.vlgmr.msra.gmra.mxu1 %v3395_v43  ;;  %v2974_v43 = vmax.f32 %v2872_v3, 0.0  ;;  %v3006_v40 = vpack.c.bf16 %v2958_v36, %v2957_v35 }
 0x411   : > { %3465 = vmatpush3.bf16.msra.mxu1 %v3012_v42  ;;  %3107 = vmatprep.mubr.bf16.mxu1 %v3398_v49  ;;  %v3013_v42 = vpack.c.bf16 %v2972_v60, %v2971_v37 }
 0x412   : > { %3466 = vmatprep.subr.bf16.mxu1 %v3019_v28  ;;  %v3014_v49 = vpack.c.bf16 %v2974_v43, %v2973_v29 }
 0x415   : > { %3467 = vmatpush3.bf16.msra.mxu1 %v3011_v50 }
 0x416   : > { %3468 = vmatprep.subr.bf16.mxu1 %v3018_v16 }
 0x419   : > { %3469 = vmatpush3.bf16.msra.mxu1 %v3010_v59 }
 0x41a   : > { %3470 = vmatprep.subr.bf16.mxu1 %v3017_v21 }
 0x41d   : > { %3471 = vmatpush3.bf16.msra.mxu1 %v3009_v26 }
 0x41e   : > { %3472 = vmatprep.subr.bf16.mxu1 %v3016_v9 }
 0x421   : > { %3473 = vmatpush3.bf16.msra.mxu1 %v3008_v63 }
 0x422   : > { %3474 = vmatprep.subr.bf16.mxu1 %v3015_v25 }
 0x425   : > { %3475 = vmatpush3.bf16.msra.mxu1 %v3007_v39 }
 0x426   : > { %3476 = vmatprep.subr.bf16.mxu1 %v3014_v49 }
 0x429   : > { %3477 = vmatpush3.bf16.msra.mxu1 %v3006_v40 }
 0x42a   : > { %3478 = vmatprep.subr.bf16.mxu1 %v3013_v42 }
 0x42d   : > { %3479 = vmatpush3.bf16.msra.mxu1 %v3005_v17 }
 0x430   : > { %3108 = vmatmul.mubr.bf16.vlgmr.msra.gmra.mxu1 %v3397_v51 }
 0x4d0   : > { %v3458_v13 = vpop.f32.mrf.mxu1 }
 0x4d2   : > { %v3459_v18 = vpop.f32.mrf.mxu1 }
 0x4d3   : > { %v3460_v5 = vadd.f32 %v3459_v18, %v3458_v13 }
 0x4d4   : > { %v3461_v48 = vpop.f32.mrf.mxu1 }
 0x4d6   : > { %v3462_v10 = vpop.f32.mrf.mxu1 }
 0x4f0   : > { %v3480_v2 = vpop.f32.mrf.mxu1 }
 0x4f2   : > { %v3481_v1 = vpop.f32.mrf.mxu1 }
 0x4f3   : > { %v3482_v28 = vadd.f32 %v3481_v1, %v3480_v2 }
 0x4f4   : > { %v3483_v8 = vpop.f32.mrf.mxu1 }
 0x4f5   : > { %v3110_v50 = vadd.f32 %v3482_v28, %v3460_v5 }
 0x4f6   : > { %v3484_v62 = vpop.f32.mrf.mxu1 }
 0x4f7   : > { %3115 = vst [vmem:[%s4347_s28] sm:$0xff] %v3110_v50 }
 0x4f8 PF: > { %s27_s15 = sadd.s32 1, %s3958_s15   ;;  %s4870_s1 = smov %s3938_s10 }
 0x4f9   : > { %p24_p11 = scmp.ge.s32.totalorder %s27_s15, 6   ;;  %s4871_s10 = smov %s4065_s18 }
 0x4fa   : > { %s4872_s11 = smov %s3950_s13  ;;  %s4873_s12 = smov %s3954_s14 }
 0x4fb   : > { %s4874_s13 = smov %s4877_s16  ;;  %s4875_s14 = smov %s4881_s17 }
 0x4fc   :  { %26 = sbr.rel (!%p24_p11) target bundleno = 29 (0x1d), region = 114 }

// kernel: gnn_forward.3
= control target key start
LH: loop header
LB: loop body
LE: loop exit
PB: predicated region body
PF: predicated region fallthrough
CT: control target
= control target key end

     0   :  { %s5156_s0 = inlined_call_operand.vmem [shape: s32[2,2], index: 0, kind: input, shape index: {}]   ;;  %s5157_s2 = inlined_call_operand.vmem [shape: bf16[1024,1024], index: 2, kind: input, shape index: {}]   ;;  %s5158_s3 = inlined_call_operand.vmem [shape: bf16[1024,128], index: 3, kind: input, shape index: {}]   ;;  %s5159_s4 = inlined_call_operand.vmem [shape: bf16[128,128], index: 4, kind: input, shape index: {}]   ;;  %s5160_s5 = inlined_call_operand.vmem [shape: f32[1,128], index: 5, kind: input, shape index: {}]   ;;  %s5161_s6 = inlined_call_operand.vmem [shape: bf16[1024,128], index: 6, kind: output, shape index: {}]   ;;  %s5162_s1 = inlined_call_operand.vmem [shape: s32[2], index: 1, kind: input, shape index: {}]  }
   0x1   :  { %s11_s23 = sshll.u32 %s5156_s0, 4  ;;  %s15_s26 = sshll.u32 %s5162_s1, 4  ;;  %s12_s23 = int_to_ptr.vmem [resolvable:$true] %s11_s23  ;;  %s16_s26 = int_to_ptr.vmem [resolvable:$true] %s15_s26 }
   0x2   :  { %s4281_s27 = scalar_lea.vmem %s12_s23, 32  ;;  %p4286_p1 = scmp.lt.s32.totalorder %s12_s23, %s12_s23 }
   0x3   :  { %p4282_p0 = scmp.ne.s32.totalorder %s12_s23, %s4281_s27  ;;  %p4287_p2 = scmp.lt.s32.totalorder %s4281_s27, %s4281_s27 }
   0x5   :  { %p4288_p3 = por %p4287_p2, %p4286_p1 }
   0x7   :  { %p4289_p4 = pnand %p4288_p3, %p4282_p0 }
   0x9   :  { %4292 = shalt.err (!%p4289_p4)  }
   0xa   :  { %s4363_s28 = smov [#allocation4]   ;;  %s4293_s29 = scalar_lea.vmem %s16_s26, 16 }
   0xb   :  { %14 = dma.vmem_to_smem %s12_s23, 32, %s4363_s28, [#allocation3] }
   0xc   :  { %p4294_p5 = scmp.ne.s32.totalorder %s16_s26, %s4293_s29  ;;  %p4298_p6 = scmp.lt.s32.totalorder %s16_s26, %s16_s26 }
   0xd   :  { %p4299_p7 = scmp.lt.s32.totalorder %s4293_s29, %s4293_s29 }
   0xf   :  { %p4300_p8 = por %p4299_p7, %p4298_p6 }
  0x11   :  { %p4301_p9 = pnand %p4300_p8, %p4294_p5 }
  0x13   :  { %4304 = shalt.err (!%p4301_p9)  }
  0x14   :  { %s4364_s0 = smov [#allocation5]  }
  0x15   :  { %18 = dma.vmem_to_smem %s16_s26, 16, %s4364_s0, [#allocation3] }
  0x16   :  { %4333 = dma.done.wait [#allocation3], 48 }
  0x17   :  { %4334 = vsyncadd [#allocation3], 4294967248 }
  0x18   :  { %20 = sfence }
  0x19   :  { %s4408_s1 = smov 0   ;;  %s4410_s30 = smov 0  }
  0x1a   :  { %s4412_s7 = smov 0   ;;  %s4414_s8 = smov 0  }
  0x1b   :  { %s4416_s9 = smov 0   ;;  %s4418_s10 = smov 0  }
  0x1c   :  { %s4420_s11 = smov 0  }
  0x1d LB: > { %s35_s12 = sadd.s32 1, %s4353_s9  ;;  %s38_s13 = sadd.s32 1, %s4357_s10  ;;  %s4361_s11 = sphi %s4420_s11, %s26_s11   ;;  %s4357_s10 = sphi %s4418_s10, %s5168_s10   ;;  %s4353_s9 = sphi %s4416_s9, %s5167_s9   ;;  %s4349_s8 = sphi %s4414_s8, %s5166_s8   ;;  %s4345_s7 = sphi %s4412_s7, %s5165_s7   ;;  %s4341_s30 = sphi %s4410_s30, %s5164_s30   ;;  %s4337_s1 = sphi %s4408_s1, %s5163_s1  }
  0x1e   : > { %p36_p10 = scmp.ge.s32.totalorder %s35_s12, 2  ;;  %s42_s14 = sshra.s32 %s4353_s9, 7 }
  0x1f   : > { %s44_s15 = sadd.s32 %s4357_s10, %s42_s14  ;;  %s47_s16 = sand.u32 127, %s4353_s9 }
  0x20   : > { %s5170_s12 = smov (%p36_p10, %s35_s12), 0  ;;  %s5172_s13 = smov (!%p36_p10, %s38_s13), %s4357_s10 }
  0x21   : > { %s3342_s17 = sshll.u32 %s44_s15, 7  ;;  %p40_p11 = scmp.ge.s32.totalorder %s5172_s13, 2 }
  0x22   : > { %s48_s18 = sadd.s32 %s3342_s17, %s47_s16  ;;  %s50_s19 = sshra.s32 %s5170_s12, 7 }
  0x23   : > { %s5174_s13 = smov (%p40_p11, %s5172_s13), 0  ;;  %s55_s20 = sand.u32 127, %s5170_s12 }
  0x24   : > { %p70_p12 = scmp.ne.s32.totalorder %s4341_s30, %s4337_s1  ;;  %s49_s21 = sld [smem:[#allocation4 + %s48_s18]] }
  0x25   : > { %s52_s22 = sadd.s32 %s50_s19, %s5174_s13  ;;  %p71_p13 = scmp.eq.s32.totalorder %s4361_s11, 0 }
  0x26   : > { %s3343_s23 = sshll.u32 %s52_s22, 7  ;;  %s58_s26 = ssub.s32 %s4357_s10, %s5174_s13 }
  0x27   : > { %s56_s24 = sadd.s32 %s3343_s23, %s55_s20  ;;  %p72_p0 = por %p71_p13, %p70_p12 }
  0x28   : > { %s57_s25 = sld [smem:[#allocation4 + %s56_s24]]  ;;  %s63_s29 = sadd.s32 1, %s4341_s30 }
  0x29   : > { %p3345_p2 = scmp.ge.s32.totalorder %s4361_s11, 4 }
  0x2e   : > { %s59_s27 = ssub.s32 %s49_s21, %s57_s25  ;;  %194 = sbr.rel (%p3345_p2) target bundleno = 126 (0x7e), region = 28 }
  0x2f   : > { %s60_s28 = sor.u32 %s59_s27, %s58_s26 }
  0x30   : > { %p61_p1 = scmp.eq.s32.totalorder %s60_s28, 0 }
  0x32   : > { %s4463_s0 = scalar_select %p61_p1, %s4341_s30, %s63_s29  }
  0x33   : > { %197 = sbr.rel (!%p72_p0) target bundleno = 126 (0x7e), region = 32  ;;  %s209_s14 = sld [smem:[#allocation4 + %s48_s18]] (%p72_p0) }
  0x34   : > { %s199_s15 = sand.u32 (%p72_p0), 1, %s4341_s30   ;;  %s3597_s16 = sshll.u32 (%p72_p0), %s4357_s10, 9 }
  0x35   : > { %s3346_s17 = sshll.u32 (%p72_p0), %s199_s15, 10 }
  0x36   : > { %s4476_s18 = scalar_lea.vmem (%p72_p0), [#allocation6], %s3346_s17 }
  0x39   : > { %s3349_s19 = sshll.u32 %s209_s14, 2 }
  0x3a   : > { %s213_s20 = sadd.s32 %s3597_s16, %s3349_s19 }
  0x3b   : > { %s3351_s22 = sshll.u32 %s213_s20, 2 }
  0x3c   : > { %s4471_s24 = scalar_lea.vmem %s5157_s2, %s3351_s22 }
  0x3d   : > { %v228_v0 = vld [vmem:[%s4471_s24] sm:$0xff]  ;;  %v230_v1 = vld [vmem:[%s4471_s24 + $0x8] sm:$0xff] }
  0x3e   : > { %v232_v2 = vld [vmem:[%s4471_s24 + $0x20] sm:$0xff]  ;;  %229 = vst [vmem:[%s4476_s18] sm:$0xff] %v228_v0  ;;  %231 = vst [vmem:[%s4476_s18 + $0x8] sm:$0xff] %v230_v1  ;;  %v234_v3 = vld [vmem:[%s4471_s24 + $0x28] sm:$0xff] }
  0x3f   : > { %233 = vst [vmem:[%s4476_s18 + $0x10] sm:$0xff] %v232_v2  ;;  %v236_v4 = vld [vmem:[%s4471_s24 + $0x40] sm:$0xff]  ;;  %v238_v5 = vld [vmem:[%s4471_s24 + $0x48] sm:$0xff]  ;;  %235 = vst [vmem:[%s4476_s18 + $0x18] sm:$0xff] %v234_v3 }
  0x40   : > { %237 = vst [vmem:[%s4476_s18 + $0x20] sm:$0xff] %v236_v4  ;;  %239 = vst [vmem:[%s4476_s18 + $0x28] sm:$0xff] %v238_v5  ;;  %v240_v6 = vld [vmem:[%s4471_s24 + $0x60] sm:$0xff]  ;;  %v242_v7 = vld [vmem:[%s4471_s24 + $0x68] sm:$0xff] }
  0x41   : > { %v244_v8 = vld [vmem:[%s4471_s24 + $0x80] sm:$0xff]  ;;  %241 = vst [vmem:[%s4476_s18 + $0x30] sm:$0xff] %v240_v6  ;;  %243 = vst [vmem:[%s4476_s18 + $0x38] sm:$0xff] %v242_v7  ;;  %v246_v9 = vld [vmem:[%s4471_s24 + $0x88] sm:$0xff] }
  0x42   : > { %245 = vst [vmem:[%s4476_s18 + $0x40] sm:$0xff] %v244_v8  ;;  %v248_v10 = vld [vmem:[%s4471_s24 + $0xa0] sm:$0xff]  ;;  %v250_v11 = vld [vmem:[%s4471_s24 + $0xa8] sm:$0xff]  ;;  %247 = vst [vmem:[%s4476_s18 + $0x48] sm:$0xff] %v246_v9 }
  0x43   : > { %249 = vst [vmem:[%s4476_s18 + $0x50] sm:$0xff] %v248_v10  ;;  %251 = vst [vmem:[%s4476_s18 + $0x58] sm:$0xff] %v250_v11  ;;  %v252_v12 = vld [vmem:[%s4471_s24 + $0xc0] sm:$0xff]  ;;  %v254_v13 = vld [vmem:[%s4471_s24 + $0xc8] sm:$0xff] }
  0x44   : > { %v256_v14 = vld [vmem:[%s4471_s24 + $0xe0] sm:$0xff]  ;;  %253 = vst [vmem:[%s4476_s18 + $0x60] sm:$0xff] %v252_v12  ;;  %255 = vst [vmem:[%s4476_s18 + $0x68] sm:$0xff] %v254_v13  ;;  %v258_v15 = vld [vmem:[%s4471_s24 + $0xe8] sm:$0xff] }
  0x45   : > { %257 = vst [vmem:[%s4476_s18 + $0x70] sm:$0xff] %v256_v14  ;;  %v260_v16 = vld [vmem:[%s4471_s24 + $0x100] sm:$0xff]  ;;  %v262_v17 = vld [vmem:[%s4471_s24 + $0x108] sm:$0xff]  ;;  %259 = vst [vmem:[%s4476_s18 + $0x78] sm:$0xff] %v258_v15 }
  0x46   : > { %261 = vst [vmem:[%s4476_s18 + $0x80] sm:$0xff] %v260_v16  ;;  %263 = vst [vmem:[%s4476_s18 + $0x88] sm:$0xff] %v262_v17  ;;  %v264_v18 = vld [vmem:[%s4471_s24 + $0x120] sm:$0xff]  ;;  %v266_v19 = vld [vmem:[%s4471_s24 + $0x128] sm:$0xff] }
  0x47   : > { %v268_v20 = vld [vmem:[%s4471_s24 + $0x140] sm:$0xff]  ;;  %265 = vst [vmem:[%s4476_s18 + $0x90] sm:$0xff] %v264_v18  ;;  %267 = vst [vmem:[%s4476_s18 + $0x98] sm:$0xff] %v266_v19  ;;  %v270_v21 = vld [vmem:[%s4471_s24 + $0x148] sm:$0xff] }
  0x48   : > { %269 = vst [vmem:[%s4476_s18 + $0xa0] sm:$0xff] %v268_v20  ;;  %v272_v22 = vld [vmem:[%s4471_s24 + $0x160] sm:$0xff]  ;;  %v274_v23 = vld [vmem:[%s4471_s24 + $0x168] sm:$0xff]  ;;  %271 = vst [vmem:[%s4476_s18 + $0xa8] sm:$0xff] %v270_v21 }
  0x49   : > { %273 = vst [vmem:[%s4476_s18 + $0xb0] sm:$0xff] %v272_v22  ;;  %275 = vst [vmem:[%s4476_s18 + $0xb8] sm:$0xff] %v274_v23  ;;  %v276_v24 = vld [vmem:[%s4471_s24 + $0x180] sm:$0xff]  ;;  %v278_v25 = vld [vmem:[%s4471_s24 + $0x188] sm:$0xff] }
  0x4a   : > { %v280_v26 = vld [vmem:[%s4471_s24 + $0x1a0] sm:$0xff]  ;;  %277 = vst [vmem:[%s4476_s18 + $0xc0] sm:$0xff] %v276_v24  ;;  %279 = vst [vmem:[%s4476_s18 + $0xc8] sm:$0xff] %v278_v25  ;;  %v282_v27 = vld [vmem:[%s4471_s24 + $0x1a8] sm:$0xff] }
  0x4b   : > { %281 = vst [vmem:[%s4476_s18 + $0xd0] sm:$0xff] %v280_v26  ;;  %v284_v28 = vld [vmem:[%s4471_s24 + $0x1c0] sm:$0xff]  ;;  %v286_v29 = vld [vmem:[%s4471_s24 + $0x1c8] sm:$0xff]  ;;  %283 = vst [vmem:[%s4476_s18 + $0xd8] sm:$0xff] %v282_v27 }
  0x4c   : > { %285 = vst [vmem:[%s4476_s18 + $0xe0] sm:$0xff] %v284_v28  ;;  %287 = vst [vmem:[%s4476_s18 + $0xe8] sm:$0xff] %v286_v29  ;;  %v288_v30 = vld [vmem:[%s4471_s24 + $0x1e0] sm:$0xff]  ;;  %v290_v31 = vld [vmem:[%s4471_s24 + $0x1e8] sm:$0xff] }
  0x4d   : > { %v292_v32 = vld [vmem:[%s4471_s24 + $0x200] sm:$0xff]  ;;  %289 = vst [vmem:[%s4476_s18 + $0xf0] sm:$0xff] %v288_v30  ;;  %291 = vst [vmem:[%s4476_s18 + $0xf8] sm:$0xff] %v290_v31  ;;  %v294_v33 = vld [vmem:[%s4471_s24 + $0x208] sm:$0xff] }
  0x4e   : > { %293 = vst [vmem:[%s4476_s18 + $0x100] sm:$0xff] %v292_v32  ;;  %v296_v34 = vld [vmem:[%s4471_s24 + $0x220] sm:$0xff]  ;;  %v298_v35 = vld [vmem:[%s4471_s24 + $0x228] sm:$0xff]  ;;  %295 = vst [vmem:[%s4476_s18 + $0x108] sm:$0xff] %v294_v33 }
  0x4f   : > { %297 = vst [vmem:[%s4476_s18 + $0x110] sm:$0xff] %v296_v34  ;;  %299 = vst [vmem:[%s4476_s18 + $0x118] sm:$0xff] %v298_v35  ;;  %v300_v36 = vld [vmem:[%s4471_s24 + $0x240] sm:$0xff]  ;;  %v302_v37 = vld [vmem:[%s4471_s24 + $0x248] sm:$0xff] }
  0x50   : > { %v304_v38 = vld [vmem:[%s4471_s24 + $0x260] sm:$0xff]  ;;  %301 = vst [vmem:[%s4476_s18 + $0x120] sm:$0xff] %v300_v36  ;;  %303 = vst [vmem:[%s4476_s18 + $0x128] sm:$0xff] %v302_v37  ;;  %v306_v39 = vld [vmem:[%s4471_s24 + $0x268] sm:$0xff] }
  0x51   : > { %305 = vst [vmem:[%s4476_s18 + $0x130] sm:$0xff] %v304_v38  ;;  %v308_v40 = vld [vmem:[%s4471_s24 + $0x280] sm:$0xff]  ;;  %v310_v41 = vld [vmem:[%s4471_s24 + $0x288] sm:$0xff]  ;;  %307 = vst [vmem:[%s4476_s18 + $0x138] sm:$0xff] %v306_v39 }
  0x52   : > { %309 = vst [vmem:[%s4476_s18 + $0x140] sm:$0xff] %v308_v40  ;;  %311 = vst [vmem:[%s4476_s18 + $0x148] sm:$0xff] %v310_v41  ;;  %v312_v42 = vld [vmem:[%s4471_s24 + $0x2a0] sm:$0xff]  ;;  %v314_v43 = vld [vmem:[%s4471_s24 + $0x2a8] sm:$0xff] }
  0x53   : > { %v316_v44 = vld [vmem:[%s4471_s24 + $0x2c0] sm:$0xff]  ;;  %313 = vst [vmem:[%s4476_s18 + $0x150] sm:$0xff] %v312_v42  ;;  %315 = vst [vmem:[%s4476_s18 + $0x158] sm:$0xff] %v314_v43  ;;  %v318_v45 = vld [vmem:[%s4471_s24 + $0x2c8] sm:$0xff] }
  0x54   : > { %317 = vst [vmem:[%s4476_s18 + $0x160] sm:$0xff] %v316_v44  ;;  %v320_v46 = vld [vmem:[%s4471_s24 + $0x2e0] sm:$0xff]  ;;  %v322_v47 = vld [vmem:[%s4471_s24 + $0x2e8] sm:$0xff]  ;;  %319 = vst [vmem:[%s4476_s18 + $0x168] sm:$0xff] %v318_v45 }
  0x55   : > { %321 = vst [vmem:[%s4476_s18 + $0x170] sm:$0xff] %v320_v46  ;;  %323 = vst [vmem:[%s4476_s18 + $0x178] sm:$0xff] %v322_v47  ;;  %v324_v48 = vld [vmem:[%s4471_s24 + $0x300] sm:$0xff]  ;;  %v326_v49 = vld [vmem:[%s4471_s24 + $0x308] sm:$0xff] }
  0x56   : > { %v328_v50 = vld [vmem:[%s4471_s24 + $0x320] sm:$0xff]  ;;  %325 = vst [vmem:[%s4476_s18 + $0x180] sm:$0xff] %v324_v48  ;;  %327 = vst [vmem:[%s4476_s18 + $0x188] sm:$0xff] %v326_v49  ;;  %v330_v51 = vld [vmem:[%s4471_s24 + $0x328] sm:$0xff] }
  0x57   : > { %329 = vst [vmem:[%s4476_s18 + $0x190] sm:$0xff] %v328_v50  ;;  %v332_v52 = vld [vmem:[%s4471_s24 + $0x340] sm:$0xff]  ;;  %v334_v53 = vld [vmem:[%s4471_s24 + $0x348] sm:$0xff]  ;;  %331 = vst [vmem:[%s4476_s18 + $0x198] sm:$0xff] %v330_v51 }
  0x58   : > { %333 = vst [vmem:[%s4476_s18 + $0x1a0] sm:$0xff] %v332_v52  ;;  %335 = vst [vmem:[%s4476_s18 + $0x1a8] sm:$0xff] %v334_v53  ;;  %v336_v54 = vld [vmem:[%s4471_s24 + $0x360] sm:$0xff]  ;;  %v338_v55 = vld [vmem:[%s4471_s24 + $0x368] sm:$0xff] }
  0x59   : > { %v340_v56 = vld [vmem:[%s4471_s24 + $0x380] sm:$0xff]  ;;  %337 = vst [vmem:[%s4476_s18 + $0x1b0] sm:$0xff] %v336_v54  ;;  %339 = vst [vmem:[%s4476_s18 + $0x1b8] sm:$0xff] %v338_v55  ;;  %v342_v57 = vld [vmem:[%s4471_s24 + $0x388] sm:$0xff] }
  0x5a   : > { %341 = vst [vmem:[%s4476_s18 + $0x1c0] sm:$0xff] %v340_v56  ;;  %v344_v58 = vld [vmem:[%s4471_s24 + $0x3a0] sm:$0xff]  ;;  %v346_v59 = vld [vmem:[%s4471_s24 + $0x3a8] sm:$0xff]  ;;  %343 = vst [vmem:[%s4476_s18 + $0x1c8] sm:$0xff] %v342_v57 }
  0x5b   : > { %345 = vst [vmem:[%s4476_s18 + $0x1d0] sm:$0xff] %v344_v58  ;;  %347 = vst [vmem:[%s4476_s18 + $0x1d8] sm:$0xff] %v346_v59  ;;  %v348_v60 = vld [vmem:[%s4471_s24 + $0x3c0] sm:$0xff]  ;;  %v350_v61 = vld [vmem:[%s4471_s24 + $0x3c8] sm:$0xff] }
  0x5c   : > { %v352_v62 = vld [vmem:[%s4471_s24 + $0x3e0] sm:$0xff]  ;;  %349 = vst [vmem:[%s4476_s18 + $0x1e0] sm:$0xff] %v348_v60  ;;  %351 = vst [vmem:[%s4476_s18 + $0x1e8] sm:$0xff] %v350_v61  ;;  %v354_v63 = vld [vmem:[%s4471_s24 + $0x3e8] sm:$0xff] }
  0x5d   : > { %353 = vst [vmem:[%s4476_s18 + $0x1f0] sm:$0xff] %v352_v62  ;;  %v356_v0 = vld [vmem:[%s4471_s24 + $0x400] sm:$0xff]  ;;  %v358_v1 = vld [vmem:[%s4471_s24 + $0x408] sm:$0xff]  ;;  %355 = vst [vmem:[%s4476_s18 + $0x1f8] sm:$0xff] %v354_v63 }
  0x5e   : > { %357 = vst [vmem:[%s4476_s18 + $0x200] sm:$0xff] %v356_v0  ;;  %359 = vst [vmem:[%s4476_s18 + $0x208] sm:$0xff] %v358_v1  ;;  %v360_v2 = vld [vmem:[%s4471_s24 + $0x420] sm:$0xff]  ;;  %v362_v3 = vld [vmem:[%s4471_s24 + $0x428] sm:$0xff] }
  0x5f   : > { %v364_v4 = vld [vmem:[%s4471_s24 + $0x440] sm:$0xff]  ;;  %361 = vst [vmem:[%s4476_s18 + $0x210] sm:$0xff] %v360_v2  ;;  %363 = vst [vmem:[%s4476_s18 + $0x218] sm:$0xff] %v362_v3  ;;  %v366_v5 = vld [vmem:[%s4471_s24 + $0x448] sm:$0xff] }
  0x60   : > { %365 = vst [vmem:[%s4476_s18 + $0x220] sm:$0xff] %v364_v4  ;;  %v368_v6 = vld [vmem:[%s4471_s24 + $0x460] sm:$0xff]  ;;  %v370_v7 = vld [vmem:[%s4471_s24 + $0x468] sm:$0xff]  ;;  %367 = vst [vmem:[%s4476_s18 + $0x228] sm:$0xff] %v366_v5 }
  0x61   : > { %369 = vst [vmem:[%s4476_s18 + $0x230] sm:$0xff] %v368_v6  ;;  %371 = vst [vmem:[%s4476_s18 + $0x238] sm:$0xff] %v370_v7  ;;  %v372_v8 = vld [vmem:[%s4471_s24 + $0x480] sm:$0xff]  ;;  %v374_v9 = vld [vmem:[%s4471_s24 + $0x488] sm:$0xff] }
  0x62   : > { %v376_v10 = vld [vmem:[%s4471_s24 + $0x4a0] sm:$0xff]  ;;  %373 = vst [vmem:[%s4476_s18 + $0x240] sm:$0xff] %v372_v8  ;;  %375 = vst [vmem:[%s4476_s18 + $0x248] sm:$0xff] %v374_v9  ;;  %v378_v11 = vld [vmem:[%s4471_s24 + $0x4a8] sm:$0xff] }
  0x63   : > { %377 = vst [vmem:[%s4476_s18 + $0x250] sm:$0xff] %v376_v10  ;;  %v380_v12 = vld [vmem:[%s4471_s24 + $0x4c0] sm:$0xff]  ;;  %v382_v13 = vld [vmem:[%s4471_s24 + $0x4c8] sm:$0xff]  ;;  %379 = vst [vmem:[%s4476_s18 + $0x258] sm:$0xff] %v378_v11 }
  0x64   : > { %381 = vst [vmem:[%s4476_s18 + $0x260] sm:$0xff] %v380_v12  ;;  %383 = vst [vmem:[%s4476_s18 + $0x268] sm:$0xff] %v382_v13  ;;  %v384_v14 = vld [vmem:[%s4471_s24 + $0x4e0] sm:$0xff]  ;;  %v386_v15 = vld [vmem:[%s4471_s24 + $0x4e8] sm:$0xff] }
  0x65   : > { %v388_v16 = vld [vmem:[%s4471_s24 + $0x500] sm:$0xff]  ;;  %385 = vst [vmem:[%s4476_s18 + $0x270] sm:$0xff] %v384_v14  ;;  %387 = vst [vmem:[%s4476_s18 + $0x278] sm:$0xff] %v386_v15  ;;  %v390_v17 = vld [vmem:[%s4471_s24 + $0x508] sm:$0xff] }
  0x66   : > { %389 = vst [vmem:[%s4476_s18 + $0x280] sm:$0xff] %v388_v16  ;;  %v392_v18 = vld [vmem:[%s4471_s24 + $0x520] sm:$0xff]  ;;  %v394_v19 = vld [vmem:[%s4471_s24 + $0x528] sm:$0xff]  ;;  %391 = vst [vmem:[%s4476_s18 + $0x288] sm:$0xff] %v390_v17 }
  0x67   : > { %393 = vst [vmem:[%s4476_s18 + $0x290] sm:$0xff] %v392_v18  ;;  %395 = vst [vmem:[%s4476_s18 + $0x298] sm:$0xff] %v394_v19  ;;  %v396_v20 = vld [vmem:[%s4471_s24 + $0x540] sm:$0xff]  ;;  %v398_v21 = vld [vmem:[%s4471_s24 + $0x548] sm:$0xff] }
  0x68   : > { %v400_v22 = vld [vmem:[%s4471_s24 + $0x560] sm:$0xff]  ;;  %397 = vst [vmem:[%s4476_s18 + $0x2a0] sm:$0xff] %v396_v20  ;;  %399 = vst [vmem:[%s4476_s18 + $0x2a8] sm:$0xff] %v398_v21  ;;  %v402_v23 = vld [vmem:[%s4471_s24 + $0x568] sm:$0xff] }
  0x69   : > { %401 = vst [vmem:[%s4476_s18 + $0x2b0] sm:$0xff] %v400_v22  ;;  %v404_v24 = vld [vmem:[%s4471_s24 + $0x580] sm:$0xff]  ;;  %v406_v25 = vld [vmem:[%s4471_s24 + $0x588] sm:$0xff]  ;;  %403 = vst [vmem:[%s4476_s18 + $0x2b8] sm:$0xff] %v402_v23 }
  0x6a   : > { %405 = vst [vmem:[%s4476_s18 + $0x2c0] sm:$0xff] %v404_v24  ;;  %407 = vst [vmem:[%s4476_s18 + $0x2c8] sm:$0xff] %v406_v25  ;;  %v408_v26 = vld [vmem:[%s4471_s24 + $0x5a0] sm:$0xff]  ;;  %v410_v27 = vld [vmem:[%s4471_s24 + $0x5a8] sm:$0xff] }
  0x6b   : > { %v412_v28 = vld [vmem:[%s4471_s24 + $0x5c0] sm:$0xff]  ;;  %409 = vst [vmem:[%s4476_s18 + $0x2d0] sm:$0xff] %v408_v26  ;;  %411 = vst [vmem:[%s4476_s18 + $0x2d8] sm:$0xff] %v410_v27  ;;  %v414_v29 = vld [vmem:[%s4471_s24 + $0x5c8] sm:$0xff] }
  0x6c   : > { %413 = vst [vmem:[%s4476_s18 + $0x2e0] sm:$0xff] %v412_v28  ;;  %v416_v30 = vld [vmem:[%s4471_s24 + $0x5e0] sm:$0xff]  ;;  %v418_v31 = vld [vmem:[%s4471_s24 + $0x5e8] sm:$0xff]  ;;  %415 = vst [vmem:[%s4476_s18 + $0x2e8] sm:$0xff] %v414_v29 }
  0x6d   : > { %417 = vst [vmem:[%s4476_s18 + $0x2f0] sm:$0xff] %v416_v30  ;;  %419 = vst [vmem:[%s4476_s18 + $0x2f8] sm:$0xff] %v418_v31  ;;  %v420_v32 = vld [vmem:[%s4471_s24 + $0x600] sm:$0xff]  ;;  %v422_v33 = vld [vmem:[%s4471_s24 + $0x608] sm:$0xff] }
  0x6e   : > { %v424_v34 = vld [vmem:[%s4471_s24 + $0x620] sm:$0xff]  ;;  %421 = vst [vmem:[%s4476_s18 + $0x300] sm:$0xff] %v420_v32  ;;  %423 = vst [vmem:[%s4476_s18 + $0x308] sm:$0xff] %v422_v33  ;;  %v426_v35 = vld [vmem:[%s4471_s24 + $0x628] sm:$0xff] }
  0x6f   : > { %425 = vst [vmem:[%s4476_s18 + $0x310] sm:$0xff] %v424_v34  ;;  %v428_v36 = vld [vmem:[%s4471_s24 + $0x640] sm:$0xff]  ;;  %v430_v37 = vld [vmem:[%s4471_s24 + $0x648] sm:$0xff]  ;;  %427 = vst [vmem:[%s4476_s18 + $0x318] sm:$0xff] %v426_v35 }
  0x70   : > { %429 = vst [vmem:[%s4476_s18 + $0x320] sm:$0xff] %v428_v36  ;;  %431 = vst [vmem:[%s4476_s18 + $0x328] sm:$0xff] %v430_v37  ;;  %v432_v38 = vld [vmem:[%s4471_s24 + $0x660] sm:$0xff]  ;;  %v434_v39 = vld [vmem:[%s4471_s24 + $0x668] sm:$0xff] }
  0x71   : > { %v436_v40 = vld [vmem:[%s4471_s24 + $0x680] sm:$0xff]  ;;  %433 = vst [vmem:[%s4476_s18 + $0x330] sm:$0xff] %v432_v38  ;;  %435 = vst [vmem:[%s4476_s18 + $0x338] sm:$0xff] %v434_v39  ;;  %v438_v41 = vld [vmem:[%s4471_s24 + $0x688] sm:$0xff] }
  0x72   : > { %437 = vst [vmem:[%s4476_s18 + $0x340] sm:$0xff] %v436_v40  ;;  %v440_v42 = vld [vmem:[%s4471_s24 + $0x6a0] sm:$0xff]  ;;  %v442_v43 = vld [vmem:[%s4471_s24 + $0x6a8] sm:$0xff]  ;;  %439 = vst [vmem:[%s4476_s18 + $0x348] sm:$0xff] %v438_v41 }
  0x73   : > { %441 = vst [vmem:[%s4476_s18 + $0x350] sm:$0xff] %v440_v42  ;;  %443 = vst [vmem:[%s4476_s18 + $0x358] sm:$0xff] %v442_v43  ;;  %v444_v44 = vld [vmem:[%s4471_s24 + $0x6c0] sm:$0xff]  ;;  %v446_v45 = vld [vmem:[%s4471_s24 + $0x6c8] sm:$0xff] }
  0x74   : > { %v448_v46 = vld [vmem:[%s4471_s24 + $0x6e0] sm:$0xff]  ;;  %445 = vst [vmem:[%s4476_s18 + $0x360] sm:$0xff] %v444_v44  ;;  %447 = vst [vmem:[%s4476_s18 + $0x368] sm:$0xff] %v446_v45  ;;  %v450_v47 = vld [vmem:[%s4471_s24 + $0x6e8] sm:$0xff] }
  0x75   : > { %449 = vst [vmem:[%s4476_s18 + $0x370] sm:$0xff] %v448_v46  ;;  %v452_v48 = vld [vmem:[%s4471_s24 + $0x700] sm:$0xff]  ;;  %v454_v49 = vld [vmem:[%s4471_s24 + $0x708] sm:$0xff]  ;;  %451 = vst [vmem:[%s4476_s18 + $0x378] sm:$0xff] %v450_v47 }
  0x76   : > { %453 = vst [vmem:[%s4476_s18 + $0x380] sm:$0xff] %v452_v48  ;;  %455 = vst [vmem:[%s4476_s18 + $0x388] sm:$0xff] %v454_v49  ;;  %v456_v50 = vld [vmem:[%s4471_s24 + $0x720] sm:$0xff]  ;;  %v458_v51 = vld [vmem:[%s4471_s24 + $0x728] sm:$0xff] }
  0x77   : > { %v460_v52 = vld [vmem:[%s4471_s24 + $0x740] sm:$0xff]  ;;  %457 = vst [vmem:[%s4476_s18 + $0x390] sm:$0xff] %v456_v50  ;;  %459 = vst [vmem:[%s4476_s18 + $0x398] sm:$0xff] %v458_v51  ;;  %v462_v53 = vld [vmem:[%s4471_s24 + $0x748] sm:$0xff] }
  0x78   : > { %461 = vst [vmem:[%s4476_s18 + $0x3a0] sm:$0xff] %v460_v52  ;;  %v464_v54 = vld [vmem:[%s4471_s24 + $0x760] sm:$0xff]  ;;  %v466_v55 = vld [vmem:[%s4471_s24 + $0x768] sm:$0xff]  ;;  %463 = vst [vmem:[%s4476_s18 + $0x3a8] sm:$0xff] %v462_v53 }
  0x79   : > { %465 = vst [vmem:[%s4476_s18 + $0x3b0] sm:$0xff] %v464_v54  ;;  %467 = vst [vmem:[%s4476_s18 + $0x3b8] sm:$0xff] %v466_v55  ;;  %v468_v56 = vld [vmem:[%s4471_s24 + $0x780] sm:$0xff]  ;;  %v470_v57 = vld [vmem:[%s4471_s24 + $0x788] sm:$0xff] }
  0x7a   : > { %v472_v58 = vld [vmem:[%s4471_s24 + $0x7a0] sm:$0xff]  ;;  %469 = vst [vmem:[%s4476_s18 + $0x3c0] sm:$0xff] %v468_v56  ;;  %471 = vst [vmem:[%s4476_s18 + $0x3c8] sm:$0xff] %v470_v57  ;;  %v474_v59 = vld [vmem:[%s4471_s24 + $0x7a8] sm:$0xff] }
  0x7b   : > { %473 = vst [vmem:[%s4476_s18 + $0x3d0] sm:$0xff] %v472_v58  ;;  %v476_v60 = vld [vmem:[%s4471_s24 + $0x7c0] sm:$0xff]  ;;  %v478_v61 = vld [vmem:[%s4471_s24 + $0x7c8] sm:$0xff]  ;;  %475 = vst [vmem:[%s4476_s18 + $0x3d8] sm:$0xff] %v474_v59 }
  0x7c   : > { %477 = vst [vmem:[%s4476_s18 + $0x3e0] sm:$0xff] %v476_v60  ;;  %479 = vst [vmem:[%s4476_s18 + $0x3e8] sm:$0xff] %v478_v61  ;;  %v480_v62 = vld [vmem:[%s4471_s24 + $0x7e0] sm:$0xff]  ;;  %v482_v63 = vld [vmem:[%s4471_s24 + $0x7e8] sm:$0xff] }
  0x7d   : > { %481 = vst [vmem:[%s4476_s18 + $0x3f0] sm:$0xff] %v480_v62  ;;  %483 = vst [vmem:[%s4476_s18 + $0x3f8] sm:$0xff] %v482_v63 }
  0x7e PF: > { %p3352_p3 = scmp.ge.s32.totalorder %s4361_s11, 1  ;;  %p488_p4 = scmp.lt.s32.totalorder %s4361_s11, 5 }
  0x80   : > { %p489_p5 = pnand %p3352_p3, %p488_p4 }
  0x81   : > { %s495_s25 = sand.u32 (!%p489_p5), 1, %s4337_s1   ;;  %s3354_s26 = sshll.u32 (!%p489_p5), %s4349_s8, 6 }
  0x82   : > { %492 = sbr.rel (%p489_p5) target bundleno = 1011 (0x3f3), region = 55  ;;  %s3353_s27 = sshll.u32 (!%p489_p5), %s495_s25, 10 }
  0x83   : > { %p531_p6 = scmp.lt.s32.totalorder (!%p489_p5), %s3354_s26, 127  ;;  %s4740_s16 = scalar_lea.vmem (!%p489_p5), [#allocation6], %s3353_s27 }
  0x84   : > { %p3356_p7 = scmp.ne.s32.totalorder (!%p489_p5), %s4345_s7, 0 }
  0x87   : > { %s5176_s26 = smov (!%p531_p6, %s3354_s26), 127  ;;  %540 = sbr.rel (%p3356_p7) target bundleno = 173 (0xad), region = 63 }
  0x88   : > { %s3355_s28 = sshll.u32 %s5176_s26, 2 }
  0x89   : > { %s4738_s15 = scalar_lea.vmem %s5161_s6, %s3355_s28 }
  0x8c   : > { %v4365_v0 = vmov 0.0  }
  0x8d   : > { %541 = vst [vmem:[#allocation2 + $0xb0] sm:$0xff] %v4365_v0  ;;  %542 = vst [vmem:[#allocation2 + $0x1b0] sm:$0xff] %v4365_v0 }
  0x8e   : > { %543 = vst [vmem:[#allocation2 + $0xd8] sm:$0xff] %v4365_v0  ;;  %544 = vst [vmem:[#allocation2 + $0x18] sm:$0xff] %v4365_v0 }
  0x8f   : > { %545 = vst [vmem:[#allocation2 + $0x50] sm:$0xff] %v4365_v0  ;;  %546 = vst [vmem:[#allocation2 + $0x168] sm:$0xff] %v4365_v0 }
  0x90   : > { %547 = vst [vmem:[#allocation2 + $0x130] sm:$0xff] %v4365_v0  ;;  %548 = vst [vmem:[#allocation2 + $0x48] sm:$0xff] %v4365_v0 }
  0x91   : > { %549 = vst [vmem:[#allocation2 + $0x180] sm:$0xff] %v4365_v0  ;;  %550 = vst [vmem:[#allocation2 + $0x110] sm:$0xff] %v4365_v0 }
  0x92   : > { %551 = vst [vmem:[#allocation2 + $0x118] sm:$0xff] %v4365_v0  ;;  %552 = vst [vmem:[#allocation2 + $0x98] sm:$0xff] %v4365_v0 }
  0x93   : > { %553 = vst [vmem:[#allocation2 + $0x120] sm:$0xff] %v4365_v0  ;;  %554 = vst [vmem:[#allocation2 + $0x150] sm:$0xff] %v4365_v0 }
  0x94   : > { %555 = vst [vmem:[#allocation2 + $0x108] sm:$0xff] %v4365_v0  ;;  %556 = vst [vmem:[#allocation2 + $0x60] sm:$0xff] %v4365_v0 }
  0x95   : > { %557 = vst [vmem:[#allocation2 + $0xe0] sm:$0xff] %v4365_v0  ;;  %558 = vst [vmem:[#allocation2 + $0x188] sm:$0xff] %v4365_v0 }
  0x96   : > { %559 = vst [vmem:[#allocation2 + $0x138] sm:$0xff] %v4365_v0  ;;  %560 = vst [vmem:[#allocation2 + $0x140] sm:$0xff] %v4365_v0 }
  0x97   : > { %561 = vst [vmem:[#allocation2 + $0x80] sm:$0xff] %v4365_v0  ;;  %562 = vst [vmem:[#allocation2 + $0x1a8] sm:$0xff] %v4365_v0 }
  0x98   : > { %563 = vst [vmem:[#allocation2 + $0x1b8] sm:$0xff] %v4365_v0  ;;  %564 = vst [vmem:[#allocation2 + $0x28] sm:$0xff] %v4365_v0 }
  0x99   : > { %565 = vst [vmem:[#allocation2 + $0x1e8] sm:$0xff] %v4365_v0  ;;  %566 = vst [vmem:[#allocation2 + $0xf8] sm:$0xff] %v4365_v0 }
  0x9a   : > { %567 = vst [vmem:[#allocation2 + $0x160] sm:$0xff] %v4365_v0  ;;  %568 = vst [vmem:[#allocation2 + $0x30] sm:$0xff] %v4365_v0 }
  0x9b   : > { %569 = vst [vmem:[#allocation2 + $0x1e0] sm:$0xff] %v4365_v0  ;;  %570 = vst [vmem:[#allocation2] sm:$0xff] %v4365_v0 }
  0x9c   : > { %571 = vst [vmem:[#allocation2 + $0xf0] sm:$0xff] %v4365_v0  ;;  %572 = vst [vmem:[#allocation2 + $0x8] sm:$0xff] %v4365_v0 }
  0x9d   : > { %573 = vst [vmem:[#allocation2 + $0x148] sm:$0xff] %v4365_v0  ;;  %574 = vst [vmem:[#allocation2 + $0x1d0] sm:$0xff] %v4365_v0 }
  0x9e   : > { %575 = vst [vmem:[#allocation2 + $0x100] sm:$0xff] %v4365_v0  ;;  %576 = vst [vmem:[#allocation2 + $0xc8] sm:$0xff] %v4365_v0 }
  0x9f   : > { %577 = vst [vmem:[#allocation2 + $0x40] sm:$0xff] %v4365_v0  ;;  %578 = vst [vmem:[#allocation2 + $0x1f8] sm:$0xff] %v4365_v0 }
  0xa0   : > { %579 = vst [vmem:[#allocation2 + $0x20] sm:$0xff] %v4365_v0  ;;  %580 = vst [vmem:[#allocation2 + $0x128] sm:$0xff] %v4365_v0 }
  0xa1   : > { %581 = vst [vmem:[#allocation2 + $0x1a0] sm:$0xff] %v4365_v0  ;;  %582 = vst [vmem:[#allocation2 + $0x1f0] sm:$0xff] %v4365_v0 }
  0xa2   : > { %583 = vst [vmem:[#allocation2 + $0xe8] sm:$0xff] %v4365_v0  ;;  %584 = vst [vmem:[#allocation2 + $0x78] sm:$0xff] %v4365_v0 }
  0xa3   : > { %585 = vst [vmem:[#allocation2 + $0x70] sm:$0xff] %v4365_v0  ;;  %586 = vst [vmem:[#allocation2 + $0x90] sm:$0xff] %v4365_v0 }
  0xa4   : > { %587 = vst [vmem:[#allocation2 + $0x1d8] sm:$0xff] %v4365_v0  ;;  %588 = vst [vmem:[#allocation2 + $0xd0] sm:$0xff] %v4365_v0 }
  0xa5   : > { %589 = vst [vmem:[#allocation2 + $0xb8] sm:$0xff] %v4365_v0  ;;  %590 = vst [vmem:[#allocation2 + $0x88] sm:$0xff] %v4365_v0 }
  0xa6   : > { %591 = vst [vmem:[#allocation2 + $0xa8] sm:$0xff] %v4365_v0  ;;  %592 = vst [vmem:[#allocation2 + $0x1c8] sm:$0xff] %v4365_v0 }
  0xa7   : > { %593 = vst [vmem:[#allocation2 + $0x170] sm:$0xff] %v4365_v0  ;;  %594 = vst [vmem:[#allocation2 + $0x178] sm:$0xff] %v4365_v0 }
  0xa8   : > { %595 = vst [vmem:[#allocation2 + $0x68] sm:$0xff] %v4365_v0  ;;  %596 = vst [vmem:[#allocation2 + $0x190] sm:$0xff] %v4365_v0 }
  0xa9   : > { %597 = vst [vmem:[#allocation2 + $0x198] sm:$0xff] %v4365_v0  ;;  %598 = vst [vmem:[#allocation2 + $0x38] sm:$0xff] %v4365_v0 }
  0xaa   : > { %599 = vst [vmem:[#allocation2 + $0xc0] sm:$0xff] %v4365_v0  ;;  %600 = vst [vmem:[#allocation2 + $0x1c0] sm:$0xff] %v4365_v0 }
  0xab   : > { %601 = vst [vmem:[#allocation2 + $0x158] sm:$0xff] %v4365_v0  ;;  %602 = vst [vmem:[#allocation2 + $0x10] sm:$0xff] %v4365_v0 }
  0xac   : > { %603 = vst [vmem:[#allocation2 + $0x58] sm:$0xff] %v4365_v0  ;;  %604 = vst [vmem:[#allocation2 + $0xa0] sm:$0xff] %v4365_v0 }
  0xad PF: > { %s605_s1 = sld [smem:[#allocation5 + %s4349_s8]] }
  0xb3   : > { %p3357_p8 = scmp.ge.s32.totalorder %s4345_s7, %s605_s1 }
  0xb4   : > { %s610_s17 = sshra.s32 (!%p3357_p8), %s4345_s7, 7  ;;  %s615_s19 = sand.u32 (!%p3357_p8), 127, %s4345_s7 }
  0xb5   : > { %609 = sbr.rel (%p3357_p8) target bundleno = 709 (0x2c5), region = 67  ;;  %s612_s20 = sadd.s32 (!%p3357_p8), %s4349_s8, %s610_s17 }
  0xb6   : > { %s3358_s22 = sshll.u32 (!%p3357_p8), %s612_s20, 7 }
  0xb7   : > { %s616_s23 = sadd.s32 (!%p3357_p8), %s3358_s22, %s615_s19 }
  0xb8   : > { %s617_s21 = sld [smem:[#allocation4 + %s616_s23]] (!%p3357_p8) }
  0xba   : > { %v4366_v1 = vmov 0   ;;  %v4083_v2 = vld [vmem:[%s4740_s16 + $0x4] ss:$16 sps:$4 sm:$0xff]   ;;  %v4086_v3 = vld [vmem:[%s4740_s16 + $0xc] ss:$16 sps:$4 sm:$0xff]  }
  0xbb   : > { %1711 = vmatprep.subr.bf16.mxu0 %v4366_v1  ;;  %2000 = vmatprep.subr.bf16.mxu1 %v4366_v1  ;;  %v4081_v36 = vld [vmem:[%s4740_s16] ss:$16 sps:$4 sm:$0xff]   ;;  %v4084_v37 = vld [vmem:[%s4740_s16 + $0x8] ss:$16 sps:$4 sm:$0xff]   ;;  %v4087_v38 = vld [vmem:[%s4740_s16 + $0x24] ss:$16 sps:$4 sm:$0xff]  }
  0xbc   : > { %1743 = vmatprep.mubr.bf16.mxu0 %v4083_v2  ;;  %2032 = vmatprep.mubr.bf16.mxu1 %v4086_v3  ;;  %v4089_v39 = vld [vmem:[%s4740_s16 + $0x2c] ss:$16 sps:$4 sm:$0xff]   ;;  %v4091_v40 = vld [vmem:[%s4740_s16 + $0x20] ss:$16 sps:$4 sm:$0xff]   ;;  %v4092_v41 = vld [vmem:[%s4740_s16 + $0x28] ss:$16 sps:$4 sm:$0xff]  }
  0xbd   : > { %v4093_v42 = vld [vmem:[%s4740_s16 + $0x44] ss:$16 sps:$4 sm:$0xff]   ;;  %v4095_v43 = vld [vmem:[%s4740_s16 + $0x4c] ss:$16 sps:$4 sm:$0xff]   ;;  %v4097_v44 = vld [vmem:[%s4740_s16 + $0x40] ss:$16 sps:$4 sm:$0xff]  }
  0xbe   : > { %s3359_s24 = sshll.u32 %s617_s21, 9  ;;  %v4098_v45 = vld [vmem:[%s4740_s16 + $0x48] ss:$16 sps:$4 sm:$0xff]   ;;  %v4099_v46 = vld [vmem:[%s4740_s16 + $0x64] ss:$16 sps:$4 sm:$0xff]  }
  0xbf   : > { %s619_s18 = sshra.s32 %s3359_s24, 3  ;;  %v4101_v47 = vld [vmem:[%s4740_s16 + $0x6c] ss:$16 sps:$4 sm:$0xff]   ;;  %v4103_v48 = vld [vmem:[%s4740_s16 + $0x60] ss:$16 sps:$4 sm:$0xff]  }
  0xc0   : > { %s3360_s25 = sshll.u32 %s619_s18, 2  ;;  %v4104_v49 = vld [vmem:[%s4740_s16 + $0x68] ss:$16 sps:$4 sm:$0xff]   ;;  %v4105_v50 = vld [vmem:[%s4740_s16 + $0x84] ss:$16 sps:$4 sm:$0xff]  }
  0xc1   : > { %s4819_s28 = scalar_lea.vmem %s5158_s3, %s3360_s25  ;;  %v4107_v51 = vld [vmem:[%s4740_s16 + $0x8c] ss:$16 sps:$4 sm:$0xff]   ;;  %v4109_v52 = vld [vmem:[%s4740_s16 + $0x80] ss:$16 sps:$4 sm:$0xff]   ;;  %v4110_v53 = vld [vmem:[%s4740_s16 + $0x88] ss:$16 sps:$4 sm:$0xff]  }
  0xc2   : > { %v4049_v4 = vld [vmem:[%s4819_s28 + $0x38] sm:$0xff]   ;;  %v4051_v6 = vld [vmem:[%s4819_s28 + $0x30] sm:$0xff]   ;;  %v4053_v8 = vld [vmem:[%s4819_s28 + $0x28] sm:$0xff]  }
  0xc3   : > { %v4050_v5 = vld [vmem:[%s4819_s28 + $0xb8] sm:$0xff]   ;;  %1712 = vmatpush1.bf16.msra.mxu0 %v4049_v4  ;;  %v4052_v7 = vld [vmem:[%s4819_s28 + $0xb0] sm:$0xff]   ;;  %v4054_v9 = vld [vmem:[%s4819_s28 + $0xa8] sm:$0xff]  }
  0xc4   : > { %2001 = vmatpush1.bf16.msra.mxu1 %v4050_v5  ;;  %1713 = vmatprep.subr.bf16.mxu0 %v4366_v1  ;;  %v4055_v10 = vld [vmem:[%s4819_s28 + $0x20] sm:$0xff]   ;;  %v4057_v12 = vld [vmem:[%s4819_s28 + $0x18] sm:$0xff]   ;;  %v4059_v14 = vld [vmem:[%s4819_s28 + $0x10] sm:$0xff]  }
  0xc5   : > { %2002 = vmatprep.subr.bf16.mxu1 %v4366_v1  ;;  %v4056_v11 = vld [vmem:[%s4819_s28 + $0xa0] sm:$0xff]   ;;  %v4058_v13 = vld [vmem:[%s4819_s28 + $0x98] sm:$0xff]   ;;  %v4060_v15 = vld [vmem:[%s4819_s28 + $0x90] sm:$0xff]  }
  0xc6   : > { %v4061_v16 = vld [vmem:[%s4819_s28 + $0x8] sm:$0xff]   ;;  %v4063_v18 = vld [vmem:[%s4819_s28] sm:$0xff]   ;;  %v4065_v20 = vld [vmem:[%s4819_s28 + $0x78] sm:$0xff]  }
  0xc7   : > { %1714 = vmatpush1.bf16.msra.mxu0 %v4051_v6  ;;  %v4062_v17 = vld [vmem:[%s4819_s28 + $0x88] sm:$0xff]   ;;  %v4064_v19 = vld [vmem:[%s4819_s28 + $0x80] sm:$0xff]   ;;  %v4066_v21 = vld [vmem:[%s4819_s28 + $0xf8] sm:$0xff]  }
  0xc8   : > { %2003 = vmatpush1.bf16.msra.mxu1 %v4052_v7  ;;  %1715 = vmatprep.subr.bf16.mxu0 %v4366_v1  ;;  %v4067_v22 = vld [vmem:[%s4819_s28 + $0x70] sm:$0xff]   ;;  %v4069_v24 = vld [vmem:[%s4819_s28 + $0x68] sm:$0xff]   ;;  %v4071_v26 = vld [vmem:[%s4819_s28 + $0x60] sm:$0xff]  }
  0xc9   : > { %2004 = vmatprep.subr.bf16.mxu1 %v4366_v1  ;;  %v4068_v23 = vld [vmem:[%s4819_s28 + $0xf0] sm:$0xff]   ;;  %v4070_v25 = vld [vmem:[%s4819_s28 + $0xe8] sm:$0xff]   ;;  %v4072_v27 = vld [vmem:[%s4819_s28 + $0xe0] sm:$0xff]  }
  0xca   : > { %v4073_v28 = vld [vmem:[%s4819_s28 + $0x58] sm:$0xff]   ;;  %v4075_v30 = vld [vmem:[%s4819_s28 + $0x50] sm:$0xff]   ;;  %v4077_v32 = vld [vmem:[%s4819_s28 + $0x48] sm:$0xff]  }
  0xcb   : > { %1716 = vmatpush1.bf16.msra.mxu0 %v4053_v8  ;;  %v4074_v29 = vld [vmem:[%s4819_s28 + $0xd8] sm:$0xff]   ;;  %v4076_v31 = vld [vmem:[%s4819_s28 + $0xd0] sm:$0xff]   ;;  %v4078_v33 = vld [vmem:[%s4819_s28 + $0xc8] sm:$0xff]  }
  0xcc   : > { %2005 = vmatpush1.bf16.msra.mxu1 %v4054_v9  ;;  %1717 = vmatprep.subr.bf16.mxu0 %v4366_v1  ;;  %v4079_v34 = vld [vmem:[%s4819_s28 + $0x40] sm:$0xff]   ;;  %v4113_v55 = vld [vmem:[%s4740_s16 + $0xac] ss:$16 sps:$4 sm:$0xff]   ;;  %v4116_v57 = vld [vmem:[%s4740_s16 + $0xa8] ss:$16 sps:$4 sm:$0xff]  }
  0xcd   : > { %2006 = vmatprep.subr.bf16.mxu1 %v4366_v1  ;;  %v4080_v35 = vld [vmem:[%s4819_s28 + $0xc0] sm:$0xff]   ;;  %v4119_v59 = vld [vmem:[%s4740_s16 + $0xcc] ss:$16 sps:$4 sm:$0xff]   ;;  %v4122_v61 = vld [vmem:[%s4740_s16 + $0xc8] ss:$16 sps:$4 sm:$0xff]  }
  0xce   : > { %v4111_v54 = vld [vmem:[%s4740_s16 + $0xa4] ss:$16 sps:$4 sm:$0xff]   ;;  %v4115_v56 = vld [vmem:[%s4740_s16 + $0xa0] ss:$16 sps:$4 sm:$0xff]   ;;  %v4125_v63 = vld [vmem:[%s4740_s16 + $0xec] ss:$16 sps:$4 sm:$0xff]  }
  0xcf   : > { %1718 = vmatpush1.bf16.msra.mxu0 %v4055_v10  ;;  %v4117_v58 = vld [vmem:[%s4740_s16 + $0xc4] ss:$16 sps:$4 sm:$0xff]   ;;  %v4121_v60 = vld [vmem:[%s4740_s16 + $0xc0] ss:$16 sps:$4 sm:$0xff]   ;;  %v4131_v3 = vld [vmem:[%s4740_s16 + $0x10c] ss:$16 sps:$4 sm:$0xff]  }
  0xd0   : > { %2007 = vmatpush1.bf16.msra.mxu1 %v4056_v11  ;;  %1719 = vmatprep.subr.bf16.mxu0 %v4366_v1  ;;  %v4123_v62 = vld [vmem:[%s4740_s16 + $0xe4] ss:$16 sps:$4 sm:$0xff]   ;;  %v4127_v0 = vld [vmem:[%s4740_s16 + $0xe0] ss:$16 sps:$4 sm:$0xff]   ;;  %v4134_v5 = vld [vmem:[%s4740_s16 + $0x108] ss:$16 sps:$4 sm:$0xff]  }
  0xd1   : > { %2008 = vmatprep.subr.bf16.mxu1 %v4366_v1  ;;  %v4129_v2 = vld [vmem:[%s4740_s16 + $0x104] ss:$16 sps:$4 sm:$0xff]   ;;  %v4133_v4 = vld [vmem:[%s4740_s16 + $0x100] ss:$16 sps:$4 sm:$0xff]   ;;  %v4137_v7 = vld [vmem:[%s4740_s16 + $0x12c] ss:$16 sps:$4 sm:$0xff]  }
  0xd2   : > { %v4135_v6 = vld [vmem:[%s4740_s16 + $0x124] ss:$16 sps:$4 sm:$0xff]   ;;  %v4139_v8 = vld [vmem:[%s4740_s16 + $0x120] ss:$16 sps:$4 sm:$0xff]   ;;  %v4140_v9 = vld [vmem:[%s4740_s16 + $0x128] ss:$16 sps:$4 sm:$0xff]  }
  0xd3   : > { %1720 = vmatpush1.bf16.msra.mxu0 %v4057_v12  ;;  %v4141_v10 = vld [vmem:[%s4740_s16 + $0x144] ss:$16 sps:$4 sm:$0xff]   ;;  %v4143_v11 = vld [vmem:[%s4740_s16 + $0x14c] ss:$16 sps:$4 sm:$0xff]   ;;  %v4145_v12 = vld [vmem:[%s4740_s16 + $0x140] ss:$16 sps:$4 sm:$0xff]  }
  0xd4   : > { %2009 = vmatpush1.bf16.msra.mxu1 %v4058_v13  ;;  %1721 = vmatprep.subr.bf16.mxu0 %v4366_v1  ;;  %v4146_v13 = vld [vmem:[%s4740_s16 + $0x148] ss:$16 sps:$4 sm:$0xff]  }
  0xd5   : > { %2010 = vmatprep.subr.bf16.mxu1 %v4366_v1 }
  0xd7   : > { %1722 = vmatpush1.bf16.msra.mxu0 %v4059_v14  ;;  %v4147_v14 = vld [vmem:[%s4740_s16 + $0x164] ss:$16 sps:$4 sm:$0xff]  }
  0xd8   : > { %2011 = vmatpush1.bf16.msra.mxu1 %v4060_v15  ;;  %1723 = vmatprep.subr.bf16.mxu0 %v4366_v1  ;;  %v4149_v15 = vld [vmem:[%s4740_s16 + $0x16c] ss:$16 sps:$4 sm:$0xff]  }
  0xd9   : > { %2012 = vmatprep.subr.bf16.mxu1 %v4366_v1 }
  0xdb   : > { %1724 = vmatpush1.bf16.msra.mxu0 %v4061_v16  ;;  %v4151_v16 = vld [vmem:[%s4740_s16 + $0x160] ss:$16 sps:$4 sm:$0xff]  }
  0xdc   : > { %2013 = vmatpush1.bf16.msra.mxu1 %v4062_v17  ;;  %1725 = vmatprep.subr.bf16.mxu0 %v4366_v1  ;;  %v4152_v17 = vld [vmem:[%s4740_s16 + $0x168] ss:$16 sps:$4 sm:$0xff]  }
  0xdd   : > { %2014 = vmatprep.subr.bf16.mxu1 %v4366_v1 }
  0xdf   : > { %1726 = vmatpush1.bf16.msra.mxu0 %v4063_v18  ;;  %v4153_v18 = vld [vmem:[%s4740_s16 + $0x184] ss:$16 sps:$4 sm:$0xff]  }
  0xe0   : > { %2015 = vmatpush1.bf16.msra.mxu1 %v4064_v19  ;;  %1727 = vmatprep.subr.bf16.mxu0 %v4366_v1  ;;  %v4155_v19 = vld [vmem:[%s4740_s16 + $0x18c] ss:$16 sps:$4 sm:$0xff]  }
  0xe1   : > { %2016 = vmatprep.subr.bf16.mxu1 %v4366_v1 }
  0xe3   : > { %1728 = vmatpush2.bf16.msra.mxu0 %v4065_v20  ;;  %v4157_v20 = vld [vmem:[%s4740_s16 + $0x180] ss:$16 sps:$4 sm:$0xff]  }
  0xe4   : > { %2017 = vmatpush2.bf16.msra.mxu1 %v4066_v21  ;;  %1729 = vmatprep.subr.bf16.mxu0 %v4366_v1  ;;  %v4158_v21 = vld [vmem:[%s4740_s16 + $0x188] ss:$16 sps:$4 sm:$0xff]  }
  0xe5   : > { %2018 = vmatprep.subr.bf16.mxu1 %v4366_v1 }
  0xe7   : > { %1730 = vmatpush2.bf16.msra.mxu0 %v4067_v22  ;;  %v4159_v22 = vld [vmem:[%s4740_s16 + $0x1a4] ss:$16 sps:$4 sm:$0xff]  }
  0xe8   : > { %2019 = vmatpush2.bf16.msra.mxu1 %v4068_v23  ;;  %1731 = vmatprep.subr.bf16.mxu0 %v4366_v1  ;;  %v4161_v23 = vld [vmem:[%s4740_s16 + $0x1ac] ss:$16 sps:$4 sm:$0xff]  }
  0xe9   : > { %2020 = vmatprep.subr.bf16.mxu1 %v4366_v1 }
  0xeb   : > { %1732 = vmatpush2.bf16.msra.mxu0 %v4069_v24  ;;  %v4163_v24 = vld [vmem:[%s4740_s16 + $0x1a0] ss:$16 sps:$4 sm:$0xff]  }
  0xec   : > { %2021 = vmatpush2.bf16.msra.mxu1 %v4070_v25  ;;  %1733 = vmatprep.subr.bf16.mxu0 %v4366_v1  ;;  %v4164_v25 = vld [vmem:[%s4740_s16 + $0x1a8] ss:$16 sps:$4 sm:$0xff]  }
  0xed   : > { %2022 = vmatprep.subr.bf16.mxu1 %v4366_v1 }
  0xef   : > { %1734 = vmatpush2.bf16.msra.mxu0 %v4071_v26  ;;  %v4165_v26 = vld [vmem:[%s4740_s16 + $0x1c4] ss:$16 sps:$4 sm:$0xff]  }
  0xf0   : > { %2023 = vmatpush2.bf16.msra.mxu1 %v4072_v27  ;;  %1735 = vmatprep.subr.bf16.mxu0 %v4366_v1  ;;  %v4167_v27 = vld [vmem:[%s4740_s16 + $0x1cc] ss:$16 sps:$4 sm:$0xff]  }
  0xf1   : > { %2024 = vmatprep.subr.bf16.mxu1 %v4366_v1 }
  0xf3   : > { %1736 = vmatpush2.bf16.msra.mxu0 %v4073_v28  ;;  %v4169_v28 = vld [vmem:[%s4740_s16 + $0x1c0] ss:$16 sps:$4 sm:$0xff]  }
  0xf4   : > { %2025 = vmatpush2.bf16.msra.mxu1 %v4074_v29  ;;  %1737 = vmatprep.subr.bf16.mxu0 %v4366_v1  ;;  %v4170_v29 = vld [vmem:[%s4740_s16 + $0x1c8] ss:$16 sps:$4 sm:$0xff]  }
  0xf5   : > { %2026 = vmatprep.subr.bf16.mxu1 %v4366_v1 }
  0xf7   : > { %1738 = vmatpush2.bf16.msra.mxu0 %v4075_v30  ;;  %v4171_v30 = vld [vmem:[%s4740_s16 + $0x1e4] ss:$16 sps:$4 sm:$0xff]  }
  0xf8   : > { %2027 = vmatpush2.bf16.msra.mxu1 %v4076_v31  ;;  %1739 = vmatprep.subr.bf16.mxu0 %v4366_v1  ;;  %v4173_v31 = vld [vmem:[%s4740_s16 + $0x1ec] ss:$16 sps:$4 sm:$0xff]  }
  0xf9   : > { %2028 = vmatprep.subr.bf16.mxu1 %v4366_v1 }
  0xfb   : > { %1740 = vmatpush2.bf16.msra.mxu0 %v4077_v32  ;;  %v4175_v32 = vld [vmem:[%s4740_s16 + $0x1e0] ss:$16 sps:$4 sm:$0xff]  }
  0xfc   : > { %2029 = vmatpush2.bf16.msra.mxu1 %v4078_v33  ;;  %1741 = vmatprep.subr.bf16.mxu0 %v4366_v1  ;;  %v4176_v33 = vld [vmem:[%s4740_s16 + $0x1e8] ss:$16 sps:$4 sm:$0xff]  }
  0xfd   : > { %2030 = vmatprep.subr.bf16.mxu1 %v4366_v1  ;;  %v4128_v1 = vld [vmem:[%s4740_s16 + $0xe8] ss:$16 sps:$4 sm:$0xff]  }
  0xff   : > { %1742 = vmatpush2.bf16.msra.mxu0 %v4079_v34  ;;  %v4177_v34 = vld [vmem:[%s4740_s16 + $0x204] ss:$16 sps:$4 sm:$0xff]  }
 0x100   : > { %2031 = vmatpush2.bf16.msra.mxu1 %v4080_v35  ;;  %v4179_v35 = vld [vmem:[%s4740_s16 + $0x20c] ss:$16 sps:$4 sm:$0xff]  }
 0x102   : > { %1744 = vmatmul.mubr.bf16.vlgmr.msra.gmra.mxu0 %v4081_v36  ;;  %v4181_v36 = vld [vmem:[%s4740_s16 + $0x200] ss:$16 sps:$4 sm:$0xff]  }
 0x103   : > { %2033 = vmatmul.mubr.bf16.vlgmr.msra.gmra.mxu1 %v4084_v37  ;;  %1751 = vmatprep.mubr.bf16.mxu0 %v4087_v38  ;;  %v4182_v37 = vld [vmem:[%s4740_s16 + $0x208] ss:$16 sps:$4 sm:$0xff]   ;;  %v4183_v38 = vld [vmem:[%s4740_s16 + $0x224] ss:$16 sps:$4 sm:$0xff]  }
 0x104   : > { %2040 = vmatprep.mubr.bf16.mxu1 %v4089_v39  ;;  %v4185_v39 = vld [vmem:[%s4740_s16 + $0x22c] ss:$16 sps:$4 sm:$0xff]  }
 0x10a   : > { %1752 = vmatmul.mubr.bf16.gmra.mxu0 %v4091_v40  ;;  %v4187_v40 = vld [vmem:[%s4740_s16 + $0x220] ss:$16 sps:$4 sm:$0xff]  }
 0x10b   : > { %2041 = vmatmul.mubr.bf16.gmra.mxu1 %v4092_v41  ;;  %1759 = vmatprep.mubr.bf16.mxu0 %v4093_v42  ;;  %v4188_v41 = vld [vmem:[%s4740_s16 + $0x228] ss:$16 sps:$4 sm:$0xff]   ;;  %v4189_v42 = vld [vmem:[%s4740_s16 + $0x244] ss:$16 sps:$4 sm:$0xff]  }
 0x10c   : > { %2048 = vmatprep.mubr.bf16.mxu1 %v4095_v43  ;;  %v4191_v43 = vld [vmem:[%s4740_s16 + $0x24c] ss:$16 sps:$4 sm:$0xff]  }
 0x112   : > { %1760 = vmatmul.mubr.bf16.gmra.mxu0 %v4097_v44  ;;  %v4193_v44 = vld [vmem:[%s4740_s16 + $0x240] ss:$16 sps:$4 sm:$0xff]  }
 0x113   : > { %2049 = vmatmul.mubr.bf16.gmra.mxu1 %v4098_v45  ;;  %1767 = vmatprep.mubr.bf16.mxu0 %v4099_v46  ;;  %v4194_v45 = vld [vmem:[%s4740_s16 + $0x248] ss:$16 sps:$4 sm:$0xff]   ;;  %v4195_v46 = vld [vmem:[%s4740_s16 + $0x264] ss:$16 sps:$4 sm:$0xff]  }
 0x114   : > { %2056 = vmatprep.mubr.bf16.mxu1 %v4101_v47  ;;  %v4197_v47 = vld [vmem:[%s4740_s16 + $0x26c] ss:$16 sps:$4 sm:$0xff]  }
 0x11a   : > { %1768 = vmatmul.mubr.bf16.gmra.mxu0 %v4103_v48  ;;  %v4199_v48 = vld [vmem:[%s4740_s16 + $0x260] ss:$16 sps:$4 sm:$0xff]  }
 0x11b   : > { %2057 = vmatmul.mubr.bf16.gmra.mxu1 %v4104_v49  ;;  %1775 = vmatprep.mubr.bf16.mxu0 %v4105_v50  ;;  %v4200_v49 = vld [vmem:[%s4740_s16 + $0x268] ss:$16 sps:$4 sm:$0xff]   ;;  %v4201_v50 = vld [vmem:[%s4740_s16 + $0x284] ss:$16 sps:$4 sm:$0xff]  }
 0x11c   : > { %2064 = vmatprep.mubr.bf16.mxu1 %v4107_v51  ;;  %v4203_v51 = vld [vmem:[%s4740_s16 + $0x28c] ss:$16 sps:$4 sm:$0xff]  }
 0x122   : > { %1776 = vmatmul.mubr.bf16.gmra.mxu0 %v4109_v52  ;;  %v4205_v52 = vld [vmem:[%s4740_s16 + $0x280] ss:$16 sps:$4 sm:$0xff]  }
 0x123   : > { %2065 = vmatmul.mubr.bf16.gmra.mxu1 %v4110_v53  ;;  %1783 = vmatprep.mubr.bf16.mxu0 %v4111_v54  ;;  %v4206_v53 = vld [vmem:[%s4740_s16 + $0x288] ss:$16 sps:$4 sm:$0xff]   ;;  %v4207_v54 = vld [vmem:[%s4740_s16 + $0x2a4] ss:$16 sps:$4 sm:$0xff]  }
 0x124   : > { %2072 = vmatprep.mubr.bf16.mxu1 %v4113_v55  ;;  %v4209_v55 = vld [vmem:[%s4740_s16 + $0x2ac] ss:$16 sps:$4 sm:$0xff]  }
 0x12a   : > { %1784 = vmatmul.mubr.bf16.gmra.mxu0 %v4115_v56  ;;  %v4211_v56 = vld [vmem:[%s4740_s16 + $0x2a0] ss:$16 sps:$4 sm:$0xff]  }
 0x12b   : > { %2073 = vmatmul.mubr.bf16.gmra.mxu1 %v4116_v57  ;;  %1791 = vmatprep.mubr.bf16.mxu0 %v4117_v58  ;;  %v4212_v57 = vld [vmem:[%s4740_s16 + $0x2a8] ss:$16 sps:$4 sm:$0xff]   ;;  %v4213_v58 = vld [vmem:[%s4740_s16 + $0x2c4] ss:$16 sps:$4 sm:$0xff]  }
 0x12c   : > { %2080 = vmatprep.mubr.bf16.mxu1 %v4119_v59  ;;  %v4215_v59 = vld [vmem:[%s4740_s16 + $0x2cc] ss:$16 sps:$4 sm:$0xff]  }
 0x132   : > { %1792 = vmatmul.mubr.bf16.gmra.mxu0 %v4121_v60  ;;  %v4217_v60 = vld [vmem:[%s4740_s16 + $0x2c0] ss:$16 sps:$4 sm:$0xff]  }
 0x133   : > { %2081 = vmatmul.mubr.bf16.gmra.mxu1 %v4122_v61  ;;  %1799 = vmatprep.mubr.bf16.mxu0 %v4123_v62  ;;  %v4218_v61 = vld [vmem:[%s4740_s16 + $0x2c8] ss:$16 sps:$4 sm:$0xff]   ;;  %v4219_v62 = vld [vmem:[%s4740_s16 + $0x2e4] ss:$16 sps:$4 sm:$0xff]  }
 0x134   : > { %2088 = vmatprep.mubr.bf16.mxu1 %v4125_v63  ;;  %v4221_v63 = vld [vmem:[%s4740_s16 + $0x2ec] ss:$16 sps:$4 sm:$0xff]  }
 0x13a   : > { %1800 = vmatmul.mubr.bf16.gmra.mxu0 %v4127_v0  ;;  %v4223_v0 = vld [vmem:[%s4740_s16 + $0x2e0] ss:$16 sps:$4 sm:$0xff]  }
 0x13b   : > { %2089 = vmatmul.mubr.bf16.gmra.mxu1 %v4128_v1  ;;  %1807 = vmatprep.mubr.bf16.mxu0 %v4129_v2  ;;  %v4224_v1 = vld [vmem:[%s4740_s16 + $0x2e8] ss:$16 sps:$4 sm:$0xff]   ;;  %v4225_v2 = vld [vmem:[%s4740_s16 + $0x304] ss:$16 sps:$4 sm:$0xff]  }
 0x13c   : > { %2096 = vmatprep.mubr.bf16.mxu1 %v4131_v3  ;;  %v4227_v3 = vld [vmem:[%s4740_s16 + $0x30c] ss:$16 sps:$4 sm:$0xff]  }
 0x142   : > { %1808 = vmatmul.mubr.bf16.gmra.mxu0 %v4133_v4  ;;  %v4229_v4 = vld [vmem:[%s4740_s16 + $0x300] ss:$16 sps:$4 sm:$0xff]  }
 0x143   : > { %2097 = vmatmul.mubr.bf16.gmra.mxu1 %v4134_v5  ;;  %1815 = vmatprep.mubr.bf16.mxu0 %v4135_v6  ;;  %v4230_v5 = vld [vmem:[%s4740_s16 + $0x308] ss:$16 sps:$4 sm:$0xff]   ;;  %v4231_v6 = vld [vmem:[%s4740_s16 + $0x324] ss:$16 sps:$4 sm:$0xff]  }
 0x144   : > { %2104 = vmatprep.mubr.bf16.mxu1 %v4137_v7  ;;  %v4233_v7 = vld [vmem:[%s4740_s16 + $0x32c] ss:$16 sps:$4 sm:$0xff]  }
 0x14a   : > { %1816 = vmatmul.mubr.bf16.gmra.mxu0 %v4139_v8 }
 0x14b   : > { %2105 = vmatmul.mubr.bf16.gmra.mxu1 %v4140_v9  ;;  %1823 = vmatprep.mubr.bf16.mxu0 %v4141_v10  ;;  %v687_v9 = vld [vmem:[#allocation2 + $0xb0] sm:$0xff] }
 0x14c   : > { %2112 = vmatprep.mubr.bf16.mxu1 %v4143_v11 }
 0x152   : > { %1824 = vmatmul.mubr.bf16.gmra.mxu0 %v4145_v12 }
 0x153   : > { %2113 = vmatmul.mubr.bf16.gmra.mxu1 %v4146_v13  ;;  %1831 = vmatprep.mubr.bf16.mxu0 %v4147_v14 }
 0x154   : > { %2120 = vmatprep.mubr.bf16.mxu1 %v4149_v15 }
 0x15a   : > { %1832 = vmatmul.mubr.bf16.gmra.mxu0 %v4151_v16  ;;  %v4235_v16 = vld [vmem:[%s4740_s16 + $0x320] ss:$16 sps:$4 sm:$0xff]  }
 0x15b   : > { %2121 = vmatmul.mubr.bf16.gmra.mxu1 %v4152_v17  ;;  %1839 = vmatprep.mubr.bf16.mxu0 %v4153_v18  ;;  %v688_v17 = vld [vmem:[#allocation2 + $0x1b0] sm:$0xff] }
 0x15c   : > { %2128 = vmatprep.mubr.bf16.mxu1 %v4155_v19  ;;  %v4236_v19 = vld [vmem:[%s4740_s16 + $0x328] ss:$16 sps:$4 sm:$0xff]  }
 0x162   : > { %1840 = vmatmul.mubr.bf16.gmra.mxu0 %v4157_v20  ;;  %v4237_v20 = vld [vmem:[%s4740_s16 + $0x344] ss:$16 sps:$4 sm:$0xff]  }
 0x163   : > { %2129 = vmatmul.mubr.bf16.gmra.mxu1 %v4158_v21  ;;  %1847 = vmatprep.mubr.bf16.mxu0 %v4159_v22 }
 0x164   : > { %2136 = vmatprep.mubr.bf16.mxu1 %v4161_v23  ;;  %v4239_v23 = vld [vmem:[%s4740_s16 + $0x34c] ss:$16 sps:$4 sm:$0xff]  }
 0x16a   : > { %1848 = vmatmul.mubr.bf16.gmra.mxu0 %v4163_v24 }
 0x16b   : > { %2137 = vmatmul.mubr.bf16.gmra.mxu1 %v4164_v25  ;;  %1855 = vmatprep.mubr.bf16.mxu0 %v4165_v26 }
 0x16c   : > { %2144 = vmatprep.mubr.bf16.mxu1 %v4167_v27  ;;  %v689_v27 = vld [vmem:[#allocation2 + $0xd8] sm:$0xff] }
 0x172   : > { %1856 = vmatmul.mubr.bf16.gmra.mxu0 %v4169_v28 }
 0x173   : > { %2145 = vmatmul.mubr.bf16.gmra.mxu1 %v4170_v29  ;;  %1863 = vmatprep.mubr.bf16.mxu0 %v4171_v30 }
 0x174   : > { %2152 = vmatprep.mubr.bf16.mxu1 %v4173_v31 }
 0x17a   : > { %1864 = vmatmul.mubr.bf16.gmra.mxu0 %v4175_v32 }
 0x17b   : > { %2153 = vmatmul.mubr.bf16.gmra.mxu1 %v4176_v33  ;;  %1871 = vmatprep.mubr.bf16.mxu0 %v4177_v34  ;;  %v4241_v34 = vld [vmem:[%s4740_s16 + $0x340] ss:$16 sps:$4 sm:$0xff]  }
 0x17c   : > { %2160 = vmatprep.mubr.bf16.mxu1 %v4179_v35  ;;  %v690_v35 = vld [vmem:[#allocation2 + $0x18] sm:$0xff] }
 0x182   : > { %1872 = vmatmul.mubr.bf16.gmra.mxu0 %v4181_v36 }
 0x183   : > { %2161 = vmatmul.mubr.bf16.gmra.mxu1 %v4182_v37  ;;  %1879 = vmatprep.mubr.bf16.mxu0 %v4183_v38  ;;  %v4242_v37 = vld [vmem:[%s4740_s16 + $0x348] ss:$16 sps:$4 sm:$0xff]   ;;  %v4243_v38 = vld [vmem:[%s4740_s16 + $0x364] ss:$16 sps:$4 sm:$0xff]  }
 0x184   : > { %2168 = vmatprep.mubr.bf16.mxu1 %v4185_v39 }
 0x18a   : > { %1880 = vmatmul.mubr.bf16.gmra.mxu0 %v4187_v40 }
 0x18b   : > { %2169 = vmatmul.mubr.bf16.gmra.mxu1 %v4188_v41  ;;  %1887 = vmatprep.mubr.bf16.mxu0 %v4189_v42  ;;  %v4245_v41 = vld [vmem:[%s4740_s16 + $0x36c] ss:$16 sps:$4 sm:$0xff]  }
 0x18c   : > { %2176 = vmatprep.mubr.bf16.mxu1 %v4191_v43 }
 0x192   : > { %1888 = vmatmul.mubr.bf16.gmra.mxu0 %v4193_v44 }
 0x193   : > { %2177 = vmatmul.mubr.bf16.gmra.mxu1 %v4194_v45  ;;  %1895 = vmatprep.mubr.bf16.mxu0 %v4195_v46  ;;  %v691_v45 = vld [vmem:[#allocation2 + $0x50] sm:$0xff] }
 0x194   : > { %2184 = vmatprep.mubr.bf16.mxu1 %v4197_v47 }
 0x19a   : > { %1896 = vmatmul.mubr.bf16.gmra.mxu0 %v4199_v48 }
 0x19b   : > { %2185 = vmatmul.mubr.bf16.gmra.mxu1 %v4200_v49  ;;  %1903 = vmatprep.mubr.bf16.mxu0 %v4201_v50 }
 0x19c   : > { %2192 = vmatprep.mubr.bf16.mxu1 %v4203_v51 }
 0x1a2   : > { %1904 = vmatmul.mubr.bf16.gmra.mxu0 %v4205_v52  ;;  %v4247_v52 = vld [vmem:[%s4740_s16 + $0x360] ss:$16 sps:$4 sm:$0xff]  }
 0x1a3   : > { %2193 = vmatmul.mubr.bf16.gmra.mxu1 %v4206_v53  ;;  %1911 = vmatprep.mubr.bf16.mxu0 %v4207_v54  ;;  %v692_v53 = vld [vmem:[#allocation2 + $0x168] sm:$0xff] }
 0x1a4   : > { %2200 = vmatprep.mubr.bf16.mxu1 %v4209_v55  ;;  %v4248_v55 = vld [vmem:[%s4740_s16 + $0x368] ss:$16 sps:$4 sm:$0xff]  }
 0x1aa   : > { %1912 = vmatmul.mubr.bf16.gmra.mxu0 %v4211_v56  ;;  %v4251_v56 = vld [vmem:[%s4740_s16 + $0x384] ss:$16 sps:$4 sm:$0xff]  }
 0x1ab   : > { %2201 = vmatmul.mubr.bf16.gmra.mxu1 %v4212_v57  ;;  %1919 = vmatprep.mubr.bf16.mxu0 %v4213_v58 }
 0x1ac   : > { %2208 = vmatprep.mubr.bf16.mxu1 %v4215_v59  ;;  %v4254_v59 = vld [vmem:[%s4740_s16 + $0x38c] ss:$16 sps:$4 sm:$0xff]  }
 0x1b2   : > { %1920 = vmatmul.mubr.bf16.gmra.mxu0 %v4217_v60 }
 0x1b3   : > { %2209 = vmatmul.mubr.bf16.gmra.mxu1 %v4218_v61  ;;  %1927 = vmatprep.mubr.bf16.mxu0 %v4219_v62 }
 0x1b4   : > { %2216 = vmatprep.mubr.bf16.mxu1 %v4221_v63  ;;  %v693_v63 = vld [vmem:[#allocation2 + $0x130] sm:$0xff] }
 0x1ba   : > { %1928 = vmatmul.mubr.bf16.gmra.mxu0 %v4223_v0 }
 0x1bb   : > { %2217 = vmatmul.mubr.bf16.gmra.mxu1 %v4224_v1  ;;  %1935 = vmatprep.mubr.bf16.mxu0 %v4225_v2 }
 0x1bc   : > { %2224 = vmatprep.mubr.bf16.mxu1 %v4227_v3 }
 0x1c2   : > { %v1745_v8 = vpop.f32.mrf.mxu0  ;;  %1936 = vmatmul.mubr.bf16.gmra.mxu0 %v4229_v4 }
 0x1c3   : > { %v2034_v10 = vpop.f32.mrf.mxu1  ;;  %2225 = vmatmul.mubr.bf16.gmra.mxu1 %v4230_v5  ;;  %1943 = vmatprep.mubr.bf16.mxu0 %v4231_v6  ;;  %v4249_v6 = vld [vmem:[%s4740_s16 + $0x380] ss:$16 sps:$4 sm:$0xff]  }
 0x1c4   : > { %v2035_v11 = vadd.f32 %v2034_v10, %v1745_v8  ;;  %v1747_v12 = vpop.f32.mrf.mxu0  ;;  %2232 = vmatprep.mubr.bf16.mxu1 %v4233_v7  ;;  %v694_v7 = vld [vmem:[#allocation2 + $0x48] sm:$0xff]  ;;  %v4257_v10 = vld [vmem:[%s4740_s16 + $0x3a4] ss:$16 sps:$4 sm:$0xff]  }
 0x1c5   : > { %v2036_v13 = vpop.f32.mrf.mxu1 }
 0x1c6   : > { %v2289_v14 = vadd.f32 %v2035_v11, %v687_v9  ;;  %v1748_v15 = vpop.f32.mrf.mxu0  ;;  %v4252_v9 = vld [vmem:[%s4740_s16 + $0x388] ss:$16 sps:$4 sm:$0xff]   ;;  %v4260_v13 = vld [vmem:[%s4740_s16 + $0x3ac] ss:$16 sps:$4 sm:$0xff]  }
 0x1c7   : > { %v2037_v18 = vpop.f32.mrf.mxu1 }
 0x1c8   : > { %2353 = vst [vmem:[#allocation2 + $0xb0] sm:$0xff] %v2289_v14  ;;  %v2038_v21 = vadd.f32 %v2037_v18, %v1748_v15  ;;  %v1750_v22 = vpop.f32.mrf.mxu0 }
 0x1c9   : > { %v2039_v24 = vpop.f32.mrf.mxu1 }
 0x1ca   : > { %v2290_v25 = vadd.f32 %v2038_v21, %v688_v17  ;;  %v1753_v26 = vpop.f32.mrf.mxu0  ;;  %1944 = vmatmul.mubr.bf16.gmra.mxu0 %v4235_v16  ;;  %v695_v17 = vld [vmem:[#allocation2 + $0x180] sm:$0xff] }
 0x1cb   : > { %v2042_v28 = vpop.f32.mrf.mxu1  ;;  %2233 = vmatmul.mubr.bf16.gmra.mxu1 %v4236_v19  ;;  %1951 = vmatprep.mubr.bf16.mxu0 %v4237_v20  ;;  %v4255_v24 = vld [vmem:[%s4740_s16 + $0x3a0] ss:$16 sps:$4 sm:$0xff]  }
 0x1cc   : > { %2354 = vst [vmem:[#allocation2 + $0x1b0] sm:$0xff] %v2290_v25  ;;  %v2043_v29 = vadd.f32 %v2042_v28, %v1753_v26  ;;  %v1755_v30 = vpop.f32.mrf.mxu0  ;;  %2240 = vmatprep.mubr.bf16.mxu1 %v4239_v23  ;;  %v696_v25 = vld [vmem:[#allocation2 + $0x110] sm:$0xff] }
 0x1cd   : > { %v2044_v31 = vpop.f32.mrf.mxu1  ;;  %v4263_v28 = vld [vmem:[%s4740_s16 + $0x3c4] ss:$16 sps:$4 sm:$0xff]  }
 0x1ce   : > { %v2291_v32 = vadd.f32 %v2043_v29, %v689_v27  ;;  %v1756_v33 = vpop.f32.mrf.mxu0  ;;  %v4258_v27 = vld [vmem:[%s4740_s16 + $0x3a8] ss:$16 sps:$4 sm:$0xff]   ;;  %v4266_v31 = vld [vmem:[%s4740_s16 + $0x3cc] ss:$16 sps:$4 sm:$0xff]  }
 0x1cf   : > { %v2045_v36 = vpop.f32.mrf.mxu1 }
 0x1d0   : > { %2355 = vst [vmem:[#allocation2 + $0xd8] sm:$0xff] %v2291_v32  ;;  %v2046_v39 = vadd.f32 %v2045_v36, %v1756_v33  ;;  %v1758_v40 = vpop.f32.mrf.mxu0 }
 0x1d1   : > { %v2047_v42 = vpop.f32.mrf.mxu1 }
 0x1d2   : > { %v2292_v43 = vadd.f32 %v2046_v39, %v690_v35  ;;  %v1761_v44 = vpop.f32.mrf.mxu0  ;;  %1952 = vmatmul.mubr.bf16.gmra.mxu0 %v4241_v34  ;;  %v697_v35 = vld [vmem:[#allocation2 + $0x118] sm:$0xff]  ;;  %v4261_v42 = vld [vmem:[%s4740_s16 + $0x3c0] ss:$16 sps:$4 sm:$0xff]  }
 0x1d3   : > { %v2050_v46 = vpop.f32.mrf.mxu1  ;;  %2241 = vmatmul.mubr.bf16.gmra.mxu1 %v4242_v37  ;;  %1959 = vmatprep.mubr.bf16.mxu0 %v4243_v38 }
 0x1d4   : > { %2356 = vst [vmem:[#allocation2 + $0x18] sm:$0xff] %v2292_v43  ;;  %v2051_v47 = vadd.f32 %v2050_v46, %v1761_v44  ;;  %v1763_v48 = vpop.f32.mrf.mxu0  ;;  %2248 = vmatprep.mubr.bf16.mxu1 %v4245_v41  ;;  %v698_v43 = vld [vmem:[#allocation2 + $0x98] sm:$0xff]  ;;  %v4269_v46 = vld [vmem:[%s4740_s16 + $0x3e4] ss:$16 sps:$4 sm:$0xff]  }
 0x1d5   : > { %v2052_v49 = vpop.f32.mrf.mxu1 }
 0x1d6   : > { %v2293_v50 = vadd.f32 %v2051_v47, %v691_v45  ;;  %v1764_v51 = vpop.f32.mrf.mxu0  ;;  %v4264_v45 = vld [vmem:[%s4740_s16 + $0x3c8] ss:$16 sps:$4 sm:$0xff]   ;;  %v4272_v49 = vld [vmem:[%s4740_s16 + $0x3ec] ss:$16 sps:$4 sm:$0xff]  }
 0x1d7   : > { %v2053_v54 = vpop.f32.mrf.mxu1 }
 0x1d8   : > { %2357 = vst [vmem:[#allocation2 + $0x50] sm:$0xff] %v2293_v50  ;;  %v2054_v57 = vadd.f32 %v2053_v54, %v1764_v51  ;;  %v1766_v58 = vpop.f32.mrf.mxu0 }
 0x1d9   : > { %v2055_v60 = vpop.f32.mrf.mxu1 }
 0x1da   : > { %v2294_v61 = vadd.f32 %v2054_v57, %v692_v53  ;;  %v1769_v62 = vpop.f32.mrf.mxu0  ;;  %1960 = vmatmul.mubr.bf16.gmra.mxu0 %v4247_v52  ;;  %v699_v53 = vld [vmem:[#allocation2 + $0x120] sm:$0xff] }
 0x1db   : > { %v2058_v0 = vpop.f32.mrf.mxu1  ;;  %2249 = vmatmul.mubr.bf16.gmra.mxu1 %v4248_v55  ;;  %1967 = vmatprep.mubr.bf16.mxu0 %v4251_v56  ;;  %v4267_v60 = vld [vmem:[%s4740_s16 + $0x3e0] ss:$16 sps:$4 sm:$0xff]  }
 0x1dc   : > { %2358 = vst [vmem:[#allocation2 + $0x168] sm:$0xff] %v2294_v61  ;;  %v2059_v1 = vadd.f32 %v2058_v0, %v1769_v62  ;;  %v1771_v2 = vpop.f32.mrf.mxu0  ;;  %2256 = vmatprep.mubr.bf16.mxu1 %v4254_v59  ;;  %v700_v61 = vld [vmem:[#allocation2 + $0x150] sm:$0xff] }
 0x1dd   : > { %v2060_v3 = vpop.f32.mrf.mxu1 }
 0x1de   : > { %v2295_v4 = vadd.f32 %v2059_v1, %v693_v63  ;;  %v1772_v5 = vpop.f32.mrf.mxu0  ;;  %v4270_v63 = vld [vmem:[%s4740_s16 + $0x3e8] ss:$16 sps:$4 sm:$0xff]  }
 0x1df   : > { %v2061_v8 = vpop.f32.mrf.mxu1 }
 0x1e0   : > { %2359 = vst [vmem:[#allocation2 + $0x130] sm:$0xff] %v2295_v4  ;;  %v2062_v11 = vadd.f32 %v2061_v8, %v1772_v5  ;;  %v1774_v12 = vpop.f32.mrf.mxu0  ;;  %v701_v5 = vld [vmem:[#allocation2 + $0x108] sm:$0xff] }
 0x1e1   : > { %v2063_v14 = vpop.f32.mrf.mxu1  ;;  %v702_v12 = vld [vmem:[#allocation2 + $0x60] sm:$0xff] }
 0x1e2   : > { %v2296_v15 = vadd.f32 %v2062_v11, %v694_v7  ;;  %v1777_v16 = vpop.f32.mrf.mxu0  ;;  %1968 = vmatmul.mubr.bf16.gmra.mxu0 %v4249_v6 }
 0x1e3   : > { %v2066_v18 = vpop.f32.mrf.mxu1  ;;  %2257 = vmatmul.mubr.bf16.gmra.mxu1 %v4252_v9  ;;  %1975 = vmatprep.mubr.bf16.mxu0 %v4257_v10 }
 0x1e4   : > { %2360 = vst [vmem:[#allocation2 + $0x48] sm:$0xff] %v2296_v15  ;;  %v2067_v19 = vadd.f32 %v2066_v18, %v1777_v16  ;;  %v1779_v20 = vpop.f32.mrf.mxu0  ;;  %2264 = vmatprep.mubr.bf16.mxu1 %v4260_v13 }
 0x1e5   : > { %v2068_v21 = vpop.f32.mrf.mxu1 }
 0x1e6   : > { %v2297_v22 = vadd.f32 %v2067_v19, %v695_v17  ;;  %v1780_v23 = vpop.f32.mrf.mxu0  ;;  %v703_v19 = vld [vmem:[#allocation2 + $0xe0] sm:$0xff] }
 0x1e7   : > { %v2069_v26 = vpop.f32.mrf.mxu1 }
 0x1e8   : > { %2361 = vst [vmem:[#allocation2 + $0x180] sm:$0xff] %v2297_v22  ;;  %v2070_v29 = vadd.f32 %v2069_v26, %v1780_v23  ;;  %v1782_v30 = vpop.f32.mrf.mxu0  ;;  %v704_v26 = vld [vmem:[#allocation2 + $0x188] sm:$0xff] }
 0x1e9   : > { %v2071_v32 = vpop.f32.mrf.mxu1 }
 0x1ea   : > { %v2298_v33 = vadd.f32 %v2070_v29, %v696_v25  ;;  %v1785_v34 = vpop.f32.mrf.mxu0  ;;  %1976 = vmatmul.mubr.bf16.gmra.mxu0 %v4255_v24 }
 0x1eb   : > { %v2074_v36 = vpop.f32.mrf.mxu1  ;;  %2265 = vmatmul.mubr.bf16.gmra.mxu1 %v4258_v27  ;;  %1983 = vmatprep.mubr.bf16.mxu0 %v4263_v28 }
 0x1ec   : > { %2362 = vst [vmem:[#allocation2 + $0x110] sm:$0xff] %v2298_v33  ;;  %v2075_v37 = vadd.f32 %v2074_v36, %v1785_v34  ;;  %v1787_v38 = vpop.f32.mrf.mxu0  ;;  %2272 = vmatprep.mubr.bf16.mxu1 %v4266_v31  ;;  %v705_v33 = vld [vmem:[#allocation2 + $0x138] sm:$0xff] }
 0x1ed   : > { %v2076_v39 = vpop.f32.mrf.mxu1 }
 0x1ee   : > { %v2299_v40 = vadd.f32 %v2075_v37, %v697_v35  ;;  %v1788_v41 = vpop.f32.mrf.mxu0 }
 0x1ef   : > { %v2077_v44 = vpop.f32.mrf.mxu1 }
 0x1f0   : > { %2363 = vst [vmem:[#allocation2 + $0x118] sm:$0xff] %v2299_v40  ;;  %v2078_v47 = vadd.f32 %v2077_v44, %v1788_v41  ;;  %v1790_v48 = vpop.f32.mrf.mxu0  ;;  %v706_v40 = vld [vmem:[#allocation2 + $0x140] sm:$0xff] }
 0x1f1   : > { %v2079_v50 = vpop.f32.mrf.mxu1 }
 0x1f2   : > { %v2300_v51 = vadd.f32 %v2078_v47, %v698_v43  ;;  %v1793_v52 = vpop.f32.mrf.mxu0  ;;  %1984 = vmatmul.mubr.bf16.gmra.mxu0 %v4261_v42  ;;  %v707_v47 = vld [vmem:[#allocation2 + $0x80] sm:$0xff] }
 0x1f3   : > { %v2082_v54 = vpop.f32.mrf.mxu1  ;;  %2273 = vmatmul.mubr.bf16.gmra.mxu1 %v4264_v45  ;;  %1991 = vmatprep.mubr.bf16.mxu0 %v4269_v46 }
 0x1f4   : > { %2364 = vst [vmem:[#allocation2 + $0x98] sm:$0xff] %v2300_v51  ;;  %v2083_v55 = vadd.f32 %v2082_v54, %v1793_v52  ;;  %v1795_v56 = vpop.f32.mrf.mxu0  ;;  %2280 = vmatprep.mubr.bf16.mxu1 %v4272_v49  ;;  %v708_v54 = vld [vmem:[#allocation2 + $0x1a8] sm:$0xff] }
 0x1f5   : > { %v2084_v57 = vpop.f32.mrf.mxu1 }
 0x1f6   : > { %v2301_v58 = vadd.f32 %v2083_v55, %v699_v53  ;;  %v1796_v59 = vpop.f32.mrf.mxu0 }
 0x1f7   : > { %v2085_v62 = vpop.f32.mrf.mxu1 }
 0x1f8   : > { %2365 = vst [vmem:[#allocation2 + $0x120] sm:$0xff] %v2301_v58  ;;  %v2086_v0 = vadd.f32 %v2085_v62, %v1796_v59  ;;  %v1798_v1 = vpop.f32.mrf.mxu0 }
 0x1f9   : > { %v2087_v2 = vpop.f32.mrf.mxu1 }
 0x1fa   : > { %v2302_v3 = vadd.f32 %v2086_v0, %v700_v61  ;;  %v1801_v4 = vpop.f32.mrf.mxu0  ;;  %1992 = vmatmul.mubr.bf16.gmra.mxu0 %v4267_v60  ;;  %v709_v61 = vld [vmem:[#allocation2 + $0x1b8] sm:$0xff] }
 0x1fb   : > { %v2090_v6 = vpop.f32.mrf.mxu1  ;;  %2281 = vmatmul.mubr.bf16.gmra.mxu1 %v4270_v63 }
 0x1fc   : > { %2366 = vst [vmem:[#allocation2 + $0x150] sm:$0xff] %v2302_v3  ;;  %v2091_v7 = vadd.f32 %v2090_v6, %v1801_v4  ;;  %v1803_v8 = vpop.f32.mrf.mxu0  ;;  %v710_v4 = vld [vmem:[#allocation2 + $0x28] sm:$0xff] }
 0x1fd   : > { %v2092_v9 = vpop.f32.mrf.mxu1 }
 0x1fe   : > { %v2303_v10 = vadd.f32 %v2091_v7, %v701_v5  ;;  %v1804_v11 = vpop.f32.mrf.mxu0 }
 0x1ff   : > { %v2093_v13 = vpop.f32.mrf.mxu1 }
 0x200   : > { %2367 = vst [vmem:[#allocation2 + $0x108] sm:$0xff] %v2303_v10  ;;  %v2094_v14 = vadd.f32 %v2093_v13, %v1804_v11  ;;  %v1806_v15 = vpop.f32.mrf.mxu0  ;;  %v711_v11 = vld [vmem:[#allocation2 + $0x1e8] sm:$0xff] }
 0x201   : > { %v2095_v16 = vpop.f32.mrf.mxu1 }
 0x202   : > { %v2304_v17 = vadd.f32 %v2094_v14, %v702_v12  ;;  %v1809_v18 = vpop.f32.mrf.mxu0 }
 0x203   : > { %v2098_v20 = vpop.f32.mrf.mxu1 }
 0x204   : > { %2368 = vst [vmem:[#allocation2 + $0x60] sm:$0xff] %v2304_v17  ;;  %v2099_v21 = vadd.f32 %v2098_v20, %v1809_v18  ;;  %v1811_v22 = vpop.f32.mrf.mxu0  ;;  %v712_v18 = vld [vmem:[#allocation2 + $0xf8] sm:$0xff] }
 0x205   : > { %v2100_v23 = vpop.f32.mrf.mxu1 }
 0x206   : > { %v2305_v24 = vadd.f32 %v2099_v21, %v703_v19  ;;  %v1812_v25 = vpop.f32.mrf.mxu0 }
 0x207   : > { %v2101_v27 = vpop.f32.mrf.mxu1 }
 0x208   : > { %2369 = vst [vmem:[#allocation2 + $0xe0] sm:$0xff] %v2305_v24  ;;  %v2102_v28 = vadd.f32 %v2101_v27, %v1812_v25  ;;  %v1814_v29 = vpop.f32.mrf.mxu0  ;;  %v713_v25 = vld [vmem:[#allocation2 + $0x160] sm:$0xff] }
 0x209   : > { %v2103_v30 = vpop.f32.mrf.mxu1 }
 0x20a   : > { %v2306_v31 = vadd.f32 %v2102_v28, %v704_v26  ;;  %v1817_v32 = vpop.f32.mrf.mxu0 }
 0x20b   : > { %v2106_v34 = vpop.f32.mrf.mxu1 }
 0x20c   : > { %2370 = vst [vmem:[#allocation2 + $0x188] sm:$0xff] %v2306_v31  ;;  %v2107_v35 = vadd.f32 %v2106_v34, %v1817_v32  ;;  %v1819_v36 = vpop.f32.mrf.mxu0  ;;  %v714_v32 = vld [vmem:[#allocation2 + $0x30] sm:$0xff] }
 0x20d   : > { %v2108_v37 = vpop.f32.mrf.mxu1 }
 0x20e   : > { %v2307_v38 = vadd.f32 %v2107_v35, %v705_v33  ;;  %v1820_v39 = vpop.f32.mrf.mxu0 }
 0x20f   : > { %v2109_v41 = vpop.f32.mrf.mxu1 }
 0x210   : > { %2371 = vst [vmem:[#allocation2 + $0x138] sm:$0xff] %v2307_v38  ;;  %v2110_v42 = vadd.f32 %v2109_v41, %v1820_v39  ;;  %v1822_v43 = vpop.f32.mrf.mxu0  ;;  %v715_v39 = vld [vmem:[#allocation2 + $0x1e0] sm:$0xff] }
 0x211   : > { %v2111_v44 = vpop.f32.mrf.mxu1 }
 0x212   : > { %v2308_v45 = vadd.f32 %v2110_v42, %v706_v40  ;;  %v1825_v46 = vpop.f32.mrf.mxu0 }
 0x213   : > { %v2114_v48 = vpop.f32.mrf.mxu1 }
 0x214   : > { %2372 = vst [vmem:[#allocation2 + $0x140] sm:$0xff] %v2308_v45  ;;  %v2115_v49 = vadd.f32 %v2114_v48, %v1825_v46  ;;  %v1827_v50 = vpop.f32.mrf.mxu0  ;;  %v716_v46 = vld [vmem:[#allocation2] sm:$0xff] }
 0x215   : > { %v2116_v51 = vpop.f32.mrf.mxu1 }
 0x216   : > { %v2309_v52 = vadd.f32 %v2115_v49, %v707_v47  ;;  %v1828_v53 = vpop.f32.mrf.mxu0 }
 0x217   : > { %v2117_v55 = vpop.f32.mrf.mxu1 }
 0x218   : > { %2373 = vst [vmem:[#allocation2 + $0x80] sm:$0xff] %v2309_v52  ;;  %v2118_v56 = vadd.f32 %v2117_v55, %v1828_v53  ;;  %v1830_v57 = vpop.f32.mrf.mxu0  ;;  %v717_v53 = vld [vmem:[#allocation2 + $0xf0] sm:$0xff] }
 0x219   : > { %v2119_v58 = vpop.f32.mrf.mxu1 }
 0x21a   : > { %v2310_v59 = vadd.f32 %v2118_v56, %v708_v54  ;;  %v1833_v60 = vpop.f32.mrf.mxu0 }
 0x21b   : > { %v2122_v62 = vpop.f32.mrf.mxu1 }
 0x21c   : > { %2374 = vst [vmem:[#allocation2 + $0x1a8] sm:$0xff] %v2310_v59  ;;  %v2123_v63 = vadd.f32 %v2122_v62, %v1833_v60  ;;  %v1835_v0 = vpop.f32.mrf.mxu0  ;;  %v718_v60 = vld [vmem:[#allocation2 + $0x8] sm:$0xff] }
 0x21d   : > { %v2124_v1 = vpop.f32.mrf.mxu1 }
 0x21e   : > { %v2311_v2 = vadd.f32 %v2123_v63, %v709_v61  ;;  %v1836_v3 = vpop.f32.mrf.mxu0 }
 0x21f   : > { %v2125_v5 = vpop.f32.mrf.mxu1 }
 0x220   : > { %2375 = vst [vmem:[#allocation2 + $0x1b8] sm:$0xff] %v2311_v2  ;;  %v2126_v6 = vadd.f32 %v2125_v5, %v1836_v3  ;;  %v1838_v7 = vpop.f32.mrf.mxu0  ;;  %v719_v3 = vld [vmem:[#allocation2 + $0x148] sm:$0xff] }
 0x221   : > { %v2127_v8 = vpop.f32.mrf.mxu1 }
 0x222   : > { %v2312_v9 = vadd.f32 %v2126_v6, %v710_v4  ;;  %v1841_v10 = vpop.f32.mrf.mxu0 }
 0x223   : > { %v2130_v12 = vpop.f32.mrf.mxu1 }
 0x224   : > { %2376 = vst [vmem:[#allocation2 + $0x28] sm:$0xff] %v2312_v9  ;;  %v2131_v13 = vadd.f32 %v2130_v12, %v1841_v10  ;;  %v1843_v14 = vpop.f32.mrf.mxu0  ;;  %v720_v10 = vld [vmem:[#allocation2 + $0x1d0] sm:$0xff] }
 0x225   : > { %v2132_v15 = vpop.f32.mrf.mxu1 }
 0x226   : > { %v2313_v16 = vadd.f32 %v2131_v13, %v711_v11  ;;  %v1844_v17 = vpop.f32.mrf.mxu0 }
 0x227   : > { %v2133_v19 = vpop.f32.mrf.mxu1 }
 0x228   : > { %2377 = vst [vmem:[#allocation2 + $0x1e8] sm:$0xff] %v2313_v16  ;;  %v2134_v20 = vadd.f32 %v2133_v19, %v1844_v17  ;;  %v1846_v21 = vpop.f32.mrf.mxu0  ;;  %v721_v17 = vld [vmem:[#allocation2 + $0x100] sm:$0xff] }
 0x229   : > { %v2135_v22 = vpop.f32.mrf.mxu1 }
 0x22a   : > { %v2314_v23 = vadd.f32 %v2134_v20, %v712_v18  ;;  %v1849_v24 = vpop.f32.mrf.mxu0 }
 0x22b   : > { %v2138_v26 = vpop.f32.mrf.mxu1 }
 0x22c   : > { %2378 = vst [vmem:[#allocation2 + $0xf8] sm:$0xff] %v2314_v23  ;;  %v2139_v27 = vadd.f32 %v2138_v26, %v1849_v24  ;;  %v1851_v28 = vpop.f32.mrf.mxu0  ;;  %v722_v24 = vld [vmem:[#allocation2 + $0xc8] sm:$0xff] }
 0x22d   : > { %v2140_v29 = vpop.f32.mrf.mxu1 }
 0x22e   : > { %v2315_v30 = vadd.f32 %v2139_v27, %v713_v25  ;;  %v1852_v31 = vpop.f32.mrf.mxu0 }
 0x22f   : > { %v2141_v33 = vpop.f32.mrf.mxu1 }
 0x230   : > { %2379 = vst [vmem:[#allocation2 + $0x160] sm:$0xff] %v2315_v30  ;;  %v2142_v34 = vadd.f32 %v2141_v33, %v1852_v31  ;;  %v1854_v35 = vpop.f32.mrf.mxu0  ;;  %v723_v31 = vld [vmem:[#allocation2 + $0x40] sm:$0xff] }
 0x231   : > { %v2143_v36 = vpop.f32.mrf.mxu1 }
 0x232   : > { %v2316_v37 = vadd.f32 %v2142_v34, %v714_v32  ;;  %v1857_v38 = vpop.f32.mrf.mxu0 }
 0x233   : > { %v2146_v40 = vpop.f32.mrf.mxu1 }
 0x234   : > { %2380 = vst [vmem:[#allocation2 + $0x30] sm:$0xff] %v2316_v37  ;;  %v2147_v41 = vadd.f32 %v2146_v40, %v1857_v38  ;;  %v1859_v42 = vpop.f32.mrf.mxu0  ;;  %v724_v38 = vld [vmem:[#allocation2 + $0x1f8] sm:$0xff] }
 0x235   : > { %v2148_v43 = vpop.f32.mrf.mxu1 }
 0x236   : > { %v2317_v44 = vadd.f32 %v2147_v41, %v715_v39  ;;  %v1860_v45 = vpop.f32.mrf.mxu0 }
 0x237   : > { %v2149_v47 = vpop.f32.mrf.mxu1 }
 0x238   : > { %2381 = vst [vmem:[#allocation2 + $0x1e0] sm:$0xff] %v2317_v44  ;;  %v2150_v48 = vadd.f32 %v2149_v47, %v1860_v45  ;;  %v1862_v49 = vpop.f32.mrf.mxu0  ;;  %v725_v45 = vld [vmem:[#allocation2 + $0x20] sm:$0xff] }
 0x239   : > { %v2151_v50 = vpop.f32.mrf.mxu1 }
 0x23a   : > { %v2318_v51 = vadd.f32 %v2150_v48, %v716_v46  ;;  %v1865_v52 = vpop.f32.mrf.mxu0 }
 0x23b   : > { %v2154_v54 = vpop.f32.mrf.mxu1 }
 0x23c   : > { %2382 = vst [vmem:[#allocation2] sm:$0xff] %v2318_v51  ;;  %v2155_v55 = vadd.f32 %v2154_v54, %v1865_v52  ;;  %v1867_v56 = vpop.f32.mrf.mxu0  ;;  %v726_v52 = vld [vmem:[#allocation2 + $0x128] sm:$0xff] }
 0x23d   : > { %v2156_v57 = vpop.f32.mrf.mxu1 }
 0x23e   : > { %v2319_v58 = vadd.f32 %v2155_v55, %v717_v53  ;;  %v1868_v59 = vpop.f32.mrf.mxu0 }
 0x23f   : > { %v2157_v61 = vpop.f32.mrf.mxu1 }
 0x240   : > { %2383 = vst [vmem:[#allocation2 + $0xf0] sm:$0xff] %v2319_v58  ;;  %v2158_v62 = vadd.f32 %v2157_v61, %v1868_v59  ;;  %v1870_v63 = vpop.f32.mrf.mxu0  ;;  %v727_v59 = vld [vmem:[#allocation2 + $0x1a0] sm:$0xff] }
 0x241   : > { %v2159_v0 = vpop.f32.mrf.mxu1 }
 0x242   : > { %v2320_v1 = vadd.f32 %v2158_v62, %v718_v60  ;;  %v1873_v2 = vpop.f32.mrf.mxu0 }
 0x243   : > { %v2162_v4 = vpop.f32.mrf.mxu1 }
 0x244   : > { %2384 = vst [vmem:[#allocation2 + $0x8] sm:$0xff] %v2320_v1  ;;  %v2163_v5 = vadd.f32 %v2162_v4, %v1873_v2  ;;  %v1875_v6 = vpop.f32.mrf.mxu0  ;;  %v728_v2 = vld [vmem:[#allocation2 + $0x1f0] sm:$0xff] }
 0x245   : > { %v2164_v7 = vpop.f32.mrf.mxu1 }
 0x246   : > { %v2321_v8 = vadd.f32 %v2163_v5, %v719_v3  ;;  %v1876_v9 = vpop.f32.mrf.mxu0 }
 0x247   : > { %v2165_v11 = vpop.f32.mrf.mxu1 }
 0x248   : > { %2385 = vst [vmem:[#allocation2 + $0x148] sm:$0xff] %v2321_v8  ;;  %v2166_v12 = vadd.f32 %v2165_v11, %v1876_v9  ;;  %v1878_v13 = vpop.f32.mrf.mxu0  ;;  %v729_v9 = vld [vmem:[#allocation2 + $0xe8] sm:$0xff] }
 0x249   : > { %v2167_v14 = vpop.f32.mrf.mxu1 }
 0x24a   : > { %v2322_v15 = vadd.f32 %v2166_v12, %v720_v10  ;;  %v1881_v16 = vpop.f32.mrf.mxu0 }
 0x24b   : > { %v2170_v18 = vpop.f32.mrf.mxu1 }
 0x24c   : > { %2386 = vst [vmem:[#allocation2 + $0x1d0] sm:$0xff] %v2322_v15  ;;  %v2171_v19 = vadd.f32 %v2170_v18, %v1881_v16  ;;  %v1883_v20 = vpop.f32.mrf.mxu0  ;;  %v730_v16 = vld [vmem:[#allocation2 + $0x78] sm:$0xff] }
 0x24d   : > { %v2172_v21 = vpop.f32.mrf.mxu1 }
 0x24e   : > { %v2323_v22 = vadd.f32 %v2171_v19, %v721_v17  ;;  %v1884_v23 = vpop.f32.mrf.mxu0 }
 0x24f   : > { %v2173_v25 = vpop.f32.mrf.mxu1 }
 0x250   : > { %2387 = vst [vmem:[#allocation2 + $0x100] sm:$0xff] %v2323_v22  ;;  %v2174_v26 = vadd.f32 %v2173_v25, %v1884_v23  ;;  %v1886_v27 = vpop.f32.mrf.mxu0  ;;  %v731_v23 = vld [vmem:[#allocation2 + $0x70] sm:$0xff] }
 0x251   : > { %v2175_v28 = vpop.f32.mrf.mxu1 }
 0x252   : > { %v2324_v29 = vadd.f32 %v2174_v26, %v722_v24  ;;  %v1889_v30 = vpop.f32.mrf.mxu0 }
 0x253   : > { %v2178_v32 = vpop.f32.mrf.mxu1 }
 0x254   : > { %2388 = vst [vmem:[#allocation2 + $0xc8] sm:$0xff] %v2324_v29  ;;  %v2179_v33 = vadd.f32 %v2178_v32, %v1889_v30  ;;  %v1891_v34 = vpop.f32.mrf.mxu0  ;;  %v732_v30 = vld [vmem:[#allocation2 + $0x90] sm:$0xff] }
 0x255   : > { %v2180_v35 = vpop.f32.mrf.mxu1 }
 0x256   : > { %v2325_v36 = vadd.f32 %v2179_v33, %v723_v31  ;;  %v1892_v37 = vpop.f32.mrf.mxu0 }
 0x257   : > { %v2181_v39 = vpop.f32.mrf.mxu1 }
 0x258   : > { %2389 = vst [vmem:[#allocation2 + $0x40] sm:$0xff] %v2325_v36  ;;  %v2182_v40 = vadd.f32 %v2181_v39, %v1892_v37  ;;  %v1894_v41 = vpop.f32.mrf.mxu0  ;;  %v733_v37 = vld [vmem:[#allocation2 + $0x1d8] sm:$0xff] }
 0x259   : > { %v2183_v42 = vpop.f32.mrf.mxu1 }
 0x25a   : > { %v2326_v43 = vadd.f32 %v2182_v40, %v724_v38  ;;  %v1897_v44 = vpop.f32.mrf.mxu0 }
 0x25b   : > { %v2186_v46 = vpop.f32.mrf.mxu1 }
 0x25c   : > { %2390 = vst [vmem:[#allocation2 + $0x1f8] sm:$0xff] %v2326_v43  ;;  %v2187_v47 = vadd.f32 %v2186_v46, %v1897_v44  ;;  %v1899_v48 = vpop.f32.mrf.mxu0  ;;  %v734_v44 = vld [vmem:[#allocation2 + $0xd0] sm:$0xff] }
 0x25d   : > { %v2188_v49 = vpop.f32.mrf.mxu1 }
 0x25e   : > { %v2327_v50 = vadd.f32 %v2187_v47, %v725_v45  ;;  %v1900_v51 = vpop.f32.mrf.mxu0 }
 0x25f   : > { %v2189_v53 = vpop.f32.mrf.mxu1 }
 0x260   : > { %2391 = vst [vmem:[#allocation2 + $0x20] sm:$0xff] %v2327_v50  ;;  %v2190_v54 = vadd.f32 %v2189_v53, %v1900_v51  ;;  %v1902_v55 = vpop.f32.mrf.mxu0  ;;  %v735_v51 = vld [vmem:[#allocation2 + $0xb8] sm:$0xff] }
 0x261   : > { %v2191_v56 = vpop.f32.mrf.mxu1 }
 0x262   : > { %v2328_v57 = vadd.f32 %v2190_v54, %v726_v52  ;;  %v1905_v58 = vpop.f32.mrf.mxu0 }
 0x263   : > { %v2194_v60 = vpop.f32.mrf.mxu1 }
 0x264   : > { %2392 = vst [vmem:[#allocation2 + $0x128] sm:$0xff] %v2328_v57  ;;  %v2195_v61 = vadd.f32 %v2194_v60, %v1905_v58  ;;  %v1907_v62 = vpop.f32.mrf.mxu0  ;;  %v736_v58 = vld [vmem:[#allocation2 + $0x88] sm:$0xff] }
 0x265   : > { %v2196_v63 = vpop.f32.mrf.mxu1 }
 0x266   : > { %v2329_v0 = vadd.f32 %v2195_v61, %v727_v59  ;;  %v1908_v1 = vpop.f32.mrf.mxu0 }
 0x267   : > { %v2197_v3 = vpop.f32.mrf.mxu1 }
 0x268   : > { %2393 = vst [vmem:[#allocation2 + $0x1a0] sm:$0xff] %v2329_v0  ;;  %v2198_v4 = vadd.f32 %v2197_v3, %v1908_v1  ;;  %v1910_v5 = vpop.f32.mrf.mxu0  ;;  %v737_v1 = vld [vmem:[#allocation2 + $0xa8] sm:$0xff] }
 0x269   : > { %v2199_v6 = vpop.f32.mrf.mxu1 }
 0x26a   : > { %v2330_v7 = vadd.f32 %v2198_v4, %v728_v2  ;;  %v1913_v8 = vpop.f32.mrf.mxu0 }
 0x26b   : > { %v2202_v10 = vpop.f32.mrf.mxu1 }
 0x26c   : > { %2394 = vst [vmem:[#allocation2 + $0x1f0] sm:$0xff] %v2330_v7  ;;  %v2203_v11 = vadd.f32 %v2202_v10, %v1913_v8  ;;  %v1915_v12 = vpop.f32.mrf.mxu0  ;;  %v738_v8 = vld [vmem:[#allocation2 + $0x1c8] sm:$0xff] }
 0x26d   : > { %v2204_v13 = vpop.f32.mrf.mxu1 }
 0x26e   : > { %v2331_v14 = vadd.f32 %v2203_v11, %v729_v9  ;;  %v1916_v15 = vpop.f32.mrf.mxu0 }
 0x26f   : > { %v2205_v17 = vpop.f32.mrf.mxu1 }
 0x270   : > { %2395 = vst [vmem:[#allocation2 + $0xe8] sm:$0xff] %v2331_v14  ;;  %v2206_v18 = vadd.f32 %v2205_v17, %v1916_v15  ;;  %v1918_v19 = vpop.f32.mrf.mxu0  ;;  %v739_v15 = vld [vmem:[#allocation2 + $0x170] sm:$0xff] }
 0x271   : > { %v2207_v20 = vpop.f32.mrf.mxu1 }
 0x272   : > { %v2332_v21 = vadd.f32 %v2206_v18, %v730_v16  ;;  %v1921_v22 = vpop.f32.mrf.mxu0 }
 0x273   : > { %v2210_v24 = vpop.f32.mrf.mxu1 }
 0x274   : > { %2396 = vst [vmem:[#allocation2 + $0x78] sm:$0xff] %v2332_v21  ;;  %v2211_v25 = vadd.f32 %v2210_v24, %v1921_v22  ;;  %v1923_v26 = vpop.f32.mrf.mxu0  ;;  %v740_v22 = vld [vmem:[#allocation2 + $0x178] sm:$0xff] }
 0x275   : > { %v2212_v27 = vpop.f32.mrf.mxu1 }
 0x276   : > { %v2333_v28 = vadd.f32 %v2211_v25, %v731_v23  ;;  %v1924_v29 = vpop.f32.mrf.mxu0 }
 0x277   : > { %v2213_v31 = vpop.f32.mrf.mxu1 }
 0x278   : > { %2397 = vst [vmem:[#allocation2 + $0x70] sm:$0xff] %v2333_v28  ;;  %v2214_v32 = vadd.f32 %v2213_v31, %v1924_v29  ;;  %v1926_v33 = vpop.f32.mrf.mxu0  ;;  %v741_v29 = vld [vmem:[#allocation2 + $0x68] sm:$0xff] }
 0x279   : > { %v2215_v34 = vpop.f32.mrf.mxu1 }
 0x27a   : > { %v2334_v35 = vadd.f32 %v2214_v32, %v732_v30  ;;  %v1929_v36 = vpop.f32.mrf.mxu0 }
 0x27b   : > { %v2218_v38 = vpop.f32.mrf.mxu1 }
 0x27c   : > { %2398 = vst [vmem:[#allocation2 + $0x90] sm:$0xff] %v2334_v35  ;;  %v2219_v39 = vadd.f32 %v2218_v38, %v1929_v36  ;;  %v1931_v40 = vpop.f32.mrf.mxu0  ;;  %v742_v36 = vld [vmem:[#allocation2 + $0x190] sm:$0xff] }
 0x27d   : > { %v2220_v41 = vpop.f32.mrf.mxu1 }
 0x27e   : > { %v2335_v42 = vadd.f32 %v2219_v39, %v733_v37  ;;  %v1932_v43 = vpop.f32.mrf.mxu0 }
 0x27f   : > { %v2221_v45 = vpop.f32.mrf.mxu1 }
 0x280   : > { %2399 = vst [vmem:[#allocation2 + $0x1d8] sm:$0xff] %v2335_v42  ;;  %v2222_v46 = vadd.f32 %v2221_v45, %v1932_v43  ;;  %v1934_v47 = vpop.f32.mrf.mxu0  ;;  %v743_v43 = vld [vmem:[#allocation2 + $0x198] sm:$0xff] }
 0x281   : > { %v2223_v48 = vpop.f32.mrf.mxu1 }
 0x282   : > { %v2336_v49 = vadd.f32 %v2222_v46, %v734_v44  ;;  %v1937_v50 = vpop.f32.mrf.mxu0 }
 0x283   : > { %v2226_v52 = vpop.f32.mrf.mxu1 }
 0x284   : > { %2400 = vst [vmem:[#allocation2 + $0xd0] sm:$0xff] %v2336_v49  ;;  %v2227_v53 = vadd.f32 %v2226_v52, %v1937_v50  ;;  %v1939_v54 = vpop.f32.mrf.mxu0  ;;  %v744_v50 = vld [vmem:[#allocation2 + $0x38] sm:$0xff] }
 0x285   : > { %v2228_v55 = vpop.f32.mrf.mxu1 }
 0x286   : > { %v2337_v56 = vadd.f32 %v2227_v53, %v735_v51  ;;  %v1940_v57 = vpop.f32.mrf.mxu0 }
 0x287   : > { %v2229_v59 = vpop.f32.mrf.mxu1 }
 0x288   : > { %2401 = vst [vmem:[#allocation2 + $0xb8] sm:$0xff] %v2337_v56  ;;  %v2230_v60 = vadd.f32 %v2229_v59, %v1940_v57  ;;  %v1942_v61 = vpop.f32.mrf.mxu0  ;;  %v745_v57 = vld [vmem:[#allocation2 + $0xc0] sm:$0xff] }
 0x289   : > { %v2231_v62 = vpop.f32.mrf.mxu1 }
 0x28a   : > { %v2338_v63 = vadd.f32 %v2230_v60, %v736_v58  ;;  %v1945_v0 = vpop.f32.mrf.mxu0 }
 0x28b   : > { %v2234_v2 = vpop.f32.mrf.mxu1 }
 0x28c   : > { %2402 = vst [vmem:[#allocation2 + $0x88] sm:$0xff] %v2338_v63  ;;  %v2235_v3 = vadd.f32 %v2234_v2, %v1945_v0  ;;  %v1947_v4 = vpop.f32.mrf.mxu0  ;;  %v746_v0 = vld [vmem:[#allocation2 + $0x1c0] sm:$0xff] }
 0x28d   : > { %v2236_v5 = vpop.f32.mrf.mxu1 }
 0x28e   : > { %v2339_v6 = vadd.f32 %v2235_v3, %v737_v1  ;;  %v1948_v7 = vpop.f32.mrf.mxu0 }
 0x28f   : > { %v2237_v9 = vpop.f32.mrf.mxu1 }
 0x290   : > { %2403 = vst [vmem:[#allocation2 + $0xa8] sm:$0xff] %v2339_v6  ;;  %v2238_v10 = vadd.f32 %v2237_v9, %v1948_v7  ;;  %v1950_v11 = vpop.f32.mrf.mxu0  ;;  %v747_v7 = vld [vmem:[#allocation2 + $0x158] sm:$0xff] }
 0x291   : > { %v2239_v12 = vpop.f32.mrf.mxu1 }
 0x292   : > { %v2340_v13 = vadd.f32 %v2238_v10, %v738_v8  ;;  %v1953_v14 = vpop.f32.mrf.mxu0 }
 0x293   : > { %v2242_v16 = vpop.f32.mrf.mxu1 }
 0x294   : > { %2404 = vst [vmem:[#allocation2 + $0x1c8] sm:$0xff] %v2340_v13  ;;  %v2243_v17 = vadd.f32 %v2242_v16, %v1953_v14  ;;  %v1955_v18 = vpop.f32.mrf.mxu0  ;;  %v748_v14 = vld [vmem:[#allocation2 + $0x10] sm:$0xff] }
 0x295   : > { %v2244_v19 = vpop.f32.mrf.mxu1 }
 0x296   : > { %v2341_v20 = vadd.f32 %v2243_v17, %v739_v15  ;;  %v1956_v21 = vpop.f32.mrf.mxu0 }
 0x297   : > { %v2245_v23 = vpop.f32.mrf.mxu1 }
 0x298   : > { %2405 = vst [vmem:[#allocation2 + $0x170] sm:$0xff] %v2341_v20  ;;  %v2246_v24 = vadd.f32 %v2245_v23, %v1956_v21  ;;  %v1958_v25 = vpop.f32.mrf.mxu0  ;;  %v749_v21 = vld [vmem:[#allocation2 + $0x58] sm:$0xff] }
 0x299   : > { %v2247_v26 = vpop.f32.mrf.mxu1 }
 0x29a   : > { %v2342_v27 = vadd.f32 %v2246_v24, %v740_v22  ;;  %v1961_v28 = vpop.f32.mrf.mxu0 }
 0x29b   : > { %v2250_v30 = vpop.f32.mrf.mxu1 }
 0x29c   : > { %2406 = vst [vmem:[#allocation2 + $0x178] sm:$0xff] %v2342_v27  ;;  %v2251_v31 = vadd.f32 %v2250_v30, %v1961_v28  ;;  %v1963_v32 = vpop.f32.mrf.mxu0  ;;  %v750_v28 = vld [vmem:[#allocation2 + $0xa0] sm:$0xff] }
 0x29d   : > { %v2252_v33 = vpop.f32.mrf.mxu1 }
 0x29e   : > { %v2343_v34 = vadd.f32 %v2251_v31, %v741_v29  ;;  %v1964_v35 = vpop.f32.mrf.mxu0 }
 0x29f   : > { %v2253_v37 = vpop.f32.mrf.mxu1 }
 0x2a0   : > { %2407 = vst [vmem:[#allocation2 + $0x68] sm:$0xff] %v2343_v34  ;;  %v2254_v38 = vadd.f32 %v2253_v37, %v1964_v35  ;;  %v1966_v39 = vpop.f32.mrf.mxu0 }
 0x2a1   : > { %v2255_v40 = vpop.f32.mrf.mxu1 }
 0x2a2   : > { %v2344_v41 = vadd.f32 %v2254_v38, %v742_v36  ;;  %v1969_v42 = vpop.f32.mrf.mxu0 }
 0x2a3   : > { %v2258_v44 = vpop.f32.mrf.mxu1 }
 0x2a4   : > { %2408 = vst [vmem:[#allocation2 + $0x190] sm:$0xff] %v2344_v41  ;;  %v2259_v45 = vadd.f32 %v2258_v44, %v1969_v42  ;;  %v1971_v46 = vpop.f32.mrf.mxu0 }
 0x2a5   : > { %v2260_v47 = vpop.f32.mrf.mxu1 }
 0x2a6   : > { %v2345_v48 = vadd.f32 %v2259_v45, %v743_v43  ;;  %v1972_v49 = vpop.f32.mrf.mxu0 }
 0x2a7   : > { %v2261_v51 = vpop.f32.mrf.mxu1 }
 0x2a8   : > { %2409 = vst [vmem:[#allocation2 + $0x198] sm:$0xff] %v2345_v48  ;;  %v2262_v52 = vadd.f32 %v2261_v51, %v1972_v49  ;;  %v1974_v53 = vpop.f32.mrf.mxu0 }
 0x2a9   : > { %v2263_v54 = vpop.f32.mrf.mxu1 }
 0x2aa   : > { %v2346_v55 = vadd.f32 %v2262_v52, %v744_v50  ;;  %v1977_v56 = vpop.f32.mrf.mxu0 }
 0x2ab   : > { %v2266_v58 = vpop.f32.mrf.mxu1 }
 0x2ac   : > { %2410 = vst [vmem:[#allocation2 + $0x38] sm:$0xff] %v2346_v55  ;;  %v2267_v59 = vadd.f32 %v2266_v58, %v1977_v56  ;;  %v1979_v60 = vpop.f32.mrf.mxu0 }
 0x2ad   : > { %v2268_v61 = vpop.f32.mrf.mxu1 }
 0x2ae   : > { %v2347_v62 = vadd.f32 %v2267_v59, %v745_v57  ;;  %v1980_v63 = vpop.f32.mrf.mxu0 }
 0x2af   : > { %v2269_v1 = vpop.f32.mrf.mxu1 }
 0x2b0   : > { %2411 = vst [vmem:[#allocation2 + $0xc0] sm:$0xff] %v2347_v62  ;;  %v2270_v2 = vadd.f32 %v2269_v1, %v1980_v63  ;;  %v1982_v3 = vpop.f32.mrf.mxu0 }
 0x2b1   : > { %v2271_v4 = vpop.f32.mrf.mxu1 }
 0x2b2   : > { %v2348_v5 = vadd.f32 %v2270_v2, %v746_v0  ;;  %v1985_v6 = vpop.f32.mrf.mxu0 }
 0x2b3   : > { %v2274_v8 = vpop.f32.mrf.mxu1 }
 0x2b4   : > { %2412 = vst [vmem:[#allocation2 + $0x1c0] sm:$0xff] %v2348_v5  ;;  %v2275_v9 = vadd.f32 %v2274_v8, %v1985_v6  ;;  %v1987_v10 = vpop.f32.mrf.mxu0 }
 0x2b5   : > { %v2276_v11 = vpop.f32.mrf.mxu1 }
 0x2b6   : > { %v2349_v12 = vadd.f32 %v2275_v9, %v747_v7  ;;  %v1988_v13 = vpop.f32.mrf.mxu0 }
 0x2b7   : > { %v2277_v15 = vpop.f32.mrf.mxu1 }
 0x2b8   : > { %2413 = vst [vmem:[#allocation2 + $0x158] sm:$0xff] %v2349_v12  ;;  %v2278_v16 = vadd.f32 %v2277_v15, %v1988_v13  ;;  %v1990_v17 = vpop.f32.mrf.mxu0 }
 0x2b9   : > { %v2279_v18 = vpop.f32.mrf.mxu1 }
 0x2ba   : > { %v2350_v19 = vadd.f32 %v2278_v16, %v748_v14  ;;  %v1993_v20 = vpop.f32.mrf.mxu0 }
 0x2bb   : > { %v2282_v22 = vpop.f32.mrf.mxu1 }
 0x2bc   : > { %2414 = vst [vmem:[#allocation2 + $0x10] sm:$0xff] %v2350_v19  ;;  %v2283_v23 = vadd.f32 %v2282_v22, %v1993_v20  ;;  %v1995_v24 = vpop.f32.mrf.mxu0 }
 0x2bd   : > { %v2284_v25 = vpop.f32.mrf.mxu1 }
 0x2be   : > { %v2351_v26 = vadd.f32 %v2283_v23, %v749_v21  ;;  %v1996_v27 = vpop.f32.mrf.mxu0 }
 0x2bf   : > { %v2285_v29 = vpop.f32.mrf.mxu1 }
 0x2c0   : > { %2415 = vst [vmem:[#allocation2 + $0x58] sm:$0xff] %v2351_v26  ;;  %v2286_v30 = vadd.f32 %v2285_v29, %v1996_v27  ;;  %v1998_v31 = vpop.f32.mrf.mxu0 }
 0x2c1   : > { %v2287_v32 = vpop.f32.mrf.mxu1 }
 0x2c2   : > { %v2352_v33 = vadd.f32 %v2286_v30, %v750_v28 }
 0x2c4   : > { %2416 = vst [vmem:[#allocation2 + $0xa0] sm:$0xff] %v2352_v33 }
 0x2c5 PF: > { %p3521_p9 = scmp.ne.s32.totalorder %s4345_s7, 1 }
 0x2c7   : > { %2420 = sbr.rel (%p3521_p9) target bundleno = 1011 (0x3f3), region = 71 }
 0x2cc   : > { %v4273_v34 = vld [vmem:[%s5159_s4 + $0x38] sm:$0xff]   ;;  %v4274_v35 = vld [vmem:[%s5159_s4 + $0x30] sm:$0xff]   ;;  %v4275_v36 = vld [vmem:[%s5159_s4 + $0x28] sm:$0xff]  }
 0x2cd   : > { %3893 = vmatprep.subr.bf16.mxu0 %v4273_v34  ;;  %3973 = vmatprep.subr.bf16.mxu1 %v4273_v34  ;;  %v4276_v37 = vld [vmem:[%s5159_s4 + $0x20] sm:$0xff]   ;;  %v2421_v38 = vld [vmem:[#allocation2 + $0xb0] sm:$0xff]  ;;  %v2453_v40 = vld [vmem:[#allocation2 + $0x148] sm:$0xff] }
 0x2ce   : > { %3894 = vmatpush3.bf16.msra.mxu0 %v4273_v34  ;;  %3981 = vmatpush3.bf16.msra.mxu1 %v4273_v34  ;;  %v2422_v39 = vld [vmem:[#allocation2 + $0x1b0] sm:$0xff]  ;;  %v4277_v44 = vld [vmem:[%s5159_s4 + $0x18] sm:$0xff]   ;;  %v4279_v46 = vld [vmem:[%s5159_s4 + $0x8] sm:$0xff]  }
 0x2cf   : > { %3895 = vmatprep.subr.bf16.mxu0 %v4274_v35  ;;  %3974 = vmatprep.subr.bf16.mxu1 %v4274_v35  ;;  %v2485_v41 = vpack.c.bf16 %v2422_v39, %v2421_v38  ;;  %v2454_v42 = vld [vmem:[#allocation2 + $0x1d0] sm:$0xff]  ;;  %v4280_v47 = vld [vmem:[%s5159_s4] sm:$0xff]   ;;  %v2423_v48 = vld [vmem:[#allocation2 + $0xd8] sm:$0xff] }
 0x2d0   : > { %v2501_v43 = vpack.c.bf16 %v2454_v42, %v2453_v40  ;;  %v4278_v45 = vld [vmem:[%s5159_s4 + $0x10] sm:$0xff]   ;;  %v2424_v49 = vld [vmem:[#allocation2 + $0x18] sm:$0xff]  ;;  %v2455_v50 = vld [vmem:[#allocation2 + $0x100] sm:$0xff] }
 0x2d1   : > { %3909 = vmatprep.mubr.bf16.mxu0 %v2485_v41  ;;  %v2456_v51 = vld [vmem:[#allocation2 + $0xc8] sm:$0xff]  ;;  %v2425_v52 = vld [vmem:[#allocation2 + $0x50] sm:$0xff]  ;;  %v2457_v54 = vld [vmem:[#allocation2 + $0x40] sm:$0xff]  ;;  %v2486_v56 = vpack.c.bf16 %v2424_v49, %v2423_v48 }
 0x2d2   : > { %3896 = vmatpush3.bf16.msra.mxu0 %v4274_v35  ;;  %3982 = vmatpush3.bf16.msra.mxu1 %v4274_v35  ;;  %v2426_v53 = vld [vmem:[#allocation2 + $0x168] sm:$0xff]  ;;  %v2458_v55 = vld [vmem:[#allocation2 + $0x1f8] sm:$0xff]  ;;  %v2502_v57 = vpack.c.bf16 %v2456_v51, %v2455_v50  ;;  %v2427_v60 = vld [vmem:[#allocation2 + $0x130] sm:$0xff] }
 0x2d3   : > { %3897 = vmatprep.subr.bf16.mxu0 %v4275_v36  ;;  %3975 = vmatprep.subr.bf16.mxu1 %v4275_v36  ;;  %v2487_v58 = vpack.c.bf16 %v2426_v53, %v2425_v52  ;;  %v2503_v59 = vpack.c.bf16 %v2458_v55, %v2457_v54  ;;  %v2428_v61 = vld [vmem:[#allocation2 + $0x48] sm:$0xff]  ;;  %v2459_v62 = vld [vmem:[#allocation2 + $0x20] sm:$0xff]  ;;  %v2430_v1 = vld [vmem:[#allocation2 + $0x110] sm:$0xff] }
 0x2d4   : > { %3941 = vmatprep.mubr.bf16.mxu1 %v2501_v43  ;;  %v2460_v63 = vld [vmem:[#allocation2 + $0x128] sm:$0xff]  ;;  %v2429_v0 = vld [vmem:[#allocation2 + $0x180] sm:$0xff]  ;;  %v2462_v3 = vld [vmem:[#allocation2 + $0x1f0] sm:$0xff]  ;;  %v2488_v4 = vpack.c.bf16 %v2428_v61, %v2427_v60 }
 0x2d5   : > { %v2461_v2 = vld [vmem:[#allocation2 + $0x1a0] sm:$0xff]  ;;  %v2504_v5 = vpack.c.bf16 %v2460_v63, %v2459_v62  ;;  %v2489_v6 = vpack.c.bf16 %v2430_v1, %v2429_v0  ;;  %v2431_v8 = vld [vmem:[#allocation2 + $0x118] sm:$0xff]  ;;  %v2463_v10 = vld [vmem:[#allocation2 + $0xe8] sm:$0xff] }
 0x2d6   : > { %3898 = vmatpush3.bf16.msra.mxu0 %v4275_v36  ;;  %3983 = vmatpush3.bf16.msra.mxu1 %v4275_v36  ;;  %v2505_v7 = vpack.c.bf16 %v2462_v3, %v2461_v2  ;;  %v2432_v9 = vld [vmem:[#allocation2 + $0x98] sm:$0xff]  ;;  %v2433_v12 = vld [vmem:[#allocation2 + $0x120] sm:$0xff]  ;;  %v2434_v13 = vld [vmem:[#allocation2 + $0x150] sm:$0xff] }
 0x2d7   : > { %3899 = vmatprep.subr.bf16.mxu0 %v4276_v37  ;;  %3976 = vmatprep.subr.bf16.mxu1 %v4276_v37  ;;  %v2464_v11 = vld [vmem:[#allocation2 + $0x78] sm:$0xff]  ;;  %v2465_v14 = vld [vmem:[#allocation2 + $0x70] sm:$0xff]  ;;  %v2490_v16 = vpack.c.bf16 %v2432_v9, %v2431_v8  ;;  %v2491_v18 = vpack.c.bf16 %v2434_v13, %v2433_v12  ;;  %v2435_v20 = vld [vmem:[#allocation2 + $0x108] sm:$0xff] }
 0x2d8   : > { %v2466_v15 = vld [vmem:[#allocation2 + $0x90] sm:$0xff]  ;;  %v2506_v17 = vpack.c.bf16 %v2464_v11, %v2463_v10  ;;  %v2436_v21 = vld [vmem:[#allocation2 + $0x60] sm:$0xff]  ;;  %v2467_v22 = vld [vmem:[#allocation2 + $0x1d8] sm:$0xff] }
 0x2d9   : > { %v2507_v19 = vpack.c.bf16 %v2466_v15, %v2465_v14  ;;  %v2468_v23 = vld [vmem:[#allocation2 + $0xd0] sm:$0xff]  ;;  %v2437_v24 = vld [vmem:[#allocation2 + $0xe0] sm:$0xff]  ;;  %v2438_v25 = vld [vmem:[#allocation2 + $0x188] sm:$0xff]  ;;  %v2492_v28 = vpack.c.bf16 %v2436_v21, %v2435_v20 }
 0x2da   : > { %3900 = vmatpush3.bf16.msra.mxu0 %v4276_v37  ;;  %3984 = vmatpush3.bf16.msra.mxu1 %v4276_v37  ;;  %v2469_v26 = vld [vmem:[#allocation2 + $0xb8] sm:$0xff]  ;;  %v2470_v27 = vld [vmem:[#allocation2 + $0x88] sm:$0xff]  ;;  %v2508_v29 = vpack.c.bf16 %v2468_v23, %v2467_v22  ;;  %v2493_v30 = vpack.c.bf16 %v2438_v25, %v2437_v24  ;;  %v2440_v33 = vld [vmem:[#allocation2 + $0x140] sm:$0xff] }
 0x2db   : > { %3901 = vmatprep.subr.bf16.mxu0 %v4277_v44  ;;  %3977 = vmatprep.subr.bf16.mxu1 %v4277_v44  ;;  %v2509_v31 = vpack.c.bf16 %v2470_v27, %v2469_v26  ;;  %v2439_v32 = vld [vmem:[#allocation2 + $0x138] sm:$0xff]  ;;  %v2471_v34 = vld [vmem:[#allocation2 + $0xa8] sm:$0xff]  ;;  %v2441_v36 = vld [vmem:[#allocation2 + $0x80] sm:$0xff] }
 0x2dc   : > { %v2472_v35 = vld [vmem:[#allocation2 + $0x1c8] sm:$0xff]  ;;  %v2473_v38 = vld [vmem:[#allocation2 + $0x170] sm:$0xff]  ;;  %v2474_v39 = vld [vmem:[#allocation2 + $0x178] sm:$0xff]  ;;  %v2494_v40 = vpack.c.bf16 %v2440_v33, %v2439_v32 }
 0x2dd   : > { %v2442_v37 = vld [vmem:[#allocation2 + $0x1a8] sm:$0xff]  ;;  %v2510_v41 = vpack.c.bf16 %v2472_v35, %v2471_v34  ;;  %v2511_v43 = vpack.c.bf16 %v2474_v39, %v2473_v38  ;;  %v2446_v49 = vld [vmem:[#allocation2 + $0xf8] sm:$0xff]  ;;  %v2449_v60 = vld [vmem:[#allocation2 + $0x1e0] sm:$0xff] }
 0x2de   : > { %3902 = vmatpush3.bf16.msra.mxu0 %v4277_v44  ;;  %3985 = vmatpush3.bf16.msra.mxu1 %v4277_v44  ;;  %v2495_v42 = vpack.c.bf16 %v2442_v37, %v2441_v36  ;;  %v2443_v44 = vld [vmem:[#allocation2 + $0x1b8] sm:$0xff]  ;;  %v2445_v48 = vld [vmem:[#allocation2 + $0x1e8] sm:$0xff]  ;;  %v2450_v61 = vld [vmem:[#allocation2] sm:$0xff] }
 0x2df   : > { %3903 = vmatprep.subr.bf16.mxu0 %v4278_v45  ;;  %3978 = vmatprep.subr.bf16.mxu1 %v4278_v45  ;;  %v2477_v50 = vld [vmem:[#allocation2 + $0x198] sm:$0xff]  ;;  %v2497_v54 = vpack.c.bf16 %v2446_v49, %v2445_v48  ;;  %v2482_v63 = vld [vmem:[#allocation2 + $0x10] sm:$0xff]  ;;  %v2499_v2 = vpack.c.bf16 %v2450_v61, %v2449_v60  ;;  %v5037_v10 = vld [vmem:[%s5160_s5] ss:$0 sm:$0xff] }
 0x2e0   : > { %v2478_v51 = vld [vmem:[#allocation2 + $0x38] sm:$0xff] }
 0x2e1   : > { %v2513_v55 = vpack.c.bf16 %v2478_v51, %v2477_v50  ;;  %v2481_v62 = vld [vmem:[#allocation2 + $0x158] sm:$0xff] }
 0x2e2   : > { %3904 = vmatpush3.bf16.msra.mxu0 %v4278_v45  ;;  %3986 = vmatpush3.bf16.msra.mxu1 %v4278_v45  ;;  %v2444_v45 = vld [vmem:[#allocation2 + $0x28] sm:$0xff]  ;;  %v2515_v3 = vpack.c.bf16 %v2482_v63, %v2481_v62 }
 0x2e3   : > { %3905 = vmatprep.subr.bf16.mxu0 %v4279_v46  ;;  %3979 = vmatprep.subr.bf16.mxu1 %v4279_v46  ;;  %v2496_v52 = vpack.c.bf16 %v2444_v45, %v2443_v44 }
 0x2e6   : > { %3906 = vmatpush3.bf16.msra.mxu0 %v4279_v46  ;;  %3987 = vmatpush3.bf16.msra.mxu1 %v4279_v46  ;;  %v2475_v46 = vld [vmem:[#allocation2 + $0x68] sm:$0xff] }
 0x2e7   : > { %3907 = vmatprep.subr.bf16.mxu0 %v4280_v47  ;;  %3980 = vmatprep.subr.bf16.mxu1 %v4280_v47 }
 0x2ea   : > { %3908 = vmatpush3.bf16.msra.mxu0 %v4280_v47  ;;  %3988 = vmatpush3.bf16.msra.mxu1 %v4280_v47  ;;  %v2476_v47 = vld [vmem:[#allocation2 + $0x190] sm:$0xff] }
 0x2eb   : > { %v2512_v53 = vpack.c.bf16 %v2476_v47, %v2475_v46 }
 0x2ed   : > { %3910 = vmatmul.mubr.bf16.vlgmr.msra.gmra.mxu0 %v2486_v56  ;;  %3942 = vmatmul.mubr.bf16.vlgmr.msra.gmra.mxu1 %v2502_v57  ;;  %v2447_v56 = vld [vmem:[#allocation2 + $0x160] sm:$0xff]  ;;  %v2448_v57 = vld [vmem:[#allocation2 + $0x30] sm:$0xff] }
 0x2ee   : > { %3913 = vmatprep.mubr.bf16.mxu0 %v2487_v58  ;;  %3945 = vmatprep.mubr.bf16.mxu1 %v2503_v59  ;;  %v2479_v58 = vld [vmem:[#allocation2 + $0xc0] sm:$0xff]  ;;  %v2498_v0 = vpack.c.bf16 %v2448_v57, %v2447_v56 }
 0x2ef   : > { %v2480_v59 = vld [vmem:[#allocation2 + $0x1c0] sm:$0xff] }
 0x2f0   : > { %v2514_v1 = vpack.c.bf16 %v2480_v59, %v2479_v58 }
 0x2f5   : > { %3914 = vmatmul.mubr.bf16.gmra.mxu0 %v2488_v4  ;;  %3946 = vmatmul.mubr.bf16.gmra.mxu1 %v2504_v5  ;;  %v2451_v4 = vld [vmem:[#allocation2 + $0xf0] sm:$0xff]  ;;  %v2452_v5 = vld [vmem:[#allocation2 + $0x8] sm:$0xff] }
 0x2f6   : > { %3917 = vmatprep.mubr.bf16.mxu0 %v2489_v6  ;;  %3949 = vmatprep.mubr.bf16.mxu1 %v2505_v7  ;;  %v2483_v6 = vld [vmem:[#allocation2 + $0x58] sm:$0xff]  ;;  %v2484_v7 = vld [vmem:[#allocation2 + $0xa0] sm:$0xff]  ;;  %v2500_v8 = vpack.c.bf16 %v2452_v5, %v2451_v4 }
 0x2f7   : > { %v2516_v9 = vpack.c.bf16 %v2484_v7, %v2483_v6 }
 0x2fd   : > { %3918 = vmatmul.mubr.bf16.gmra.mxu0 %v2490_v16  ;;  %3950 = vmatmul.mubr.bf16.gmra.mxu1 %v2506_v17 }
 0x2fe   : > { %3921 = vmatprep.mubr.bf16.mxu0 %v2491_v18  ;;  %3953 = vmatprep.mubr.bf16.mxu1 %v2507_v19 }
 0x305   : > { %3922 = vmatmul.mubr.bf16.gmra.mxu0 %v2492_v28  ;;  %3954 = vmatmul.mubr.bf16.gmra.mxu1 %v2508_v29 }
 0x306   : > { %3925 = vmatprep.mubr.bf16.mxu0 %v2493_v30  ;;  %3957 = vmatprep.mubr.bf16.mxu1 %v2509_v31 }
 0x30d   : > { %3926 = vmatmul.mubr.bf16.gmra.mxu0 %v2494_v40  ;;  %3958 = vmatmul.mubr.bf16.gmra.mxu1 %v2510_v41 }
 0x30e   : > { %3929 = vmatprep.mubr.bf16.mxu0 %v2495_v42  ;;  %3961 = vmatprep.mubr.bf16.mxu1 %v2511_v43 }
 0x315   : > { %3930 = vmatmul.mubr.bf16.gmra.mxu0 %v2496_v52  ;;  %3962 = vmatmul.mubr.bf16.gmra.mxu1 %v2512_v53 }
 0x316   : > { %3933 = vmatprep.mubr.bf16.mxu0 %v2497_v54  ;;  %3965 = vmatprep.mubr.bf16.mxu1 %v2513_v55 }
 0x31d   : > { %3934 = vmatmul.mubr.bf16.gmra.mxu0 %v2498_v0  ;;  %3966 = vmatmul.mubr.bf16.gmra.mxu1 %v2514_v1 }
 0x31e   : > { %3937 = vmatprep.mubr.bf16.mxu0 %v2499_v2  ;;  %3969 = vmatprep.mubr.bf16.mxu1 %v2515_v3 }
 0x325   : > { %3938 = vmatmul.mubr.bf16.gmra.mxu0 %v2500_v8  ;;  %3970 = vmatmul.mubr.bf16.gmra.mxu1 %v2516_v9 }
 0x3ad   : > { %v3911_v11 = vpop.f32.mrf.mxu0  ;;  %v3943_v12 = vpop.f32.mrf.mxu1 }
 0x3ae   : > { %v2631_v13 = vadd.f32 %v3911_v11, %v5037_v10  ;;  %v2759_v14 = vadd.f32 %v3943_v12, %v5037_v10 }
 0x3af   : > { %v2622_v15 = vpop.f32.mrf.mxu0  ;;  %v2750_v16 = vpop.f32.mrf.mxu1 }
 0x3b0   : > { %v2623_v17 = vadd.f32 %v5037_v10, %v2622_v15  ;;  %v2751_v18 = vadd.f32 %v5037_v10, %v2750_v16  ;;  %v2879_v23 = vmax.f32 %v2631_v13, 0.0  ;;  %v2911_v24 = vmax.f32 %v2759_v14, 0.0 }
 0x3b1   : > { %v3912_v19 = vpop.f32.mrf.mxu0  ;;  %v3944_v20 = vpop.f32.mrf.mxu1 }
 0x3b2   : > { %v2634_v21 = vadd.f32 %v3912_v19, %v5037_v10  ;;  %v2762_v22 = vadd.f32 %v3944_v20, %v5037_v10  ;;  %v2877_v31 = vmax.f32 %v2623_v17, 0.0  ;;  %v2909_v32 = vmax.f32 %v2751_v18, 0.0 }
 0x3b3   : > { %v2625_v25 = vpop.f32.mrf.mxu0  ;;  %v2753_v26 = vpop.f32.mrf.mxu1 }
 0x3b4   : > { %v2880_v27 = vmax.f32 %v2634_v21, 0.0  ;;  %v2912_v28 = vmax.f32 %v2762_v22, 0.0  ;;  %v2626_v29 = vadd.f32 %v5037_v10, %v2625_v25  ;;  %v2754_v30 = vadd.f32 %v5037_v10, %v2753_v26 }
 0x3b5   : > { %v3915_v33 = vpop.f32.mrf.mxu0  ;;  %v3947_v34 = vpop.f32.mrf.mxu1 }
 0x3b6   : > { %v3670_v35 = vpack.c.bf16 %v2880_v27, %v2879_v23  ;;  %v3750_v36 = vpack.c.bf16 %v2912_v28, %v2911_v24  ;;  %v2878_v37 = vmax.f32 %v2626_v29, 0.0  ;;  %v2910_v38 = vmax.f32 %v2754_v30, 0.0 }
 0x3b7   : > { %v2647_v39 = vadd.f32 %v3915_v33, %v5037_v10  ;;  %v2775_v40 = vadd.f32 %v3947_v34, %v5037_v10  ;;  %v2638_v41 = vpop.f32.mrf.mxu0  ;;  %v2766_v42 = vpop.f32.mrf.mxu1 }
 0x3b8   : > { %3822 = vst [vmem:[%s4738_s15 + $0x8] sm:$0xff] %v3670_v35   ;;  %3838 = vst [vmem:[%s4738_s15 + $0x88] sm:$0xff] %v3750_v36   ;;  %v3665_v43 = vpack.c.bf16 %v2878_v37, %v2877_v31  ;;  %v3745_v44 = vpack.c.bf16 %v2910_v38, %v2909_v32  ;;  %v2639_v45 = vadd.f32 %v5037_v10, %v2638_v41 }
 0x3b9   : > { %v2767_v46 = vadd.f32 %v5037_v10, %v2766_v42  ;;  %v3916_v47 = vpop.f32.mrf.mxu0  ;;  %v3948_v48 = vpop.f32.mrf.mxu1  ;;  %v2883_v51 = vmax.f32 %v2647_v39, 0.0  ;;  %v2915_v52 = vmax.f32 %v2775_v40, 0.0 }
 0x3ba   : > { %3666 = vst [vmem:[%s4738_s15] sm:$0xff] %v3665_v43   ;;  %3837 = vst [vmem:[%s4738_s15 + $0x80] sm:$0xff] %v3745_v44   ;;  %v2650_v49 = vadd.f32 %v3916_v47, %v5037_v10  ;;  %v2778_v50 = vadd.f32 %v3948_v48, %v5037_v10  ;;  %v2881_v59 = vmax.f32 %v2639_v45, 0.0 }
 0x3bb   : > { %v2641_v53 = vpop.f32.mrf.mxu0  ;;  %v2769_v54 = vpop.f32.mrf.mxu1  ;;  %v2913_v60 = vmax.f32 %v2767_v46, 0.0 }
 0x3bc   : > { %v2884_v55 = vmax.f32 %v2650_v49, 0.0  ;;  %v2916_v56 = vmax.f32 %v2778_v50, 0.0  ;;  %v2642_v57 = vadd.f32 %v5037_v10, %v2641_v53  ;;  %v2770_v58 = vadd.f32 %v5037_v10, %v2769_v54 }
 0x3bd   : > { %v3919_v61 = vpop.f32.mrf.mxu0  ;;  %v3951_v62 = vpop.f32.mrf.mxu1 }
 0x3be   : > { %v3680_v63 = vpack.c.bf16 %v2884_v55, %v2883_v51  ;;  %v3760_v0 = vpack.c.bf16 %v2916_v56, %v2915_v52  ;;  %v2882_v1 = vmax.f32 %v2642_v57, 0.0  ;;  %v2914_v2 = vmax.f32 %v2770_v58, 0.0 }
 0x3bf   : > { %v2663_v3 = vadd.f32 %v3919_v61, %v5037_v10  ;;  %v2791_v4 = vadd.f32 %v3951_v62, %v5037_v10  ;;  %v2654_v5 = vpop.f32.mrf.mxu0  ;;  %v2782_v6 = vpop.f32.mrf.mxu1 }
 0x3c0   : > { %3824 = vst [vmem:[%s4738_s15 + $0x18] sm:$0xff] %v3680_v63   ;;  %3840 = vst [vmem:[%s4738_s15 + $0x98] sm:$0xff] %v3760_v0   ;;  %v3675_v7 = vpack.c.bf16 %v2882_v1, %v2881_v59  ;;  %v3755_v8 = vpack.c.bf16 %v2914_v2, %v2913_v60  ;;  %v2655_v9 = vadd.f32 %v5037_v10, %v2654_v5 }
 0x3c1   : > { %v2783_v11 = vadd.f32 %v5037_v10, %v2782_v6  ;;  %v3920_v12 = vpop.f32.mrf.mxu0  ;;  %v3952_v13 = vpop.f32.mrf.mxu1  ;;  %v2887_v16 = vmax.f32 %v2663_v3, 0.0  ;;  %v2919_v17 = vmax.f32 %v2791_v4, 0.0 }
 0x3c2   : > { %3823 = vst [vmem:[%s4738_s15 + $0x10] sm:$0xff] %v3675_v7   ;;  %3839 = vst [vmem:[%s4738_s15 + $0x90] sm:$0xff] %v3755_v8   ;;  %v2666_v14 = vadd.f32 %v3920_v12, %v5037_v10  ;;  %v2794_v15 = vadd.f32 %v3952_v13, %v5037_v10  ;;  %v2885_v24 = vmax.f32 %v2655_v9, 0.0 }
 0x3c3   : > { %v2657_v18 = vpop.f32.mrf.mxu0  ;;  %v2785_v19 = vpop.f32.mrf.mxu1  ;;  %v2917_v25 = vmax.f32 %v2783_v11, 0.0 }
 0x3c4   : > { %v2888_v20 = vmax.f32 %v2666_v14, 0.0  ;;  %v2920_v21 = vmax.f32 %v2794_v15, 0.0  ;;  %v2658_v22 = vadd.f32 %v5037_v10, %v2657_v18  ;;  %v2786_v23 = vadd.f32 %v5037_v10, %v2785_v19 }
 0x3c5   : > { %v3923_v26 = vpop.f32.mrf.mxu0  ;;  %v3955_v27 = vpop.f32.mrf.mxu1 }
 0x3c6   : > { %v3690_v28 = vpack.c.bf16 %v2888_v20, %v2887_v16  ;;  %v3770_v29 = vpack.c.bf16 %v2920_v21, %v2919_v17  ;;  %v2886_v30 = vmax.f32 %v2658_v22, 0.0  ;;  %v2918_v31 = vmax.f32 %v2786_v23, 0.0 }
 0x3c7   : > { %v2679_v32 = vadd.f32 %v3923_v26, %v5037_v10  ;;  %v2807_v33 = vadd.f32 %v3955_v27, %v5037_v10  ;;  %v2670_v34 = vpop.f32.mrf.mxu0  ;;  %v2798_v35 = vpop.f32.mrf.mxu1 }
 0x3c8   : > { %3826 = vst [vmem:[%s4738_s15 + $0x28] sm:$0xff] %v3690_v28   ;;  %3842 = vst [vmem:[%s4738_s15 + $0xa8] sm:$0xff] %v3770_v29   ;;  %v3685_v36 = vpack.c.bf16 %v2886_v30, %v2885_v24  ;;  %v3765_v37 = vpack.c.bf16 %v2918_v31, %v2917_v25  ;;  %v2671_v38 = vadd.f32 %v5037_v10, %v2670_v34 }
 0x3c9   : > { %v2799_v39 = vadd.f32 %v5037_v10, %v2798_v35  ;;  %v3924_v40 = vpop.f32.mrf.mxu0  ;;  %v3956_v41 = vpop.f32.mrf.mxu1  ;;  %v2891_v44 = vmax.f32 %v2679_v32, 0.0  ;;  %v2923_v45 = vmax.f32 %v2807_v33, 0.0 }
 0x3ca   : > { %3825 = vst [vmem:[%s4738_s15 + $0x20] sm:$0xff] %v3685_v36   ;;  %3841 = vst [vmem:[%s4738_s15 + $0xa0] sm:$0xff] %v3765_v37   ;;  %v2682_v42 = vadd.f32 %v3924_v40, %v5037_v10  ;;  %v2810_v43 = vadd.f32 %v3956_v41, %v5037_v10  ;;  %v2889_v52 = vmax.f32 %v2671_v38, 0.0 }
 0x3cb   : > { %v2673_v46 = vpop.f32.mrf.mxu0  ;;  %v2801_v47 = vpop.f32.mrf.mxu1  ;;  %v2921_v53 = vmax.f32 %v2799_v39, 0.0 }
 0x3cc   : > { %v2892_v48 = vmax.f32 %v2682_v42, 0.0  ;;  %v2924_v49 = vmax.f32 %v2810_v43, 0.0  ;;  %v2674_v50 = vadd.f32 %v5037_v10, %v2673_v46  ;;  %v2802_v51 = vadd.f32 %v5037_v10, %v2801_v47 }
 0x3cd   : > { %v3927_v54 = vpop.f32.mrf.mxu0  ;;  %v3959_v55 = vpop.f32.mrf.mxu1 }
 0x3ce   : > { %v3700_v56 = vpack.c.bf16 %v2892_v48, %v2891_v44  ;;  %v3780_v57 = vpack.c.bf16 %v2924_v49, %v2923_v45  ;;  %v2890_v58 = vmax.f32 %v2674_v50, 0.0  ;;  %v2922_v59 = vmax.f32 %v2802_v51, 0.0 }
 0x3cf   : > { %v2695_v60 = vadd.f32 %v3927_v54, %v5037_v10  ;;  %v2823_v61 = vadd.f32 %v3959_v55, %v5037_v10  ;;  %v2686_v62 = vpop.f32.mrf.mxu0  ;;  %v2814_v63 = vpop.f32.mrf.mxu1 }
 0x3d0   : > { %3828 = vst [vmem:[%s4738_s15 + $0x38] sm:$0xff] %v3700_v56   ;;  %3844 = vst [vmem:[%s4738_s15 + $0xb8] sm:$0xff] %v3780_v57   ;;  %v3695_v0 = vpack.c.bf16 %v2890_v58, %v2889_v52  ;;  %v3775_v1 = vpack.c.bf16 %v2922_v59, %v2921_v53  ;;  %v2687_v2 = vadd.f32 %v5037_v10, %v2686_v62 }
 0x3d1   : > { %v2815_v3 = vadd.f32 %v5037_v10, %v2814_v63  ;;  %v3928_v4 = vpop.f32.mrf.mxu0  ;;  %v3960_v5 = vpop.f32.mrf.mxu1  ;;  %v2895_v8 = vmax.f32 %v2695_v60, 0.0  ;;  %v2927_v9 = vmax.f32 %v2823_v61, 0.0 }
 0x3d2   : > { %3827 = vst [vmem:[%s4738_s15 + $0x30] sm:$0xff] %v3695_v0   ;;  %3843 = vst [vmem:[%s4738_s15 + $0xb0] sm:$0xff] %v3775_v1   ;;  %v2698_v6 = vadd.f32 %v3928_v4, %v5037_v10  ;;  %v2826_v7 = vadd.f32 %v3960_v5, %v5037_v10  ;;  %v2893_v17 = vmax.f32 %v2687_v2, 0.0 }
 0x3d3   : > { %v2689_v11 = vpop.f32.mrf.mxu0  ;;  %v2817_v12 = vpop.f32.mrf.mxu1  ;;  %v2925_v18 = vmax.f32 %v2815_v3, 0.0 }
 0x3d4   : > { %v2896_v13 = vmax.f32 %v2698_v6, 0.0  ;;  %v2928_v14 = vmax.f32 %v2826_v7, 0.0  ;;  %v2690_v15 = vadd.f32 %v5037_v10, %v2689_v11  ;;  %v2818_v16 = vadd.f32 %v5037_v10, %v2817_v12 }
 0x3d5   : > { %v3931_v19 = vpop.f32.mrf.mxu0  ;;  %v3963_v20 = vpop.f32.mrf.mxu1 }
 0x3d6   : > { %v3710_v21 = vpack.c.bf16 %v2896_v13, %v2895_v8  ;;  %v3790_v22 = vpack.c.bf16 %v2928_v14, %v2927_v9  ;;  %v2894_v23 = vmax.f32 %v2690_v15, 0.0  ;;  %v2926_v24 = vmax.f32 %v2818_v16, 0.0 }
 0x3d7   : > { %v2711_v25 = vadd.f32 %v3931_v19, %v5037_v10  ;;  %v2839_v26 = vadd.f32 %v3963_v20, %v5037_v10  ;;  %v2702_v27 = vpop.f32.mrf.mxu0  ;;  %v2830_v28 = vpop.f32.mrf.mxu1 }
 0x3d8   : > { %3830 = vst [vmem:[%s4738_s15 + $0x48] sm:$0xff] %v3710_v21   ;;  %3846 = vst [vmem:[%s4738_s15 + $0xc8] sm:$0xff] %v3790_v22   ;;  %v3705_v29 = vpack.c.bf16 %v2894_v23, %v2893_v17  ;;  %v3785_v30 = vpack.c.bf16 %v2926_v24, %v2925_v18  ;;  %v2703_v31 = vadd.f32 %v5037_v10, %v2702_v27 }
 0x3d9   : > { %v2831_v32 = vadd.f32 %v5037_v10, %v2830_v28  ;;  %v3932_v33 = vpop.f32.mrf.mxu0  ;;  %v3964_v34 = vpop.f32.mrf.mxu1  ;;  %v2899_v37 = vmax.f32 %v2711_v25, 0.0  ;;  %v2931_v38 = vmax.f32 %v2839_v26, 0.0 }
 0x3da   : > { %3829 = vst [vmem:[%s4738_s15 + $0x40] sm:$0xff] %v3705_v29   ;;  %3845 = vst [vmem:[%s4738_s15 + $0xc0] sm:$0xff] %v3785_v30   ;;  %v2714_v35 = vadd.f32 %v3932_v33, %v5037_v10  ;;  %v2842_v36 = vadd.f32 %v3964_v34, %v5037_v10  ;;  %v2897_v45 = vmax.f32 %v2703_v31, 0.0 }
 0x3db   : > { %v2705_v39 = vpop.f32.mrf.mxu0  ;;  %v2833_v40 = vpop.f32.mrf.mxu1  ;;  %v2929_v46 = vmax.f32 %v2831_v32, 0.0 }
 0x3dc   : > { %v2900_v41 = vmax.f32 %v2714_v35, 0.0  ;;  %v2932_v42 = vmax.f32 %v2842_v36, 0.0  ;;  %v2706_v43 = vadd.f32 %v5037_v10, %v2705_v39  ;;  %v2834_v44 = vadd.f32 %v5037_v10, %v2833_v40 }
 0x3dd   : > { %v3935_v47 = vpop.f32.mrf.mxu0  ;;  %v3967_v48 = vpop.f32.mrf.mxu1 }
 0x3de   : > { %v3720_v49 = vpack.c.bf16 %v2900_v41, %v2899_v37  ;;  %v3800_v50 = vpack.c.bf16 %v2932_v42, %v2931_v38  ;;  %v2898_v51 = vmax.f32 %v2706_v43, 0.0  ;;  %v2930_v52 = vmax.f32 %v2834_v44, 0.0 }
 0x3df   : > { %v2727_v53 = vadd.f32 %v3935_v47, %v5037_v10  ;;  %v2855_v54 = vadd.f32 %v3967_v48, %v5037_v10  ;;  %v2718_v55 = vpop.f32.mrf.mxu0  ;;  %v2846_v56 = vpop.f32.mrf.mxu1 }
 0x3e0   : > { %3832 = vst [vmem:[%s4738_s15 + $0x58] sm:$0xff] %v3720_v49   ;;  %3848 = vst [vmem:[%s4738_s15 + $0xd8] sm:$0xff] %v3800_v50   ;;  %v3715_v57 = vpack.c.bf16 %v2898_v51, %v2897_v45  ;;  %v3795_v58 = vpack.c.bf16 %v2930_v52, %v2929_v46  ;;  %v2719_v59 = vadd.f32 %v5037_v10, %v2718_v55 }
 0x3e1   : > { %v2847_v60 = vadd.f32 %v5037_v10, %v2846_v56  ;;  %v3936_v61 = vpop.f32.mrf.mxu0  ;;  %v3968_v62 = vpop.f32.mrf.mxu1  ;;  %v2903_v1 = vmax.f32 %v2727_v53, 0.0  ;;  %v2935_v2 = vmax.f32 %v2855_v54, 0.0 }
 0x3e2   : > { %3831 = vst [vmem:[%s4738_s15 + $0x50] sm:$0xff] %v3715_v57   ;;  %3847 = vst [vmem:[%s4738_s15 + $0xd0] sm:$0xff] %v3795_v58   ;;  %v2730_v63 = vadd.f32 %v3936_v61, %v5037_v10  ;;  %v2858_v0 = vadd.f32 %v3968_v62, %v5037_v10  ;;  %v2901_v9 = vmax.f32 %v2719_v59, 0.0 }
 0x3e3   : > { %v2721_v3 = vpop.f32.mrf.mxu0  ;;  %v2849_v4 = vpop.f32.mrf.mxu1  ;;  %v2933_v11 = vmax.f32 %v2847_v60, 0.0 }
 0x3e4   : > { %v2904_v5 = vmax.f32 %v2730_v63, 0.0  ;;  %v2936_v6 = vmax.f32 %v2858_v0, 0.0  ;;  %v2722_v7 = vadd.f32 %v5037_v10, %v2721_v3  ;;  %v2850_v8 = vadd.f32 %v5037_v10, %v2849_v4 }
 0x3e5   : > { %v3939_v12 = vpop.f32.mrf.mxu0  ;;  %v3971_v13 = vpop.f32.mrf.mxu1 }
 0x3e6   : > { %v3730_v14 = vpack.c.bf16 %v2904_v5, %v2903_v1  ;;  %v3810_v15 = vpack.c.bf16 %v2936_v6, %v2935_v2  ;;  %v2902_v16 = vmax.f32 %v2722_v7, 0.0  ;;  %v2934_v17 = vmax.f32 %v2850_v8, 0.0 }
 0x3e7   : > { %v2743_v18 = vadd.f32 %v3939_v12, %v5037_v10  ;;  %v2871_v19 = vadd.f32 %v3971_v13, %v5037_v10  ;;  %v2734_v20 = vpop.f32.mrf.mxu0  ;;  %v2862_v21 = vpop.f32.mrf.mxu1 }
 0x3e8   : > { %3834 = vst [vmem:[%s4738_s15 + $0x68] sm:$0xff] %v3730_v14   ;;  %3850 = vst [vmem:[%s4738_s15 + $0xe8] sm:$0xff] %v3810_v15   ;;  %v3725_v22 = vpack.c.bf16 %v2902_v16, %v2901_v9  ;;  %v3805_v23 = vpack.c.bf16 %v2934_v17, %v2933_v11  ;;  %v2735_v24 = vadd.f32 %v5037_v10, %v2734_v20 }
 0x3e9   : > { %v2863_v25 = vadd.f32 %v5037_v10, %v2862_v21  ;;  %v3940_v26 = vpop.f32.mrf.mxu0  ;;  %v3972_v27 = vpop.f32.mrf.mxu1  ;;  %v2907_v30 = vmax.f32 %v2743_v18, 0.0  ;;  %v2939_v31 = vmax.f32 %v2871_v19, 0.0 }
 0x3ea   : > { %3833 = vst [vmem:[%s4738_s15 + $0x60] sm:$0xff] %v3725_v22   ;;  %3849 = vst [vmem:[%s4738_s15 + $0xe0] sm:$0xff] %v3805_v23   ;;  %v2746_v28 = vadd.f32 %v3940_v26, %v5037_v10  ;;  %v2874_v29 = vadd.f32 %v3972_v27, %v5037_v10  ;;  %v2905_v38 = vmax.f32 %v2735_v24, 0.0 }
 0x3eb   : > { %v2737_v32 = vpop.f32.mrf.mxu0  ;;  %v2865_v33 = vpop.f32.mrf.mxu1  ;;  %v2937_v39 = vmax.f32 %v2863_v25, 0.0 }
 0x3ec   : > { %v2908_v34 = vmax.f32 %v2746_v28, 0.0  ;;  %v2940_v35 = vmax.f32 %v2874_v29, 0.0  ;;  %v2738_v36 = vadd.f32 %v5037_v10, %v2737_v32  ;;  %v2866_v37 = vadd.f32 %v5037_v10, %v2865_v33 }
 0x3ee   : > { %v3740_v40 = vpack.c.bf16 %v2908_v34, %v2907_v30  ;;  %v3820_v41 = vpack.c.bf16 %v2940_v35, %v2939_v31  ;;  %v2906_v42 = vmax.f32 %v2738_v36, 0.0  ;;  %v2938_v43 = vmax.f32 %v2866_v37, 0.0 }
 0x3f0   : > { %3836 = vst [vmem:[%s4738_s15 + $0x78] sm:$0xff] %v3740_v40   ;;  %3852 = vst [vmem:[%s4738_s15 + $0xf8] sm:$0xff] %v3820_v41   ;;  %v3735_v44 = vpack.c.bf16 %v2906_v42, %v2905_v38  ;;  %v3815_v45 = vpack.c.bf16 %v2938_v43, %v2937_v39 }
 0x3f2   : > { %3835 = vst [vmem:[%s4738_s15 + $0x70] sm:$0xff] %v3735_v44   ;;  %3851 = vst [vmem:[%s4738_s15 + $0xf0] sm:$0xff] %v3815_v45  }
 0x3f3 PF: > { %s26_s11 = sadd.s32 1, %s4361_s11   ;;  %s5163_s1 = smov %s4341_s30 }
 0x3f4   : > { %p23_p10 = scmp.ge.s32.totalorder %s26_s11, 6   ;;  %s5164_s30 = smov %s4463_s0 }
 0x3f5   : > { %s5165_s7 = smov %s4353_s9  ;;  %s5166_s8 = smov %s4357_s10 }
 0x3f6   : > { %s5167_s9 = smov %s5170_s12  ;;  %s5168_s10 = smov %s5174_s13 }
 0x3f7   :  { %25 = sbr.rel (!%p23_p10) target bundleno = 29 (0x1d), region = 107 }

// kernel: gnn_forward.5
= control target key start
LH: loop header
LB: loop body
LE: loop exit
PB: predicated region body
PF: predicated region fallthrough
CT: control target
= control target key end

     0   :  { %v387_v1 = vmov 0.0   ;;  %vm388_vm0 = vmmov 0   ;;  %s491_s0 = inlined_call_operand.vmem [shape: f32[2,8,128], index: 0, kind: input, shape index: {}]   ;;  %s492_s1 = inlined_call_operand.vmem [shape: f32[8,128], index: 1, kind: input, shape index: {}]   ;;  %s493_s2 = inlined_call_operand.vmem [shape: bf16[128,128], index: 2, kind: input, shape index: {}]   ;;  %s494_s3 = inlined_call_operand.vmem [shape: f32[1,128], index: 3, kind: input, shape index: {}]   ;;  %s495_s4 = inlined_call_operand.vmem [shape: bf16[128,128], index: 4, kind: input, shape index: {}]   ;;  %s496_s5 = inlined_call_operand.vmem [shape: f32[1,128], index: 5, kind: input, shape index: {}]   ;;  %s497_s6 = inlined_call_operand.hbm [shape: f32[8,128], index: 6, kind: output, shape index: {}]  }
   0x1   :  { %v349_v0 = vld [vmem:[%s493_s2 + $0x38] sm:$0xff]   ;;  %306 = vmatprep.subr.bf16.mxu0 %v387_v1  ;;  %326 = vmatprep.subr.bf16.mxu1 %v387_v1  ;;  %v350_v2 = vld [vmem:[%s493_s2 + $0x30] sm:$0xff]   ;;  %v351_v3 = vld [vmem:[%s493_s2 + $0x28] sm:$0xff]  }
   0x2   :  { %307 = vmatpush3.bf16.msra.mxu0 %v349_v0  ;;  %322 = vmatprep.mubr.msk.bf16.mxu0 %vm388_vm0, %v387_v1  ;;  %v357_v4 = vld [vmem:[%s495_s4 + $0x38] sm:$0xff]   ;;  %v352_v5 = vld [vmem:[%s493_s2 + $0x20] sm:$0xff]   ;;  %v358_v6 = vld [vmem:[%s495_s4 + $0x30] sm:$0xff]  }
   0x3   :  { %308 = vmatprep.subr.bf16.mxu0 %v387_v1  ;;  %342 = vmatprep.mubr.msk.bf16.mxu1 %vm388_vm0, %v387_v1  ;;  %v353_v7 = vld [vmem:[%s493_s2 + $0x18] sm:$0xff]   ;;  %v359_v8 = vld [vmem:[%s495_s4 + $0x28] sm:$0xff]  }
   0x4   :  { %327 = vmatpush3.bf16.msra.mxu1 %v357_v4 }
   0x5   :  { %328 = vmatprep.subr.bf16.mxu1 %v387_v1 }
   0x6   :  { %309 = vmatpush3.bf16.msra.mxu0 %v350_v2 }
   0x7   :  { %310 = vmatprep.subr.bf16.mxu0 %v387_v1 }
   0x8   :  { %329 = vmatpush3.bf16.msra.mxu1 %v358_v6 }
   0x9   :  { %330 = vmatprep.subr.bf16.mxu1 %v387_v1 }
   0xa   :  { %311 = vmatpush3.bf16.msra.mxu0 %v351_v3 }
   0xb   :  { %312 = vmatprep.subr.bf16.mxu0 %v387_v1 }
   0xe   :  { %313 = vmatpush3.bf16.msra.mxu0 %v352_v5 }
   0xf   :  { %314 = vmatprep.subr.bf16.mxu0 %v387_v1 }
  0x10   :  { %11 = vsyncpa [#allocation3], 0  ;;  %v354_v9 = vld [vmem:[%s493_s2 + $0x10] sm:$0xff]   ;;  %v25_v10 = vld [vmem:[%s491_s0] sm:$0xff]  ;;  %331 = vmatpush3.bf16.msra.mxu1 %v359_v8  ;;  %s389_s12 = smov [#allocation2]  }
  0x11   :  { %v26_v11 = vld [vmem:[%s491_s0 + $0x8] sm:$0xff]  ;;  %v360_v12 = vld [vmem:[%s495_s4 + $0x20] sm:$0xff]   ;;  %332 = vmatprep.subr.bf16.mxu1 %v387_v1  ;;  %v361_v16 = vld [vmem:[%s495_s4 + $0x18] sm:$0xff]   ;;  %s262_s13 = sshll.u32 %s389_s12, 4  ;;  %s263_s13 = int_to_ptr.vmem [resolvable:$true] %s262_s13 }
  0x12   :  { %315 = vmatpush3.bf16.msra.mxu0 %v353_v7  ;;  %v27_v13 = vadd.f32 %v26_v11, %v25_v10  ;;  %v355_v14 = vld [vmem:[%s493_s2 + $0x8] sm:$0xff]   ;;  %v28_v15 = vld [vmem:[%s492_s1] sm:$0xff]  ;;  %v362_v19 = vld [vmem:[%s495_s4 + $0x10] sm:$0xff]   ;;  %p370_p1 = scmp.lt.s32.totalorder %s263_s13, %s263_s13 }
  0x13   :  { %316 = vmatprep.subr.bf16.mxu0 %v387_v1  ;;  %v356_v18 = vld [vmem:[%s493_s2] sm:$0xff]   ;;  %v363_v21 = vld [vmem:[%s495_s4 + $0x8] sm:$0xff]  }
  0x14   :  { %333 = vmatpush3.bf16.msra.mxu1 %v360_v12  ;;  %v29_v17 = vmul.f32 %v28_v15, %v27_v13  ;;  %v364_v22 = vld [vmem:[%s495_s4] sm:$0xff]  }
  0x15   :  { %334 = vmatprep.subr.bf16.mxu1 %v387_v1  ;;  %v270_v23 = vld [vmem:[%s494_s3] ss:$0 sm:$0xff]  ;;  %s365_s3 = scalar_lea.vmem %s263_s13, 128 }
  0x16   :  { %317 = vmatpush3.bf16.msra.mxu0 %v354_v9  ;;  %v30_v20 = vpack.c.bf16 %v29_v17, %v29_v17  ;;  %v279_v31 = vld [vmem:[%s496_s5] ss:$0 sm:$0xff]  ;;  %p366_p0 = scmp.ne.s32.totalorder %s263_s13, %s365_s3  ;;  %p371_p2 = scmp.lt.s32.totalorder %s365_s3, %s365_s3 }
  0x17   :  { %318 = vmatprep.subr.bf16.mxu0 %v387_v1 }
  0x18   :  { %335 = vmatpush3.bf16.msra.mxu1 %v361_v16  ;;  %p372_p3 = por %p371_p2, %p370_p1 }
  0x19   :  { %336 = vmatprep.subr.bf16.mxu1 %v387_v1 }
  0x1a   :  { %319 = vmatpush3.bf16.msra.mxu0 %v355_v14  ;;  %p373_p4 = pnand %p372_p3, %p366_p0 }
  0x1b   :  { %320 = vmatprep.subr.bf16.mxu0 %v387_v1 }
  0x1c   :  { %337 = vmatpush3.bf16.msra.mxu1 %v362_v19 }
  0x1d   :  { %338 = vmatprep.subr.bf16.mxu1 %v387_v1 }
  0x1e   :  { %321 = vmatpush3.bf16.msra.mxu0 %v356_v18 }
  0x20   :  { %339 = vmatpush3.bf16.msra.mxu1 %v363_v21 }
  0x21   :  { %323 = vmatmul.mubr.bf16.vlgmr.msra.gmra.mxu0 %v30_v20  ;;  %340 = vmatprep.subr.bf16.mxu1 %v387_v1 }
  0x24   :  { %341 = vmatpush3.bf16.msra.mxu1 %v364_v22 }
  0xe1   :  { %v136_v24 = vpop.f32.mrf.mxu0 }
  0xe2   :  { %v137_v25 = vadd.f32 %v270_v23, %v136_v24 }
  0xe3   :  { %v324_v26 = vpop.f32.mrf.mxu0 }
  0xe4   :  { %v142_v27 = vmax.f32 %v137_v25, 0.0 }
  0xe5   :  { %v139_v28 = vpop.f32.mrf.mxu0 }
  0xe6   :  { %v143_v29 = vpack.c.bf16 %v142_v27, %v142_v27 }
  0xe7   :  { %v325_v30 = vpop.f32.mrf.mxu0 }
  0xe8   :  { %343 = vmatmul.mubr.bf16.vlgmr.msra.gmra.mxu1 %v143_v29 }
 0x1a8   :  { %v249_v32 = vpop.f32.mrf.mxu1 }
 0x1a9   :  { %v250_v33 = vadd.f32 %v279_v31, %v249_v32 }
 0x1aa   :  { %v344_v34 = vpop.f32.mrf.mxu1 }
 0x1ab   :  { %255 = vst [vmem:[#allocation2] sm:$0xff] %v250_v33 }
 0x1ac   :  { %v252_v35 = vpop.f32.mrf.mxu1 }
 0x1ad   :  { %376 = shalt.err (!%p373_p4)
}
 0x1ae   :  { %265 = dma.vmem_to_hbm [thread:$0]  %s263_s13, 128, %s497_s6, [#allocation3]   ;;  %v345_v36 = vpop.f32.mrf.mxu1 }
 0x1af   :  { %385 = dma.done.wait [#allocation3], 128  }
 0x1b0   :  { %386 = vsyncadd [#allocation3], 4294967168 }
 0x1b1   :  { %269 = vsyncpa [#allocation3], 1 }

</bundles_post_ra>
